<compile_context>
chip_gen: v7x
topology: tpu7x:2x2x1
jax: 0.10.0
libtpu: 0.0.40
codegen_flags: <defaults>
</compile_context>

<pallas_src>
import functools

import jax
import jax.numpy as jnp
from jax.experimental import pallas as pl
from jax.experimental.pallas import tpu as pltpu

BN_EPS = 1e-5
_LANE = 128
# M-tile (rows per grid step). 512+ is a good choice on v6e (128 MiB VMEM);
# halve for v7x (64 MiB physical VMEM); keep modest on v5e.
TILE_M = 256
_VMEM_LIMIT = 48 * 1024 * 1024


# ---------------------------------------------------------------------------
# Pallas kernels
# ---------------------------------------------------------------------------
def _conv1_shortcut_kernel(p_ref, w1_ref, ws_ref, b_ref, y1_ref, ys_ref, st_ref,
                           *, tile_m, m_real, cin_p):
    """conv1 (3x3 as matmul) + fused 1x1 shortcut conv + BN-stat accumulation."""
    i = pl.program_id(0)

    @pl.when(i == 0)
    def _init():
        st_ref[...] = jnp.zeros_like(st_ref)

    p = p_ref[...]                                                   # (tm, 9*cin_p) bf16
    acc1 = jnp.dot(p, w1_ref[...], preferred_element_type=jnp.float32) + b_ref[0:1, :]
    # Shortcut 1x1 conv: its input is exactly the centre tap (kh=1, kw=1)
    # of the conv1 patch -> lane-aligned static slice, shares the patch DMA.
    center = p[:, 4 * cin_p:5 * cin_p]
    accs = jnp.dot(center, ws_ref[...], preferred_element_type=jnp.float32) + b_ref[1:2, :]

    y1_ref[...] = acc1.astype(y1_ref.dtype)
    ys_ref[...] = accs.astype(ys_ref.dtype)

    # Mask rows that are only M-padding so they don't pollute the batch stats.
    row = i * tile_m + jax.lax.broadcasted_iota(jnp.int32, (tile_m, 1), 0)
    valid = (row < m_real).astype(jnp.float32)
    a1 = acc1 * valid
    a_s = accs * valid
    st = jnp.concatenate([
        jnp.sum(a1, axis=0, keepdims=True),          # row 0: sum  (conv1)
        jnp.sum(a1 * acc1, axis=0, keepdims=True),   # row 1: sumsq(conv1)
        jnp.sum(a_s, axis=0, keepdims=True),         # row 2: sum  (shortcut)
        jnp.sum(a_s * accs, axis=0, keepdims=True),  # row 3: sumsq(shortcut)
        jnp.zeros((4, acc1.shape[1]), jnp.float32),
    ], axis=0)
    st_ref[...] = st_ref[...] + st


def _conv2_kernel(p_ref, w_ref, b_ref, y_ref, st_ref, *, tile_m, m_real):
    """conv2 (3x3 as matmul) + BN-stat accumulation."""
    i = pl.program_id(0)

    @pl.when(i == 0)
    def _init():
        st_ref[...] = jnp.zeros_like(st_ref)

    acc = jnp.dot(p_ref[...], w_ref[...], preferred_element_type=jnp.float32) + b_ref[0:1, :]
    y_ref[...] = acc.astype(y_ref.dtype)

    row = i * tile_m + jax.lax.broadcasted_iota(jnp.int32, (tile_m, 1), 0)
    valid = (row < m_real).astype(jnp.float32)
    a = acc * valid
    st = jnp.concatenate([
        jnp.sum(a, axis=0, keepdims=True),
        jnp.sum(a * acc, axis=0, keepdims=True),
        jnp.zeros((6, acc.shape[1]), jnp.float32),
    ], axis=0)
    st_ref[...] = st_ref[...] + st


def _bn_scale_shift(sum_row, sq_row, gamma, beta, count):
    inv = 1.0 / count
    mean = sum_row * inv
    var = jnp.maximum(sq_row * inv - mean * mean, 0.0)   # biased variance
    scale = gamma * jax.lax.rsqrt(var + BN_EPS)
    shift = beta - mean * scale
    return scale, shift


def _bn_relu_kernel(y_ref, st_ref, gb_ref, out_ref, *, count):
    """bn1 (from accumulated global stats) + ReLU; emits bf16 for conv2 patches."""
    scale, shift = _bn_scale_shift(st_ref[0:1, :], st_ref[1:2, :],
                                   gb_ref[0:1, :], gb_ref[1:2, :], count)
    out_ref[...] = jnp.maximum(y_ref[...] * scale + shift, 0.0).astype(out_ref.dtype)


def _finalize_kernel(y2_ref, ys_ref, st2_ref, sts_ref, gb_ref, out_ref, *, count):
    """bn2 + shortcut-BN + residual add + ReLU."""
    sc2, sh2 = _bn_scale_shift(st2_ref[0:1, :], st2_ref[1:2, :],
                               gb_ref[0:1, :], gb_ref[1:2, :], count)
    scs, shs = _bn_scale_shift(sts_ref[2:3, :], sts_ref[3:4, :],
                               gb_ref[2:3, :], gb_ref[3:4, :], count)
    out = y2_ref[...] * sc2 + sh2 + ys_ref[...] * scs + shs
    out_ref[...] = jnp.maximum(out, 0.0).astype(out_ref.dtype)


# ---------------------------------------------------------------------------
# pallas_call wrappers (grids / BlockSpecs)
# ---------------------------------------------------------------------------
def _call_conv1_shortcut(p, w1, ws, bias, *, m_real, tile_m, cin_p, cout_p):
    m_pad, k1 = p.shape
    row_spec = pl.BlockSpec((tile_m, cout_p), lambda i: (i, 0))
    acc_spec = pl.BlockSpec((8, cout_p), lambda i: (0, 0))
    return pl.pallas_call(
        functools.partial(_conv1_shortcut_kernel,
                          tile_m=tile_m, m_real=m_real, cin_p=cin_p),
        grid=(m_pad // tile_m,),
        in_specs=[
            pl.BlockSpec((tile_m, k1), lambda i: (i, 0)),      # patch tile (bf16)
            pl.BlockSpec((k1, cout_p), lambda i: (0, 0)),      # w1 resident
            pl.BlockSpec((cin_p, cout_p), lambda i: (0, 0)),   # ws resident
            acc_spec,                                          # packed biases resident
        ],
        out_specs=[row_spec, row_spec, acc_spec],
        out_shape=[
            jax.ShapeDtypeStruct((m_pad, cout_p), jnp.float32),   # conv1 + b1 (pre-BN)
            jax.ShapeDtypeStruct((m_pad, cout_p), jnp.float32),   # shortcut + bs (pre-BN)
            jax.ShapeDtypeStruct((8, cout_p), jnp.float32),       # sum/sumsq accumulator
        ],
        compiler_params=pltpu.CompilerParams(
            dimension_semantics=("arbitrary",),   # stats accumulate across M tiles
            vmem_limit_bytes=_VMEM_LIMIT),
    )(p, w1, ws, bias)


def _call_conv2(p, w, bias, *, m_real, tile_m, cout_p):
    m_pad, k = p.shape
    row_spec = pl.BlockSpec((tile_m, cout_p), lambda i: (i, 0))
    acc_spec = pl.BlockSpec((8, cout_p), lambda i: (0, 0))
    return pl.pallas_call(
        functools.partial(_conv2_kernel, tile_m=tile_m, m_real=m_real),
        grid=(m_pad // tile_m,),
        in_specs=[
            pl.BlockSpec((tile_m, k), lambda i: (i, 0)),
            pl.BlockSpec((k, cout_p), lambda i: (0, 0)),
            acc_spec,
        ],
        out_specs=[row_spec, acc_spec],
        out_shape=[
            jax.ShapeDtypeStruct((m_pad, cout_p), jnp.float32),
            jax.ShapeDtypeStruct((8, cout_p), jnp.float32),
        ],
        compiler_params=pltpu.CompilerParams(
            dimension_semantics=("arbitrary",),
            vmem_limit_bytes=_VMEM_LIMIT),
    )(p, w, bias)


def _call_bn_relu(y, st, gb, *, count, tile_m, cout_p):
    m_pad = y.shape[0]
    row_spec = pl.BlockSpec((tile_m, cout_p), lambda i: (i, 0))
    vec_spec = pl.BlockSpec((8, cout_p), lambda i: (0, 0))
    return pl.pallas_call(
        functools.partial(_bn_relu_kernel, count=float(count)),
        grid=(m_pad // tile_m,),
        in_specs=[row_spec, vec_spec, vec_spec],
        out_specs=row_spec,
        out_shape=jax.ShapeDtypeStruct((m_pad, cout_p), jnp.bfloat16),
        compiler_params=pltpu.CompilerParams(
            dimension_semantics=("parallel",),
            vmem_limit_bytes=_VMEM_LIMIT),
    )(y, st, gb)


def _call_finalize(y2, ys, st2, sts, gb, *, count, tile_m, cout_p):
    m_pad = y2.shape[0]
    row_spec = pl.BlockSpec((tile_m, cout_p), lambda i: (i, 0))
    vec_spec = pl.BlockSpec((8, cout_p), lambda i: (0, 0))
    return pl.pallas_call(
        functools.partial(_finalize_kernel, count=float(count)),
        grid=(m_pad // tile_m,),
        in_specs=[row_spec, row_spec, vec_spec, vec_spec, vec_spec],
        out_specs=row_spec,
        out_shape=jax.ShapeDtypeStruct((m_pad, cout_p), jnp.float32),
        compiler_params=pltpu.CompilerParams(
            dimension_semantics=("parallel",),
            vmem_limit_bytes=_VMEM_LIMIT),
    )(y2, ys, st2, sts, gb)


# ---------------------------------------------------------------------------
# Glue (plain JAX): layout conversion, padding, im2col, param packing
# ---------------------------------------------------------------------------
def _round_up(x, m):
    return (x + m - 1) // m * m


def _im2col_3x3(xpad, stride):
    # xpad: (N, H+2, W+2, C) -> (N*Ho*Wo, 9*C), tap-major / channel-minor columns.
    n, hp, wp, c = xpad.shape
    h, w = hp - 2, wp - 2
    ho = (h - 1) // stride + 1
    wo = (w - 1) // stride + 1
    cols = []
    for kh in range(3):
        for kw in range(3):
            cols.append(
                xpad[:, kh:kh + (ho - 1) * stride + 1:stride,
                     kw:kw + (wo - 1) * stride + 1:stride, :])
    p = jnp.concatenate(cols, axis=-1)
    return p.reshape(n * ho * wo, 9 * c), ho, wo


def _pack_rows(vecs, cout, cout_p):
    """Stack per-channel (1, cout) vectors into one (8, cout_p) f32 tile."""
    out = jnp.zeros((8, cout_p), jnp.float32)
    for r, v in enumerate(vecs):
        out = out.at[r, :cout].set(v.reshape(-1).astype(jnp.float32))
    return out


def postres2d_forward(x_nchw, params, stride=1):
    """PostRes2d forward. x_nchw: (N, Cin, H, W) -> (N, Cout, Ho, Wo)."""
    x = jnp.transpose(x_nchw, (0, 2, 3, 1)).astype(jnp.float32)   # NHWC
    n, h, w, cin = x.shape
    cout = params["w1"].shape[-1]
    cin_p = _round_up(cin, _LANE)
    cout_p = _round_up(cout, _LANE)

    # ---- conv1 patches (channel-padded, bf16 for the MXU) -----------------
    xcp = jnp.pad(x, ((0, 0), (0, 0), (0, 0), (0, cin_p - cin))).astype(jnp.bfloat16)
    xpad = jnp.pad(xcp, ((0, 0), (1, 1), (1, 1), (0, 0)))
    p1, ho, wo = _im2col_3x3(xpad, stride)                        # (M, 9*cin_p)
    m = n * ho * wo
    m_pad = _round_up(m, TILE_M)
    p1 = jnp.pad(p1, ((0, m_pad - m), (0, 0)))

    # ---- weights / per-channel vectors (padded + packed) ------------------
    w1 = jnp.pad(params["w1"], ((0, 0), (0, 0), (0, cin_p - cin), (0, cout_p - cout)))
    w1 = w1.reshape(9 * cin_p, cout_p).astype(jnp.bfloat16)
    w2 = jnp.pad(params["w2"], ((0, 0), (0, 0), (0, cout_p - cout), (0, cout_p - cout)))
    w2 = w2.reshape(9 * cout_p, cout_p).astype(jnp.bfloat16)
    ws = jnp.pad(params["ws"], ((0, cin_p - cin), (0, cout_p - cout))).astype(jnp.bfloat16)

    bias_a = _pack_rows([params["b1"], params["bs"]], cout, cout_p)
    gb1 = _pack_rows([params["g1"], params["be1"]], cout, cout_p)
    bias_c = _pack_rows([params["b2"]], cout, cout_p)
    gb_fin = _pack_rows([params["g2"], params["be2"], params["gs"], params["bes"]],
                        cout, cout_p)

    # ---- pass 1: conv1 + fused 1x1 shortcut + BN stat accumulation --------
    y1, ys, st_a = _call_conv1_shortcut(p1, w1, ws, bias_a, m_real=m,
                                        tile_m=TILE_M, cin_p=cin_p, cout_p=cout_p)

    # ---- pass 2: bn1 + relu (hid emitted in bf16 for the conv2 patches) ---
    hid = _call_bn_relu(y1, st_a, gb1, count=m, tile_m=TILE_M, cout_p=cout_p)

    # ---- conv2 patches -----------------------------------------------------
    hidn = hid[:m].reshape(n, ho, wo, cout_p)
    hpad = jnp.pad(hidn, ((0, 0), (1, 1), (1, 1), (0, 0)))
    p2, _, _ = _im2col_3x3(hpad, 1)                               # (M, 9*cout_p)
    p2 = jnp.pad(p2, ((0, m_pad - m), (0, 0)))

    # ---- pass 3: conv2 + BN stat accumulation ------------------------------
    y2, st_c = _call_conv2(p2, w2, bias_c, m_real=m, tile_m=TILE_M, cout_p=cout_p)

    # ---- pass 4: bn2 + shortcut-BN + residual add + relu -------------------
    out = _call_finalize(y2, ys, st_c, st_a, gb_fin, count=m,
                         tile_m=TILE_M, cout_p=cout_p)

    out = out[:m, :cout].reshape(n, ho, wo, cout)
    return jnp.transpose(out, (0, 3, 1, 2))


# ---------------------------------------------------------------------------
# Deterministic parameter init (shapes from PostRes2d.__init__)
# ---------------------------------------------------------------------------
def init_params(key, n_in, n_out):
    ks = jax.random.split(key, 12)

    def conv_w(k, shape, fan_in):
        return jax.random.normal(k, shape, jnp.float32) / jnp.sqrt(float(fan_in))

    return dict(
        w1=conv_w(ks[0], (3, 3, n_in, n_out), 9 * n_in),     # HWIO
        b1=0.1 * jax.random.normal(ks[1], (1, n_out), jnp.float32),
        g1=1.0 + 0.1 * jax.random.normal(ks[2], (1, n_out), jnp.float32),
        be1=0.1 * jax.random.normal(ks[3], (1, n_out), jnp.float32),
        w2=conv_w(ks[4], (3, 3, n_out, n_out), 9 * n_out),
        b2=0.1 * jax.random.normal(ks[5], (1, n_out), jnp.float32),
        g2=1.0 + 0.1 * jax.random.normal(ks[6], (1, n_out), jnp.float32),
        be2=0.1 * jax.random.normal(ks[7], (1, n_out), jnp.float32),
        ws=conv_w(ks[8], (n_in, n_out), n_in),               # 1x1 conv as matrix
        bs=0.1 * jax.random.normal(ks[9], (1, n_out), jnp.float32),
        gs=1.0 + 0.1 * jax.random.normal(ks[10], (1, n_out), jnp.float32),
        bes=0.1 * jax.random.normal(ks[11], (1, n_out), jnp.float32),
    )


# ---------------------------------------------------------------------------
# Pure-JAX reference (lax.conv, f32 HIGHEST) for a correctness smoke test
# ---------------------------------------------------------------------------
def reference_forward(x_nchw, params, stride=1):
    x = jnp.transpose(x_nchw, (0, 2, 3, 1)).astype(jnp.float32)

    def bn(y, g, b):
        mu = jnp.mean(y, axis=(0, 1, 2), keepdims=True)
        var = jnp.mean(jnp.square(y - mu), axis=(0, 1, 2), keepdims=True)
        return (y - mu) * jax.lax.rsqrt(var + BN_EPS) * g.reshape(1, 1, 1, -1) \
            + b.reshape(1, 1, 1, -1)

    def conv(inp, w, s, pad):
        dn = jax.lax.conv_dimension_numbers(inp.shape, w.shape, ("NHWC", "HWIO", "NHWC"))
        return jax.lax.conv_general_dilated(
            inp, w, (s, s), ((pad, pad), (pad, pad)), dimension_numbers=dn,
            precision=jax.lax.Precision.HIGHEST)

    n_in, n_out = params["ws"].shape
    h = conv(x, params["w1"], stride, 1) + params["b1"].reshape(1, 1, 1, -1)
    h = jnp.maximum(bn(h, params["g1"], params["be1"]), 0.0)
    o = conv(h, params["w2"], 1, 1) + params["b2"].reshape(1, 1, 1, -1)
    o = bn(o, params["g2"], params["be2"])
    r = conv(x, params["ws"].reshape(1, 1, n_in, n_out), stride, 0)
    r = bn(r + params["bs"].reshape(1, 1, 1, -1), params["gs"], params["bes"])
    out = jnp.maximum(o + r, 0.0)
    return jnp.transpose(out, (0, 3, 1, 2))


if __name__ == "__main__":
    key = jax.random.PRNGKey(0)
    n_in, n_out, stride = 4, 8, 1            # n_out != n_in -> shortcut branch active
    N, H, W = 2, 16, 16

    kp, kx = jax.random.split(key)
    params = init_params(kp, n_in, n_out)
    x = jax.random.normal(kx, (N, n_in, H, W), jnp.float32)

    fwd = jax.jit(functools.partial(postres2d_forward, stride=stride))
    out = jax.block_until_ready(fwd(x, params))

    assert out.shape == (N, n_out, H, W), out.shape
    ref = reference_forward(x, params, stride=stride)
    err = jnp.abs(out - ref)
    max_err = float(jnp.max(err))
    mean_err = float(jnp.mean(err))
    # bf16 MXU matmuls vs an f32-HIGHEST reference: allow bf16-level tolerance.
    if not bool(jnp.isfinite(out).all()) or max_err > 1e-1 or mean_err > 2e-2:
        raise SystemExit(f"mismatch vs reference: max={max_err} mean={mean_err}")

    print("KERNEL_OK")
</pallas_src>

<mosaic_0001>
module attributes {stable_mosaic.version = 11 : i64} {
  func.func @_conv1_shortcut_kernel(%arg0: i32, %arg1: memref<256x1152xbf16, #tpu.memory_space<vmem>>, %arg2: memref<1152x128xbf16, #tpu.memory_space<vmem>>, %arg3: memref<128x128xbf16, #tpu.memory_space<vmem>>, %arg4: memref<8x128xf32, #tpu.memory_space<vmem>>, %arg5: memref<256x128xf32, #tpu.memory_space<vmem>>, %arg6: memref<256x128xf32, #tpu.memory_space<vmem>>, %arg7: memref<8x128xf32, #tpu.memory_space<vmem>>) attributes {dimension_semantics = [#tpu.dimension_semantics<arbitrary>], iteration_bounds = array<i64: 2>, scalar_prefetch = 0 : i64, scratch_operands = 0 : i64, tpu.core_type = #tpu.core_type<tc>, window_params = [{transform_indices = @transform_0, window_bounds = array<i64: 256, 1152>}, {pipeline_mode = #tpu.pipeline_mode<synchronous>, transform_indices = @transform_1, window_bounds = array<i64: 1152, 128>}, {pipeline_mode = #tpu.pipeline_mode<synchronous>, transform_indices = @transform_2, window_bounds = array<i64: 128, 128>}, {pipeline_mode = #tpu.pipeline_mode<synchronous>, transform_indices = @transform_3, window_bounds = array<i64: 8, 128>}, {transform_indices = @transform_4, window_bounds = array<i64: 256, 128>}, {transform_indices = @transform_5, window_bounds = array<i64: 256, 128>}, {pipeline_mode = #tpu.pipeline_mode<synchronous>, transform_indices = @transform_6, window_bounds = array<i64: 8, 128>}]} {
    %c0_i32 = arith.constant 0 : i32
    %0 = arith.cmpi eq, %arg0, %c0_i32 : i32
    %1 = arith.extui %0 : i1 to i32
    %c0_i32_0 = arith.constant 0 : i32
    %2 = arith.cmpi ne, %1, %c0_i32_0 : i32
    scf.if %2 {
      %cst_23 = arith.constant 0.000000e+00 : f32
      %44 = vector.broadcast %cst_23 : f32 to vector<8x128xf32>
      %c0_24 = arith.constant 0 : index
      %c0_25 = arith.constant 0 : index
      %45 = vector.load %arg7[%c0_24, %c0_25] : memref<8x128xf32, #tpu.memory_space<vmem>>, vector<8x128xf32>
      tpu.vector_store %arg7[%c0_24, %c0_25], %44 {strides = array<i32>} : memref<8x128xf32, #tpu.memory_space<vmem>>, vector<8x128xf32>,
    } else {
    }
    %c0 = arith.constant 0 : index
    %c0_1 = arith.constant 0 : index
    %3 = vector.load %arg1[%c0, %c0_1] : memref<256x1152xbf16, #tpu.memory_space<vmem>>, vector<256x1152xbf16>
    %c0_2 = arith.constant 0 : index
    %c0_3 = arith.constant 0 : index
    %4 = vector.load %arg2[%c0_2, %c0_3] : memref<1152x128xbf16, #tpu.memory_space<vmem>>, vector<1152x128xbf16>
    %cst = arith.constant dense<0.000000e+00> : vector<256x128xf32>
    %5 = tpu.matmul %3, %4, %cst {dimension_numbers = #tpu.dot_dimension_numbers<[1], [0], [0], [1], [0, 0, 1, 1], [], []>} : vector<256x1152xbf16>, vector<1152x128xbf16>, vector<256x128xf32> -> vector<256x128xf32>
    %c0_4 = arith.constant 0 : index
    %c0_5 = arith.constant 0 : index
    %6 = vector.load %arg4[%c0_4, %c0_5] : memref<8x128xf32, #tpu.memory_space<vmem>>, vector<1x128xf32>
    %7 = vector.broadcast %6 : vector<1x128xf32> to vector<256x128xf32>
    %8 = arith.addf %5, %7 : vector<256x128xf32>
    %9 = vector.extract_strided_slice %3 {offsets = [0, 512], sizes = [256, 128], strides = [1, 1]} : vector<256x1152xbf16> to vector<256x128xbf16>
    %c0_6 = arith.constant 0 : index
    %c0_7 = arith.constant 0 : index
    %10 = vector.load %arg3[%c0_6, %c0_7] : memref<128x128xbf16, #tpu.memory_space<vmem>>, vector<128x128xbf16>
    %cst_8 = arith.constant dense<0.000000e+00> : vector<256x128xf32>
    %11 = tpu.matmul %9, %10, %cst_8 {dimension_numbers = #tpu.dot_dimension_numbers<[1], [0], [0], [1], [0, 0, 1, 1], [], []>} : vector<256x128xbf16>, vector<128x128xbf16>, vector<256x128xf32> -> vector<256x128xf32>
    %c1 = arith.constant 1 : index
    %c0_9 = arith.constant 0 : index
    %12 = vector.load %arg4[%c1, %c0_9] : memref<8x128xf32, #tpu.memory_space<vmem>>, vector<1x128xf32>
    %13 = vector.broadcast %12 : vector<1x128xf32> to vector<256x128xf32>
    %14 = arith.addf %11, %13 : vector<256x128xf32>
    %c0_10 = arith.constant 0 : index
    %c0_11 = arith.constant 0 : index
    %15 = vector.load %arg5[%c0_10, %c0_11] : memref<256x128xf32, #tpu.memory_space<vmem>>, vector<256x128xf32>
    tpu.vector_store %arg5[%c0_10, %c0_11], %8 {strides = array<i32>} : memref<256x128xf32, #tpu.memory_space<vmem>>, vector<256x128xf32>,
    %c0_12 = arith.constant 0 : index
    %c0_13 = arith.constant 0 : index
    %16 = vector.load %arg6[%c0_12, %c0_13] : memref<256x128xf32, #tpu.memory_space<vmem>>, vector<256x128xf32>
    tpu.vector_store %arg6[%c0_12, %c0_13], %14 {strides = array<i32>} : memref<256x128xf32, #tpu.memory_space<vmem>>, vector<256x128xf32>,
    %c256_i32 = arith.constant 256 : i32
    %17 = arith.muli %arg0, %c256_i32 : i32
    %18 = tpu.iota {dimensions = array<i32: 0>} : vector<256x1xi32>
    %19 = vector.broadcast %17 : i32 to vector<256x1xi32>
    %20 = arith.addi %19, %18 : vector<256x1xi32>
    %c512_i32 = arith.constant 512 : i32
    %21 = vector.broadcast %c512_i32 : i32 to vector<256x1xi32>
    %22 = arith.cmpi slt, %20, %21 : vector<256x1xi32>
    %23 = arith.extui %22 : vector<256x1xi1> to vector<256x1xi32>
    %24 = arith.sitofp %23 : vector<256x1xi32> to vector<256x1xf32>
    %25 = vector.broadcast %24 : vector<256x1xf32> to vector<256x128xf32>
    %26 = arith.mulf %8, %25 : vector<256x128xf32>
    %27 = vector.broadcast %24 : vector<256x1xf32> to vector<256x128xf32>
    %28 = arith.mulf %14, %27 : vector<256x128xf32>
    %cst_14 = arith.constant dense<0.000000e+00> : vector<128xf32>
    %29 = vector.multi_reduction <add>, %26, %cst_14 [0] : vector<256x128xf32> to vector<128xf32>
    %30 = vector.shape_cast %29 : vector<128xf32> to vector<1x128xf32>
    %31 = arith.mulf %26, %8 : vector<256x128xf32>
    %cst_15 = arith.constant dense<0.000000e+00> : vector<128xf32>
    %32 = vector.multi_reduction <add>, %31, %cst_15 [0] : vector<256x128xf32> to vector<128xf32>
    %33 = vector.shape_cast %32 : vector<128xf32> to vector<1x128xf32>
    %cst_16 = arith.constant dense<0.000000e+00> : vector<128xf32>
    %34 = vector.multi_reduction <add>, %28, %cst_16 [0] : vector<256x128xf32> to vector<128xf32>
    %35 = vector.shape_cast %34 : vector<128xf32> to vector<1x128xf32>
    %36 = arith.mulf %28, %14 : vector<256x128xf32>
    %cst_17 = arith.constant dense<0.000000e+00> : vector<128xf32>
    %37 = vector.multi_reduction <add>, %36, %cst_17 [0] : vector<256x128xf32> to vector<128xf32>
    %38 = vector.shape_cast %37 : vector<128xf32> to vector<1x128xf32>
    %cst_18 = arith.constant 0.000000e+00 : f32
    %39 = vector.broadcast %cst_18 : f32 to vector<4x128xf32>
    %40 = tpu.concatenate %30, %33, %35, %38, %39 in 0 : vector<1x128xf32>, vector<1x128xf32>, vector<1x128xf32>, vector<1x128xf32>, vector<4x128xf32> -> vector<8x128xf32>
    %c0_19 = arith.constant 0 : index
    %c0_20 = arith.constant 0 : index
    %41 = vector.load %arg7[%c0_19, %c0_20] : memref<8x128xf32, #tpu.memory_space<vmem>>, vector<8x128xf32>
    %42 = arith.addf %41, %40 : vector<8x128xf32>
    %c0_21 = arith.constant 0 : index
    %c0_22 = arith.constant 0 : index
    %43 = vector.load %arg7[%c0_21, %c0_22] : memref<8x128xf32, #tpu.memory_space<vmem>>, vector<8x128xf32>
    tpu.vector_store %arg7[%c0_21, %c0_22], %42 {strides = array<i32>} : memref<8x128xf32, #tpu.memory_space<vmem>>, vector<8x128xf32>,
    return
  }
  func.func @transform_0(%arg0: i32) -> (i32, i32) {
    %c0_i32 = arith.constant 0 : i32
    %c0_i32_0 = arith.constant 0 : i32
    return %arg0, %c0_i32 : i32, i32
  }
  func.func @transform_1(%arg0: i32) -> (i32, i32) {
    %c0_i32 = arith.constant 0 : i32
    %c0_i32_0 = arith.constant 0 : i32
    %c0_i32_1 = arith.constant 0 : i32
    return %c0_i32, %c0_i32_0 : i32, i32
  }
  func.func @transform_2(%arg0: i32) -> (i32, i32) {
    %c0_i32 = arith.constant 0 : i32
    %c0_i32_0 = arith.constant 0 : i32
    %c0_i32_1 = arith.constant 0 : i32
    return %c0_i32, %c0_i32_0 : i32, i32
  }
  func.func @transform_3(%arg0: i32) -> (i32, i32) {
    %c0_i32 = arith.constant 0 : i32
    %c0_i32_0 = arith.constant 0 : i32
    %c0_i32_1 = arith.constant 0 : i32
    return %c0_i32, %c0_i32_0 : i32, i32
  }
  func.func @transform_4(%arg0: i32) -> (i32, i32) {
    %c0_i32 = arith.constant 0 : i32
    %c0_i32_0 = arith.constant 0 : i32
    return %arg0, %c0_i32 : i32, i32
  }
  func.func @transform_5(%arg0: i32) -> (i32, i32) {
    %c0_i32 = arith.constant 0 : i32
    %c0_i32_0 = arith.constant 0 : i32
    return %arg0, %c0_i32 : i32, i32
  }
  func.func @transform_6(%arg0: i32) -> (i32, i32) {
    %c0_i32 = arith.constant 0 : i32
    %c0_i32_0 = arith.constant 0 : i32
    %c0_i32_1 = arith.constant 0 : i32
    return %c0_i32, %c0_i32_0 : i32, i32
  }
}

module attributes {stable_mosaic.version = 11 : i64} {
  func.func @_bn_relu_kernel(%arg0: i32, %arg1: memref<256x128xf32, #tpu.memory_space<vmem>>, %arg2: memref<8x128xf32, #tpu.memory_space<vmem>>, %arg3: memref<8x128xf32, #tpu.memory_space<vmem>>, %arg4: memref<256x128xbf16, #tpu.memory_space<vmem>>) attributes {dimension_semantics = [#tpu.dimension_semantics<parallel>], iteration_bounds = array<i64: 2>, scalar_prefetch = 0 : i64, scratch_operands = 0 : i64, tpu.core_type = #tpu.core_type<tc>, window_params = [{transform_indices = @transform_0, window_bounds = array<i64: 256, 128>}, {pipeline_mode = #tpu.pipeline_mode<synchronous>, transform_indices = @transform_1, window_bounds = array<i64: 8, 128>}, {pipeline_mode = #tpu.pipeline_mode<synchronous>, transform_indices = @transform_2, window_bounds = array<i64: 8, 128>}, {transform_indices = @transform_3, window_bounds = array<i64: 256, 128>}]} {
    %c0 = arith.constant 0 : index
    %c0_0 = arith.constant 0 : index
    %0 = vector.load %arg2[%c0, %c0_0] : memref<8x128xf32, #tpu.memory_space<vmem>>, vector<1x128xf32>
    %c1 = arith.constant 1 : index
    %c0_1 = arith.constant 0 : index
    %1 = vector.load %arg2[%c1, %c0_1] : memref<8x128xf32, #tpu.memory_space<vmem>>, vector<1x128xf32>
    %c0_2 = arith.constant 0 : index
    %c0_3 = arith.constant 0 : index
    %2 = vector.load %arg3[%c0_2, %c0_3] : memref<8x128xf32, #tpu.memory_space<vmem>>, vector<1x128xf32>
    %c1_4 = arith.constant 1 : index
    %c0_5 = arith.constant 0 : index
    %3 = vector.load %arg3[%c1_4, %c0_5] : memref<8x128xf32, #tpu.memory_space<vmem>>, vector<1x128xf32>
    %cst = arith.constant 0.001953125 : f32
    %4 = vector.broadcast %cst : f32 to vector<1x128xf32>
    %5 = arith.mulf %0, %4 : vector<1x128xf32>
    %cst_6 = arith.constant 0.001953125 : f32
    %6 = vector.broadcast %cst_6 : f32 to vector<1x128xf32>
    %7 = arith.mulf %1, %6 : vector<1x128xf32>
    %8 = arith.mulf %5, %5 : vector<1x128xf32>
    %9 = arith.subf %7, %8 : vector<1x128xf32>
    %cst_7 = arith.constant 0.000000e+00 : f32
    %10 = vector.broadcast %cst_7 : f32 to vector<1x128xf32>
    %11 = arith.maximumf %9, %10 : vector<1x128xf32>
    %cst_8 = arith.constant 9.99999974E-6 : f32
    %12 = vector.broadcast %cst_8 : f32 to vector<1x128xf32>
    %13 = arith.addf %11, %12 : vector<1x128xf32>
    %14 = math.rsqrt %13 : vector<1x128xf32>
    %15 = arith.mulf %2, %14 : vector<1x128xf32>
    %16 = arith.mulf %5, %15 : vector<1x128xf32>
    %17 = arith.subf %3, %16 : vector<1x128xf32>
    %c0_9 = arith.constant 0 : index
    %c0_10 = arith.constant 0 : index
    %18 = vector.load %arg1[%c0_9, %c0_10] : memref<256x128xf32, #tpu.memory_space<vmem>>, vector<256x128xf32>
    %19 = vector.broadcast %15 : vector<1x128xf32> to vector<256x128xf32>
    %20 = arith.mulf %18, %19 : vector<256x128xf32>
    %21 = vector.broadcast %17 : vector<1x128xf32> to vector<256x128xf32>
    %22 = arith.addf %20, %21 : vector<256x128xf32>
    %cst_11 = arith.constant 0.000000e+00 : f32
    %23 = vector.broadcast %cst_11 : f32 to vector<256x128xf32>
    %24 = arith.maximumf %22, %23 : vector<256x128xf32>
    %25 = arith.truncf %24 : vector<256x128xf32> to vector<256x128xbf16>
    %c0_12 = arith.constant 0 : index
    %c0_13 = arith.constant 0 : index
    %26 = vector.load %arg4[%c0_12, %c0_13] : memref<256x128xbf16, #tpu.memory_space<vmem>>, vector<256x128xbf16>
    tpu.vector_store %arg4[%c0_12, %c0_13], %25 {strides = array<i32>} : memref<256x128xbf16, #tpu.memory_space<vmem>>, vector<256x128xbf16>,
    return
  }
  func.func @transform_0(%arg0: i32) -> (i32, i32) {
    %c0_i32 = arith.constant 0 : i32
    %c0_i32_0 = arith.constant 0 : i32
    return %arg0, %c0_i32 : i32, i32
  }
  func.func @transform_1(%arg0: i32) -> (i32, i32) {
    %c0_i32 = arith.constant 0 : i32
    %c0_i32_0 = arith.constant 0 : i32
    %c0_i32_1 = arith.constant 0 : i32
    return %c0_i32, %c0_i32_0 : i32, i32
  }
  func.func @transform_2(%arg0: i32) -> (i32, i32) {
    %c0_i32 = arith.constant 0 : i32
    %c0_i32_0 = arith.constant 0 : i32
    %c0_i32_1 = arith.constant 0 : i32
    return %c0_i32, %c0_i32_0 : i32, i32
  }
  func.func @transform_3(%arg0: i32) -> (i32, i32) {
    %c0_i32 = arith.constant 0 : i32
    %c0_i32_0 = arith.constant 0 : i32
    return %arg0, %c0_i32 : i32, i32
  }
}

module attributes {stable_mosaic.version = 11 : i64} {
  func.func @_conv2_kernel(%arg0: i32, %arg1: memref<256x1152xbf16, #tpu.memory_space<vmem>>, %arg2: memref<1152x128xbf16, #tpu.memory_space<vmem>>, %arg3: memref<8x128xf32, #tpu.memory_space<vmem>>, %arg4: memref<256x128xf32, #tpu.memory_space<vmem>>, %arg5: memref<8x128xf32, #tpu.memory_space<vmem>>) attributes {dimension_semantics = [#tpu.dimension_semantics<arbitrary>], iteration_bounds = array<i64: 2>, scalar_prefetch = 0 : i64, scratch_operands = 0 : i64, tpu.core_type = #tpu.core_type<tc>, window_params = [{transform_indices = @transform_0, window_bounds = array<i64: 256, 1152>}, {pipeline_mode = #tpu.pipeline_mode<synchronous>, transform_indices = @transform_1, window_bounds = array<i64: 1152, 128>}, {pipeline_mode = #tpu.pipeline_mode<synchronous>, transform_indices = @transform_2, window_bounds = array<i64: 8, 128>}, {transform_indices = @transform_3, window_bounds = array<i64: 256, 128>}, {pipeline_mode = #tpu.pipeline_mode<synchronous>, transform_indices = @transform_4, window_bounds = array<i64: 8, 128>}]} {
    %c0_i32 = arith.constant 0 : i32
    %0 = arith.cmpi eq, %arg0, %c0_i32 : i32
    %1 = arith.extui %0 : i1 to i32
    %c0_i32_0 = arith.constant 0 : i32
    %2 = arith.cmpi ne, %1, %c0_i32_0 : i32
    scf.if %2 {
      %cst_15 = arith.constant 0.000000e+00 : f32
      %30 = vector.broadcast %cst_15 : f32 to vector<8x128xf32>
      %c0_16 = arith.constant 0 : index
      %c0_17 = arith.constant 0 : index
      %31 = vector.load %arg5[%c0_16, %c0_17] : memref<8x128xf32, #tpu.memory_space<vmem>>, vector<8x128xf32>
      tpu.vector_store %arg5[%c0_16, %c0_17], %30 {strides = array<i32>} : memref<8x128xf32, #tpu.memory_space<vmem>>, vector<8x128xf32>,
    } else {
    }
    %c0 = arith.constant 0 : index
    %c0_1 = arith.constant 0 : index
    %3 = vector.load %arg1[%c0, %c0_1] : memref<256x1152xbf16, #tpu.memory_space<vmem>>, vector<256x1152xbf16>
    %c0_2 = arith.constant 0 : index
    %c0_3 = arith.constant 0 : index
    %4 = vector.load %arg2[%c0_2, %c0_3] : memref<1152x128xbf16, #tpu.memory_space<vmem>>, vector<1152x128xbf16>
    %cst = arith.constant dense<0.000000e+00> : vector<256x128xf32>
    %5 = tpu.matmul %3, %4, %cst {dimension_numbers = #tpu.dot_dimension_numbers<[1], [0], [0], [1], [0, 0, 1, 1], [], []>} : vector<256x1152xbf16>, vector<1152x128xbf16>, vector<256x128xf32> -> vector<256x128xf32>
    %c0_4 = arith.constant 0 : index
    %c0_5 = arith.constant 0 : index
    %6 = vector.load %arg3[%c0_4, %c0_5] : memref<8x128xf32, #tpu.memory_space<vmem>>, vector<1x128xf32>
    %7 = vector.broadcast %6 : vector<1x128xf32> to vector<256x128xf32>
    %8 = arith.addf %5, %7 : vector<256x128xf32>
    %c0_6 = arith.constant 0 : index
    %c0_7 = arith.constant 0 : index
    %9 = vector.load %arg4[%c0_6, %c0_7] : memref<256x128xf32, #tpu.memory_space<vmem>>, vector<256x128xf32>
    tpu.vector_store %arg4[%c0_6, %c0_7], %8 {strides = array<i32>} : memref<256x128xf32, #tpu.memory_space<vmem>>, vector<256x128xf32>,
    %c256_i32 = arith.constant 256 : i32
    %10 = arith.muli %arg0, %c256_i32 : i32
    %11 = tpu.iota {dimensions = array<i32: 0>} : vector<256x1xi32>
    %12 = vector.broadcast %10 : i32 to vector<256x1xi32>
    %13 = arith.addi %12, %11 : vector<256x1xi32>
    %c512_i32 = arith.constant 512 : i32
    %14 = vector.broadcast %c512_i32 : i32 to vector<256x1xi32>
    %15 = arith.cmpi slt, %13, %14 : vector<256x1xi32>
    %16 = arith.extui %15 : vector<256x1xi1> to vector<256x1xi32>
    %17 = arith.sitofp %16 : vector<256x1xi32> to vector<256x1xf32>
    %18 = vector.broadcast %17 : vector<256x1xf32> to vector<256x128xf32>
    %19 = arith.mulf %8, %18 : vector<256x128xf32>
    %cst_8 = arith.constant dense<0.000000e+00> : vector<128xf32>
    %20 = vector.multi_reduction <add>, %19, %cst_8 [0] : vector<256x128xf32> to vector<128xf32>
    %21 = vector.shape_cast %20 : vector<128xf32> to vector<1x128xf32>
    %22 = arith.mulf %19, %8 : vector<256x128xf32>
    %cst_9 = arith.constant dense<0.000000e+00> : vector<128xf32>
    %23 = vector.multi_reduction <add>, %22, %cst_9 [0] : vector<256x128xf32> to vector<128xf32>
    %24 = vector.shape_cast %23 : vector<128xf32> to vector<1x128xf32>
    %cst_10 = arith.constant 0.000000e+00 : f32
    %25 = vector.broadcast %cst_10 : f32 to vector<6x128xf32>
    %26 = tpu.concatenate %21, %24, %25 in 0 : vector<1x128xf32>, vector<1x128xf32>, vector<6x128xf32> -> vector<8x128xf32>
    %c0_11 = arith.constant 0 : index
    %c0_12 = arith.constant 0 : index
    %27 = vector.load %arg5[%c0_11, %c0_12] : memref<8x128xf32, #tpu.memory_space<vmem>>, vector<8x128xf32>
    %28 = arith.addf %27, %26 : vector<8x128xf32>
    %c0_13 = arith.constant 0 : index
    %c0_14 = arith.constant 0 : index
    %29 = vector.load %arg5[%c0_13, %c0_14] : memref<8x128xf32, #tpu.memory_space<vmem>>, vector<8x128xf32>
    tpu.vector_store %arg5[%c0_13, %c0_14], %28 {strides = array<i32>} : memref<8x128xf32, #tpu.memory_space<vmem>>, vector<8x128xf32>,
    return
  }
  func.func @transform_0(%arg0: i32) -> (i32, i32) {
    %c0_i32 = arith.constant 0 : i32
    %c0_i32_0 = arith.constant 0 : i32
    return %arg0, %c0_i32 : i32, i32
  }
  func.func @transform_1(%arg0: i32) -> (i32, i32) {
    %c0_i32 = arith.constant 0 : i32
    %c0_i32_0 = arith.constant 0 : i32
    %c0_i32_1 = arith.constant 0 : i32
    return %c0_i32, %c0_i32_0 : i32, i32
  }
  func.func @transform_2(%arg0: i32) -> (i32, i32) {
    %c0_i32 = arith.constant 0 : i32
    %c0_i32_0 = arith.constant 0 : i32
    %c0_i32_1 = arith.constant 0 : i32
    return %c0_i32, %c0_i32_0 : i32, i32
  }
  func.func @transform_3(%arg0: i32) -> (i32, i32) {
    %c0_i32 = arith.constant 0 : i32
    %c0_i32_0 = arith.constant 0 : i32
    return %arg0, %c0_i32 : i32, i32
  }
  func.func @transform_4(%arg0: i32) -> (i32, i32) {
    %c0_i32 = arith.constant 0 : i32
    %c0_i32_0 = arith.constant 0 : i32
    %c0_i32_1 = arith.constant 0 : i32
    return %c0_i32, %c0_i32_0 : i32, i32
  }
}

module attributes {stable_mosaic.version = 11 : i64} {
  func.func @_finalize_kernel(%arg0: i32, %arg1: memref<256x128xf32, #tpu.memory_space<vmem>>, %arg2: memref<256x128xf32, #tpu.memory_space<vmem>>, %arg3: memref<8x128xf32, #tpu.memory_space<vmem>>, %arg4: memref<8x128xf32, #tpu.memory_space<vmem>>, %arg5: memref<8x128xf32, #tpu.memory_space<vmem>>, %arg6: memref<256x128xf32, #tpu.memory_space<vmem>>) attributes {dimension_semantics = [#tpu.dimension_semantics<parallel>], iteration_bounds = array<i64: 2>, scalar_prefetch = 0 : i64, scratch_operands = 0 : i64, tpu.core_type = #tpu.core_type<tc>, window_params = [{transform_indices = @transform_0, window_bounds = array<i64: 256, 128>}, {transform_indices = @transform_1, window_bounds = array<i64: 256, 128>}, {pipeline_mode = #tpu.pipeline_mode<synchronous>, transform_indices = @transform_2, window_bounds = array<i64: 8, 128>}, {pipeline_mode = #tpu.pipeline_mode<synchronous>, transform_indices = @transform_3, window_bounds = array<i64: 8, 128>}, {pipeline_mode = #tpu.pipeline_mode<synchronous>, transform_indices = @transform_4, window_bounds = array<i64: 8, 128>}, {transform_indices = @transform_5, window_bounds = array<i64: 256, 128>}]} {
    %c0 = arith.constant 0 : index
    %c0_0 = arith.constant 0 : index
    %0 = vector.load %arg3[%c0, %c0_0] : memref<8x128xf32, #tpu.memory_space<vmem>>, vector<1x128xf32>
    %c1 = arith.constant 1 : index
    %c0_1 = arith.constant 0 : index
    %1 = vector.load %arg3[%c1, %c0_1] : memref<8x128xf32, #tpu.memory_space<vmem>>, vector<1x128xf32>
    %c0_2 = arith.constant 0 : index
    %c0_3 = arith.constant 0 : index
    %2 = vector.load %arg5[%c0_2, %c0_3] : memref<8x128xf32, #tpu.memory_space<vmem>>, vector<1x128xf32>
    %c1_4 = arith.constant 1 : index
    %c0_5 = arith.constant 0 : index
    %3 = vector.load %arg5[%c1_4, %c0_5] : memref<8x128xf32, #tpu.memory_space<vmem>>, vector<1x128xf32>
    %cst = arith.constant 0.001953125 : f32
    %4 = vector.broadcast %cst : f32 to vector<1x128xf32>
    %5 = arith.mulf %0, %4 : vector<1x128xf32>
    %cst_6 = arith.constant 0.001953125 : f32
    %6 = vector.broadcast %cst_6 : f32 to vector<1x128xf32>
    %7 = arith.mulf %1, %6 : vector<1x128xf32>
    %8 = arith.mulf %5, %5 : vector<1x128xf32>
    %9 = arith.subf %7, %8 : vector<1x128xf32>
    %cst_7 = arith.constant 0.000000e+00 : f32
    %10 = vector.broadcast %cst_7 : f32 to vector<1x128xf32>
    %11 = arith.maximumf %9, %10 : vector<1x128xf32>
    %cst_8 = arith.constant 9.99999974E-6 : f32
    %12 = vector.broadcast %cst_8 : f32 to vector<1x128xf32>
    %13 = arith.addf %11, %12 : vector<1x128xf32>
    %14 = math.rsqrt %13 : vector<1x128xf32>
    %15 = arith.mulf %2, %14 : vector<1x128xf32>
    %16 = arith.mulf %5, %15 : vector<1x128xf32>
    %17 = arith.subf %3, %16 : vector<1x128xf32>
    %c2 = arith.constant 2 : index
    %c0_9 = arith.constant 0 : index
    %18 = vector.load %arg4[%c2, %c0_9] : memref<8x128xf32, #tpu.memory_space<vmem>>, vector<1x128xf32>
    %c3 = arith.constant 3 : index
    %c0_10 = arith.constant 0 : index
    %19 = vector.load %arg4[%c3, %c0_10] : memref<8x128xf32, #tpu.memory_space<vmem>>, vector<1x128xf32>
    %c2_11 = arith.constant 2 : index
    %c0_12 = arith.constant 0 : index
    %20 = vector.load %arg5[%c2_11, %c0_12] : memref<8x128xf32, #tpu.memory_space<vmem>>, vector<1x128xf32>
    %c3_13 = arith.constant 3 : index
    %c0_14 = arith.constant 0 : index
    %21 = vector.load %arg5[%c3_13, %c0_14] : memref<8x128xf32, #tpu.memory_space<vmem>>, vector<1x128xf32>
    %cst_15 = arith.constant 0.001953125 : f32
    %22 = vector.broadcast %cst_15 : f32 to vector<1x128xf32>
    %23 = arith.mulf %18, %22 : vector<1x128xf32>
    %cst_16 = arith.constant 0.001953125 : f32
    %24 = vector.broadcast %cst_16 : f32 to vector<1x128xf32>
    %25 = arith.mulf %19, %24 : vector<1x128xf32>
    %26 = arith.mulf %23, %23 : vector<1x128xf32>
    %27 = arith.subf %25, %26 : vector<1x128xf32>
    %cst_17 = arith.constant 0.000000e+00 : f32
    %28 = vector.broadcast %cst_17 : f32 to vector<1x128xf32>
    %29 = arith.maximumf %27, %28 : vector<1x128xf32>
    %cst_18 = arith.constant 9.99999974E-6 : f32
    %30 = vector.broadcast %cst_18 : f32 to vector<1x128xf32>
    %31 = arith.addf %29, %30 : vector<1x128xf32>
    %32 = math.rsqrt %31 : vector<1x128xf32>
    %33 = arith.mulf %20, %32 : vector<1x128xf32>
    %34 = arith.mulf %23, %33 : vector<1x128xf32>
    %35 = arith.subf %21, %34 : vector<1x128xf32>
    %c0_19 = arith.constant 0 : index
    %c0_20 = arith.constant 0 : index
    %36 = vector.load %arg1[%c0_19, %c0_20] : memref<256x128xf32, #tpu.memory_space<vmem>>, vector<256x128xf32>
    %37 = vector.broadcast %15 : vector<1x128xf32> to vector<256x128xf32>
    %38 = arith.mulf %36, %37 : vector<256x128xf32>
    %39 = vector.broadcast %17 : vector<1x128xf32> to vector<256x128xf32>
    %40 = arith.addf %38, %39 : vector<256x128xf32>
    %c0_21 = arith.constant 0 : index
    %c0_22 = arith.constant 0 : index
    %41 = vector.load %arg2[%c0_21, %c0_22] : memref<256x128xf32, #tpu.memory_space<vmem>>, vector<256x128xf32>
    %42 = vector.broadcast %33 : vector<1x128xf32> to vector<256x128xf32>
    %43 = arith.mulf %41, %42 : vector<256x128xf32>
    %44 = arith.addf %40, %43 : vector<256x128xf32>
    %45 = vector.broadcast %35 : vector<1x128xf32> to vector<256x128xf32>
    %46 = arith.addf %44, %45 : vector<256x128xf32>
    %cst_23 = arith.constant 0.000000e+00 : f32
    %47 = vector.broadcast %cst_23 : f32 to vector<256x128xf32>
    %48 = arith.maximumf %46, %47 : vector<256x128xf32>
    %c0_24 = arith.constant 0 : index
    %c0_25 = arith.constant 0 : index
    %49 = vector.load %arg6[%c0_24, %c0_25] : memref<256x128xf32, #tpu.memory_space<vmem>>, vector<256x128xf32>
    tpu.vector_store %arg6[%c0_24, %c0_25], %48 {strides = array<i32>} : memref<256x128xf32, #tpu.memory_space<vmem>>, vector<256x128xf32>,
    return
  }
  func.func @transform_0(%arg0: i32) -> (i32, i32) {
    %c0_i32 = arith.constant 0 : i32
    %c0_i32_0 = arith.constant 0 : i32
    return %arg0, %c0_i32 : i32, i32
  }
  func.func @transform_1(%arg0: i32) -> (i32, i32) {
    %c0_i32 = arith.constant 0 : i32
    %c0_i32_0 = arith.constant 0 : i32
    return %arg0, %c0_i32 : i32, i32
  }
  func.func @transform_2(%arg0: i32) -> (i32, i32) {
    %c0_i32 = arith.constant 0 : i32
    %c0_i32_0 = arith.constant 0 : i32
    %c0_i32_1 = arith.constant 0 : i32
    return %c0_i32, %c0_i32_0 : i32, i32
  }
  func.func @transform_3(%arg0: i32) -> (i32, i32) {
    %c0_i32 = arith.constant 0 : i32
    %c0_i32_0 = arith.constant 0 : i32
    %c0_i32_1 = arith.constant 0 : i32
    return %c0_i32, %c0_i32_0 : i32, i32
  }
  func.func @transform_4(%arg0: i32) -> (i32, i32) {
    %c0_i32 = arith.constant 0 : i32
    %c0_i32_0 = arith.constant 0 : i32
    %c0_i32_1 = arith.constant 0 : i32
    return %c0_i32, %c0_i32_0 : i32, i32
  }
  func.func @transform_5(%arg0: i32) -> (i32, i32) {
    %c0_i32 = arith.constant 0 : i32
    %c0_i32_0 = arith.constant 0 : i32
    return %arg0, %c0_i32 : i32, i32
  }
}

</mosaic_0001>

<bundles_post_ra>
// kernel: postres2d_forward.5
= control target key start
LH: loop header
LB: loop body
LE: loop exit
PB: predicated region body
PF: predicated region fallthrough
CT: control target
= control target key end

     0   :  { %s748_s12 = smov 0   ;;  %s901_s0 = inlined_call_operand.vmem [shape: f32[512,128], index: 0, kind: input, shape index: {}]   ;;  %s902_s1 = inlined_call_operand.vmem [shape: f32[8,128], index: 1, kind: input, shape index: {}]   ;;  %s903_s2 = inlined_call_operand.vmem [shape: f32[8,128], index: 2, kind: input, shape index: {}]   ;;  %s904_s3 = inlined_call_operand.vmem [shape: bf16[512,128], index: 3, kind: output, shape index: {}]  }
   0x1 LB: > { %s540_s13 = sadd.s32 4294967295, %s726_s12   ;;  %p544_p0 = scmp.ge.s32.totalorder %s726_s12, 1  ;;  %s726_s12 = sphi %s748_s12, %s13_s12  }
   0x2   : > { %p138_p1 = scmp.lt.s32.totalorder %s726_s12, 3 }
   0x4   : > { %p139_p2 = pnand %p544_p0, %p138_p1 }
   0x5   : > { %v174_v0 = vld [vmem:[%s902_s1] sm:$0x1] (!%p139_p2)  ;;  %v175_v1 = vld [vmem:[%s902_s1 + $0x1] sm:$0x1] (!%p139_p2)  ;;  %s545_s18 = sshll.u32 (!%p139_p2), %s540_s13, 5  ;;  %v220_v8 = vlaneseq (!%p139_p2) }
   0x6   : > { %142 = sbr.rel (%p139_p2) target bundleno = 65 (0x41), region = 32  ;;  %v178_v2 = vmul.f32 (!%p139_p2), 0.001953125, %v174_v0  ;;  %v179_v3 = vmul.f32 (!%p139_p2), 0.001953125, %v175_v1  ;;  %p163_p3 = scmp.lt.s32.totalorder (!%p139_p2), %s545_s18, 63  ;;  %v176_v10 = vld [vmem:[%s903_s2] sm:$0x1] (!%p139_p2) }
   0x7   : > { %v221_v9 = vshrl.u32 (!%p139_p2), %v220_v8, 7  ;;  %v177_v13 = vld [vmem:[%s903_s2 + $0x1] sm:$0x1] (!%p139_p2) }
   0x8   : > { %v180_v4 = vmul.f32 (!%p139_p2), %v178_v2, %v178_v2 }
   0x9   : > { %v222_v11 = vsub.s32 (!%p139_p2), 0, %v221_v9 }
   0xa   : > { %v181_v5 = vsub.f32 (!%p139_p2), %v179_v3, %v180_v4 }
   0xc   : > { %v182_v6 = vmax.f32 (!%p139_p2), %v181_v5, 0.0 }
   0xd   : > { %s906_s18 = smov (!%p163_p3, %s545_s18), 63 }
   0xe   : > { %v183_v7 = vadd.f32 1e-05, %v182_v6  ;;  %s546_s19 = sshll.u32 %s906_s18, 3  ;;  %s548_s27 = sshll.u32 %s906_s18, 2 }
   0xf   : > { %s768_s22 = scalar_lea.vmem %s901_s0, %s546_s19  ;;  %s820_s30 = scalar_lea.vmem %s904_s3, %s548_s27 }
  0x10   : > { %718 = vrsqrt.f32 %v183_v7  ;;  %v188_v15 = vld [vmem:[%s768_s22] sm:$0xff]  ;;  %v189_v16 = vld [vmem:[%s768_s22 + $0x8] sm:$0xff]  ;;  %v190_v17 = vld [vmem:[%s768_s22 + $0x10] sm:$0xff] }
  0x11   : > { %v191_v18 = vld [vmem:[%s768_s22 + $0x18] sm:$0xff]  ;;  %v192_v19 = vld [vmem:[%s768_s22 + $0x20] sm:$0xff]  ;;  %v193_v22 = vld [vmem:[%s768_s22 + $0x28] sm:$0xff] }
  0x12   : > { %v194_v23 = vld [vmem:[%s768_s22 + $0x30] sm:$0xff]  ;;  %v195_v24 = vld [vmem:[%s768_s22 + $0x38] sm:$0xff]  ;;  %v196_v25 = vld [vmem:[%s768_s22 + $0x40] sm:$0xff] }
  0x13   : > { %v197_v26 = vld [vmem:[%s768_s22 + $0x48] sm:$0xff]  ;;  %v198_v27 = vld [vmem:[%s768_s22 + $0x50] sm:$0xff]  ;;  %v199_v32 = vld [vmem:[%s768_s22 + $0x58] sm:$0xff] }
  0x14   : > { %v200_v33 = vld [vmem:[%s768_s22 + $0x60] sm:$0xff]  ;;  %v201_v34 = vld [vmem:[%s768_s22 + $0x68] sm:$0xff]  ;;  %v202_v3 = vld [vmem:[%s768_s22 + $0x70] sm:$0xff] }
  0x15   : > { %v203_v4 = vld [vmem:[%s768_s22 + $0x78] sm:$0xff]  ;;  %v204_v9 = vld [vmem:[%s768_s22 + $0x80] sm:$0xff] }
  0x1a   : > { %v719_v12 = vpop.eup %718 }
  0x1b   : > { %v185_v14 = vmul.f32 %v719_v12, %v176_v10 }
  0x1d   : > { %v186_v20 = vmul.f32 %v185_v14, %v178_v2  ;;  %v781_v21 = vrot.slane %v185_v14, %v222_v11  ;;  %v205_v14 = vld [vmem:[%s768_s22 + $0x88] sm:$0xff] }
  0x1f   : > { %v187_v28 = vsub.f32 %v177_v13, %v186_v20  ;;  %v224_v29 = vmul.f32 %v781_v21, %v188_v15  ;;  %v225_v30 = vmul.f32 %v781_v21, %v189_v16  ;;  %v226_v31 = vmul.f32 %v781_v21, %v190_v17  ;;  %v207_v20 = vld [vmem:[%s768_s22 + $0x98] sm:$0xff] }
  0x20   : > { %v227_v35 = vmul.f32 %v781_v21, %v191_v18  ;;  %v228_v36 = vmul.f32 %v781_v21, %v192_v19  ;;  %v229_v37 = vmul.f32 %v781_v21, %v193_v22  ;;  %v230_v38 = vmul.f32 %v781_v21, %v194_v23  ;;  %v206_v19 = vld [vmem:[%s768_s22 + $0x90] sm:$0xff] }
  0x21   : > { %v799_v39 = vrot.slane %v187_v28, %v222_v11  ;;  %v231_v40 = vmul.f32 %v781_v21, %v195_v24  ;;  %v232_v41 = vmul.f32 %v781_v21, %v196_v25  ;;  %v233_v42 = vmul.f32 %v781_v21, %v197_v26  ;;  %v208_v26 = vld [vmem:[%s768_s22 + $0xa0] sm:$0xff] }
  0x22   : > { %v234_v43 = vmul.f32 %v781_v21, %v198_v27  ;;  %v235_v44 = vmul.f32 %v781_v21, %v199_v32  ;;  %v236_v45 = vmul.f32 %v781_v21, %v200_v33  ;;  %v237_v46 = vmul.f32 %v781_v21, %v201_v34 }
  0x23   : > { %v260_v47 = vadd.f32 %v799_v39, %v224_v29  ;;  %v261_v48 = vadd.f32 %v799_v39, %v225_v30  ;;  %v262_v49 = vadd.f32 %v799_v39, %v226_v31  ;;  %v263_v50 = vadd.f32 %v799_v39, %v227_v35  ;;  %v209_v31 = vld [vmem:[%s768_s22 + $0xa8] sm:$0xff] }
  0x24   : > { %v264_v51 = vadd.f32 %v799_v39, %v228_v36  ;;  %v265_v52 = vadd.f32 %v799_v39, %v229_v37  ;;  %v266_v53 = vadd.f32 %v799_v39, %v230_v38  ;;  %v267_v54 = vadd.f32 %v799_v39, %v231_v40  ;;  %v210_v36 = vld [vmem:[%s768_s22 + $0xb0] sm:$0xff] }
  0x25   : > { %v292_v55 = vmax.f32 %v260_v47, 0.0  ;;  %v293_v56 = vmax.f32 %v261_v48, 0.0  ;;  %v294_v57 = vmax.f32 %v262_v49, 0.0  ;;  %v295_v58 = vmax.f32 %v263_v50, 0.0  ;;  %v212_v47 = vld [vmem:[%s768_s22 + $0xc0] sm:$0xff] }
  0x26   : > { %v296_v59 = vmax.f32 %v264_v51, 0.0  ;;  %v297_v60 = vmax.f32 %v265_v52, 0.0  ;;  %v298_v61 = vmax.f32 %v266_v53, 0.0  ;;  %v299_v62 = vmax.f32 %v267_v54, 0.0  ;;  %v213_v52 = vld [vmem:[%s768_s22 + $0xc8] sm:$0xff] }
  0x27   : > { %v618_v63 = vpack.c.bf16 %v293_v56, %v292_v55  ;;  %v623_v0 = vpack.c.bf16 %v295_v58, %v294_v57  ;;  %v268_v1 = vadd.f32 %v799_v39, %v232_v41  ;;  %v269_v2 = vadd.f32 %v799_v39, %v233_v42  ;;  %v211_v42 = vld [vmem:[%s768_s22 + $0xb8] sm:$0xff]  ;;  %v214_v57 = vld [vmem:[%s768_s22 + $0xd0] sm:$0xff] }
  0x28   : > { %v628_v5 = vpack.c.bf16 %v297_v60, %v296_v59  ;;  %v633_v6 = vpack.c.bf16 %v299_v62, %v298_v61  ;;  %v270_v7 = vadd.f32 %v799_v39, %v234_v43  ;;  %v271_v8 = vadd.f32 %v799_v39, %v235_v44  ;;  %v215_v58 = vld [vmem:[%s768_s22 + $0xd8] sm:$0xff] }
  0x29   : > { %619 = vst [vmem:[%s820_s30] sm:$0xff] %v618_v63   ;;  %695 = vst [vmem:[%s820_s30 + $0x8] sm:$0xff] %v623_v0   ;;  %v300_v10 = vmax.f32 %v268_v1, 0.0  ;;  %v301_v11 = vmax.f32 %v269_v2, 0.0  ;;  %v272_v12 = vadd.f32 %v799_v39, %v236_v45  ;;  %v273_v13 = vadd.f32 %v799_v39, %v237_v46  ;;  %v216_v63 = vld [vmem:[%s768_s22 + $0xe0] sm:$0xff] }
  0x2a   : > { %696 = vst [vmem:[%s820_s30 + $0x10] sm:$0xff] %v628_v5   ;;  %697 = vst [vmem:[%s820_s30 + $0x18] sm:$0xff] %v633_v6   ;;  %v302_v15 = vmax.f32 %v270_v7, 0.0  ;;  %v303_v16 = vmax.f32 %v271_v8, 0.0  ;;  %v238_v17 = vmul.f32 %v781_v21, %v202_v3  ;;  %v239_v18 = vmul.f32 %v781_v21, %v203_v4  ;;  %v217_v4 = vld [vmem:[%s768_s22 + $0xe8] sm:$0xff] }
  0x2b   : > { %v638_v22 = vpack.c.bf16 %v301_v11, %v300_v10  ;;  %v304_v23 = vmax.f32 %v272_v12, 0.0  ;;  %v305_v24 = vmax.f32 %v273_v13, 0.0  ;;  %v240_v25 = vmul.f32 %v781_v21, %v204_v9  ;;  %v218_v9 = vld [vmem:[%s768_s22 + $0xf0] sm:$0xff] }
  0x2c   : > { %v643_v27 = vpack.c.bf16 %v303_v16, %v302_v15  ;;  %v274_v28 = vadd.f32 %v799_v39, %v238_v17  ;;  %v275_v29 = vadd.f32 %v799_v39, %v239_v18  ;;  %v241_v30 = vmul.f32 %v781_v21, %v205_v14  ;;  %v219_v14 = vld [vmem:[%s768_s22 + $0xf8] sm:$0xff] }
  0x2d   : > { %698 = vst [vmem:[%s820_s30 + $0x20] sm:$0xff] %v638_v22   ;;  %v648_v32 = vpack.c.bf16 %v305_v24, %v304_v23  ;;  %v276_v33 = vadd.f32 %v799_v39, %v240_v25  ;;  %v242_v34 = vmul.f32 %v781_v21, %v206_v19  ;;  %v243_v35 = vmul.f32 %v781_v21, %v207_v20 }
  0x2e   : > { %699 = vst [vmem:[%s820_s30 + $0x28] sm:$0xff] %v643_v27   ;;  %v306_v37 = vmax.f32 %v274_v28, 0.0  ;;  %v307_v38 = vmax.f32 %v275_v29, 0.0  ;;  %v277_v40 = vadd.f32 %v799_v39, %v241_v30  ;;  %v244_v41 = vmul.f32 %v781_v21, %v208_v26 }
  0x2f   : > { %700 = vst [vmem:[%s820_s30 + $0x30] sm:$0xff] %v648_v32   ;;  %v308_v43 = vmax.f32 %v276_v33, 0.0  ;;  %v278_v44 = vadd.f32 %v799_v39, %v242_v34  ;;  %v279_v45 = vadd.f32 %v799_v39, %v243_v35  ;;  %v245_v46 = vmul.f32 %v781_v21, %v209_v31 }
  0x30   : > { %v653_v48 = vpack.c.bf16 %v307_v38, %v306_v37  ;;  %v309_v49 = vmax.f32 %v277_v40, 0.0  ;;  %v280_v50 = vadd.f32 %v799_v39, %v244_v41  ;;  %v246_v51 = vmul.f32 %v781_v21, %v210_v36 }
  0x31   : > { %v310_v53 = vmax.f32 %v278_v44, 0.0  ;;  %v311_v54 = vmax.f32 %v279_v45, 0.0  ;;  %v281_v55 = vadd.f32 %v799_v39, %v245_v46  ;;  %v247_v56 = vmul.f32 %v781_v21, %v211_v42 }
  0x32   : > { %701 = vst [vmem:[%s820_s30 + $0x38] sm:$0xff] %v653_v48   ;;  %v658_v59 = vpack.c.bf16 %v309_v49, %v308_v43  ;;  %v312_v60 = vmax.f32 %v280_v50, 0.0  ;;  %v282_v61 = vadd.f32 %v799_v39, %v246_v51  ;;  %v248_v62 = vmul.f32 %v781_v21, %v212_v47 }
  0x33   : > { %v663_v0 = vpack.c.bf16 %v311_v54, %v310_v53  ;;  %v313_v1 = vmax.f32 %v281_v55, 0.0  ;;  %v283_v2 = vadd.f32 %v799_v39, %v247_v56  ;;  %v249_v3 = vmul.f32 %v781_v21, %v213_v52 }
  0x34   : > { %702 = vst [vmem:[%s820_s30 + $0x40] sm:$0xff] %v658_v59   ;;  %v314_v5 = vmax.f32 %v282_v61, 0.0  ;;  %v284_v6 = vadd.f32 %v799_v39, %v248_v62  ;;  %v250_v7 = vmul.f32 %v781_v21, %v214_v57  ;;  %v251_v8 = vmul.f32 %v781_v21, %v215_v58 }
  0x35   : > { %703 = vst [vmem:[%s820_s30 + $0x48] sm:$0xff] %v663_v0   ;;  %v668_v10 = vpack.c.bf16 %v313_v1, %v312_v60  ;;  %v315_v11 = vmax.f32 %v283_v2, 0.0  ;;  %v285_v12 = vadd.f32 %v799_v39, %v249_v3  ;;  %v252_v13 = vmul.f32 %v781_v21, %v216_v63 }
  0x36   : > { %v316_v15 = vmax.f32 %v284_v6, 0.0  ;;  %v286_v16 = vadd.f32 %v799_v39, %v250_v7  ;;  %v287_v17 = vadd.f32 %v799_v39, %v251_v8  ;;  %v253_v18 = vmul.f32 %v781_v21, %v217_v4 }
  0x37   : > { %704 = vst [vmem:[%s820_s30 + $0x50] sm:$0xff] %v668_v10   ;;  %v673_v19 = vpack.c.bf16 %v315_v11, %v314_v5  ;;  %v317_v20 = vmax.f32 %v285_v12, 0.0  ;;  %v288_v22 = vadd.f32 %v799_v39, %v252_v13  ;;  %v254_v23 = vmul.f32 %v781_v21, %v218_v9 }
  0x38   : > { %v318_v24 = vmax.f32 %v286_v16, 0.0  ;;  %v319_v25 = vmax.f32 %v287_v17, 0.0  ;;  %v289_v26 = vadd.f32 %v799_v39, %v253_v18  ;;  %v255_v27 = vmul.f32 %v781_v21, %v219_v14 }
  0x39   : > { %705 = vst [vmem:[%s820_s30 + $0x58] sm:$0xff] %v673_v19   ;;  %v678_v28 = vpack.c.bf16 %v317_v20, %v316_v15  ;;  %v320_v29 = vmax.f32 %v288_v22, 0.0  ;;  %v290_v30 = vadd.f32 %v799_v39, %v254_v23 }
  0x3a   : > { %v683_v31 = vpack.c.bf16 %v319_v25, %v318_v24  ;;  %v321_v32 = vmax.f32 %v289_v26, 0.0  ;;  %v291_v33 = vadd.f32 %v799_v39, %v255_v27 }
  0x3b   : > { %706 = vst [vmem:[%s820_s30 + $0x60] sm:$0xff] %v678_v28   ;;  %v322_v34 = vmax.f32 %v290_v30, 0.0 }
  0x3c   : > { %707 = vst [vmem:[%s820_s30 + $0x68] sm:$0xff] %v683_v31   ;;  %v688_v35 = vpack.c.bf16 %v321_v32, %v320_v29  ;;  %v323_v36 = vmax.f32 %v291_v33, 0.0 }
  0x3e   : > { %708 = vst [vmem:[%s820_s30 + $0x70] sm:$0xff] %v688_v35   ;;  %v693_v37 = vpack.c.bf16 %v323_v36, %v322_v34 }
  0x40   : > { %709 = vst [vmem:[%s820_s30 + $0x78] sm:$0xff] %v693_v37  }
  0x41 PF: > { %s13_s12 = sadd.s32 1, %s726_s12  }
  0x42   : > { %p10_p4 = scmp.ge.s32.totalorder %s13_s12, 4  }
  0x44   :  { %12 = sbr.rel (!%p10_p4) target bundleno = 1 (0x1), region = 62 }

// kernel: postres2d_forward.4
= control target key start
LH: loop header
LB: loop body
LE: loop exit
PB: predicated region body
PF: predicated region fallthrough
CT: control target
= control target key end

     0   :  { %s4606_s21 = smov 0   ;;  %s5752_s0 = inlined_call_operand.vmem [shape: bf16[512,1152], index: 0, kind: input, shape index: {}]   ;;  %s5753_s1 = inlined_call_operand.vmem [shape: bf16[1152,128], index: 1, kind: input, shape index: {}]   ;;  %s5754_s2 = inlined_call_operand.vmem [shape: bf16[128,128], index: 2, kind: input, shape index: {}]   ;;  %s5755_s3 = inlined_call_operand.vmem [shape: f32[8,128], index: 3, kind: input, shape index: {}]   ;;  %s5756_s4 = inlined_call_operand.vmem [shape: f32[512,128], index: 4, kind: output, shape index: {0}]   ;;  %s5757_s5 = inlined_call_operand.vmem [shape: f32[512,128], index: 5, kind: output, shape index: {1}]   ;;  %s5758_s6 = inlined_call_operand.vmem [shape: f32[8,128], index: 6, kind: output, shape index: {2}]  }
   0x1 LB: > { %s4612_s22 = sadd.s32 4294967295, %s4567_s21   ;;  %p3401_p0 = scmp.ge.s32.totalorder %s4567_s21, 1  ;;  %s4567_s21 = sphi %s4606_s21, %s17_s21  }
   0x2   : > { %p214_p1 = scmp.lt.s32.totalorder %s4567_s21, 3 }
   0x4   : > { %p215_p2 = pnand %p3401_p0, %p214_p1 }
   0x6   : > { %218 = sbr.rel (%p215_p2) target bundleno = 634 (0x27a), region = 36 }
   0xd   : > { %s3402_s23 = sshll.u32 %s4612_s22, 5  ;;  %p3408_p4 = scmp.ne.s32.totalorder %s4612_s22, 0 }
   0xe   : > { %p251_p3 = scmp.lt.s32.totalorder %s3402_s23, 63  ;;  %v4569_v0 = vmov (!%p3408_p4), 0.0  }
   0xf   : > { %273 = sbr.rel (%p3408_p4) target bundleno = 22 (0x16), region = 40  ;;  %274 = vst [vmem:[%s5758_s6] sm:$0xff] (!%p3408_p4), %v4569_v0 }
  0x10   : > { %s5823_s23 = smov (!%p251_p3, %s3402_s23), 63 }
  0x11   : > { %s4262_s24 = smul.u32 36, %s5823_s23  ;;  %s3405_s25 = sshll.u32 %s5823_s23, 3 }
  0x12   : > { %s4620_s28 = scalar_lea.vmem %s5756_s4, %s3405_s25  ;;  %s4625_s7 = scalar_lea.vmem %s5757_s5, %s3405_s25 }
  0x13   : > { %s4630_s10 = scalar_lea.vmem %s5752_s0, %s4262_s24 }
  0x16 PF: > { %v4273_v1 = vld [vmem:[%s5753_s1 + $0x40] sm:$0xff]   ;;  %v4277_v5 = vld [vmem:[%s5753_s1 + $0x48] sm:$0xff]   ;;  %v4281_v9 = vld [vmem:[%s5753_s1 + $0x50] sm:$0xff]  }
  0x17   : > { %v4274_v2 = vld [vmem:[%s5753_s1 + $0xc0] sm:$0xff]   ;;  %3670 = vmatprep.subr.bf16.mxu0 %v4273_v1  ;;  %v4278_v6 = vld [vmem:[%s5753_s1 + $0xc8] sm:$0xff]   ;;  %v4282_v10 = vld [vmem:[%s5753_s1 + $0xd0] sm:$0xff]  }
  0x18   : > { %v4275_v3 = vld [vmem:[%s5753_s1] sm:$0xff]   ;;  %3782 = vmatprep.subr.bf16.mxu1 %v4274_v2  ;;  %v4279_v7 = vld [vmem:[%s5753_s1 + $0x8] sm:$0xff]   ;;  %v4283_v11 = vld [vmem:[%s5753_s1 + $0x10] sm:$0xff]  }
  0x19   : > { %v4276_v4 = vld [vmem:[%s5753_s1 + $0x80] sm:$0xff]   ;;  %3671 = vmatpush3.bf16.msra.mxu0 %v4275_v3  ;;  %v4280_v8 = vld [vmem:[%s5753_s1 + $0x88] sm:$0xff]   ;;  %v4284_v12 = vld [vmem:[%s5753_s1 + $0x90] sm:$0xff]  }
  0x1a   : > { %3783 = vmatpush3.bf16.msra.mxu1 %v4276_v4  ;;  %3672 = vmatprep.subr.bf16.mxu0 %v4277_v5  ;;  %v4285_v13 = vld [vmem:[%s5753_s1 + $0x58] sm:$0xff]   ;;  %v4289_v17 = vld [vmem:[%s5753_s1 + $0x60] sm:$0xff]   ;;  %v4293_v21 = vld [vmem:[%s5753_s1 + $0x68] sm:$0xff]  }
  0x1b   : > { %3784 = vmatprep.subr.bf16.mxu1 %v4278_v6  ;;  %v4286_v14 = vld [vmem:[%s5753_s1 + $0xd8] sm:$0xff]   ;;  %v4290_v18 = vld [vmem:[%s5753_s1 + $0xe0] sm:$0xff]   ;;  %v4294_v22 = vld [vmem:[%s5753_s1 + $0xe8] sm:$0xff]  }
  0x1c   : > { %v4287_v15 = vld [vmem:[%s5753_s1 + $0x18] sm:$0xff]   ;;  %v4291_v19 = vld [vmem:[%s5753_s1 + $0x20] sm:$0xff]   ;;  %v4295_v23 = vld [vmem:[%s5753_s1 + $0x28] sm:$0xff]  }
  0x1d   : > { %3673 = vmatpush3.bf16.msra.mxu0 %v4279_v7  ;;  %v4288_v16 = vld [vmem:[%s5753_s1 + $0x98] sm:$0xff]   ;;  %v4292_v20 = vld [vmem:[%s5753_s1 + $0xa0] sm:$0xff]   ;;  %v4296_v24 = vld [vmem:[%s5753_s1 + $0xa8] sm:$0xff]  }
  0x1e   : > { %3785 = vmatpush3.bf16.msra.mxu1 %v4280_v8  ;;  %3674 = vmatprep.subr.bf16.mxu0 %v4281_v9  ;;  %v4297_v25 = vld [vmem:[%s5753_s1 + $0x70] sm:$0xff]   ;;  %v4301_v29 = vld [vmem:[%s5753_s1 + $0x78] sm:$0xff]   ;;  %v4305_v33 = vld [vmem:[%s4630_s10] ss:$36 sps:$4 sm:$0xff]  }
  0x1f   : > { %3786 = vmatprep.subr.bf16.mxu1 %v4282_v10  ;;  %v4298_v26 = vld [vmem:[%s5753_s1 + $0xf0] sm:$0xff]   ;;  %v4302_v30 = vld [vmem:[%s5753_s1 + $0xf8] sm:$0xff]   ;;  %v4307_v34 = vld [vmem:[%s4630_s10 + $0x4] ss:$36 sps:$4 sm:$0xff]  }
  0x20   : > { %v4299_v27 = vld [vmem:[%s5753_s1 + $0x30] sm:$0xff]   ;;  %v4303_v31 = vld [vmem:[%s5753_s1 + $0x38] sm:$0xff]   ;;  %v4308_v35 = vld [vmem:[%s4630_s10 + $0x8] ss:$36 sps:$4 sm:$0xff]   ;;  %1784 = vmatprep.mubr.bf16.mxu0 %v4307_v34 }
  0x21   : > { %3675 = vmatpush3.bf16.msra.mxu0 %v4283_v11  ;;  %v4300_v28 = vld [vmem:[%s5753_s1 + $0xb0] sm:$0xff]   ;;  %v4304_v32 = vld [vmem:[%s5753_s1 + $0xb8] sm:$0xff]   ;;  %v4311_v37 = vld [vmem:[%s5753_s1 + $0x140] sm:$0xff]  }
  0x22   : > { %3787 = vmatpush3.bf16.msra.mxu1 %v4284_v12  ;;  %3676 = vmatprep.subr.bf16.mxu0 %v4285_v13  ;;  %v4310_v36 = vld [vmem:[%s4630_s10 + $0xc] ss:$36 sps:$4 sm:$0xff]   ;;  %v4312_v38 = vld [vmem:[%s5753_s1 + $0x100] sm:$0xff]   ;;  %v4317_v42 = vld [vmem:[%s4630_s10 + $0x54] ss:$36 sps:$4 sm:$0xff]  }
  0x23   : > { %3788 = vmatprep.subr.bf16.mxu1 %v4286_v14  ;;  %1945 = vmatprep.mubr.bf16.mxu1 %v4310_v36  ;;  %v4313_v39 = vld [vmem:[%s5753_s1 + $0x1c0] sm:$0xff]   ;;  %v4315_v41 = vld [vmem:[%s4630_s10 + $0x4c] ss:$36 sps:$4 sm:$0xff]   ;;  %v4321_v45 = vld [vmem:[%s4630_s10 + $0x94] ss:$36 sps:$4 sm:$0xff]  }
  0x24   : > { %v4314_v40 = vld [vmem:[%s5753_s1 + $0x180] sm:$0xff]   ;;  %v4319_v43 = vld [vmem:[%s4630_s10 + $0x48] ss:$36 sps:$4 sm:$0xff]   ;;  %v4320_v44 = vld [vmem:[%s4630_s10 + $0x50] ss:$36 sps:$4 sm:$0xff]  }
  0x25   : > { %3677 = vmatpush3.bf16.msra.mxu0 %v4287_v15  ;;  %v4323_v46 = vld [vmem:[%s4630_s10 + $0x9c] ss:$36 sps:$4 sm:$0xff]   ;;  %v4327_v47 = vld [vmem:[%s5753_s1 + $0x148] sm:$0xff]   ;;  %v4325_v49 = vld [vmem:[%s4630_s10 + $0x90] ss:$36 sps:$4 sm:$0xff]  }
  0x26   : > { %3789 = vmatpush3.bf16.msra.mxu1 %v4288_v16  ;;  %3678 = vmatprep.subr.bf16.mxu0 %v4289_v17  ;;  %v4328_v48 = vld [vmem:[%s5753_s1 + $0x108] sm:$0xff]   ;;  %v4326_v52 = vld [vmem:[%s4630_s10 + $0x98] ss:$36 sps:$4 sm:$0xff]   ;;  %v4343_v56 = vld [vmem:[%s5753_s1 + $0x150] sm:$0xff]  }
  0x27   : > { %3790 = vmatprep.subr.bf16.mxu1 %v4290_v18  ;;  %v4329_v50 = vld [vmem:[%s5753_s1 + $0x1c8] sm:$0xff]   ;;  %v4331_v53 = vld [vmem:[%s4630_s10 + $0xdc] ss:$36 sps:$4 sm:$0xff]   ;;  %v4344_v59 = vld [vmem:[%s5753_s1 + $0x110] sm:$0xff]  }
  0x28   : > { %v4330_v51 = vld [vmem:[%s5753_s1 + $0x188] sm:$0xff]   ;;  %v4335_v55 = vld [vmem:[%s4630_s10 + $0xd8] ss:$36 sps:$4 sm:$0xff]   ;;  %v4336_v57 = vld [vmem:[%s4630_s10 + $0xe0] ss:$36 sps:$4 sm:$0xff]  }
  0x29   : > { %3679 = vmatpush3.bf16.msra.mxu0 %v4291_v19  ;;  %v4333_v54 = vld [vmem:[%s4630_s10 + $0xe4] ss:$36 sps:$4 sm:$0xff]   ;;  %v4345_v60 = vld [vmem:[%s5753_s1 + $0x1d0] sm:$0xff]   ;;  %v4359_v2 = vld [vmem:[%s5753_s1 + $0x158] sm:$0xff]  }
  0x2a   : > { %3791 = vmatpush3.bf16.msra.mxu1 %v4292_v20  ;;  %3680 = vmatprep.subr.bf16.mxu0 %v4293_v21  ;;  %v4337_v58 = vld [vmem:[%s4630_s10 + $0x124] ss:$36 sps:$4 sm:$0xff]   ;;  %v4346_v61 = vld [vmem:[%s5753_s1 + $0x190] sm:$0xff]   ;;  %v4360_v4 = vld [vmem:[%s5753_s1 + $0x118] sm:$0xff]  }
  0x2b   : > { %3792 = vmatprep.subr.bf16.mxu1 %v4294_v22  ;;  %v4339_v62 = vld [vmem:[%s4630_s10 + $0x12c] ss:$36 sps:$4 sm:$0xff]   ;;  %v4341_v63 = vld [vmem:[%s4630_s10 + $0x120] ss:$36 sps:$4 sm:$0xff]   ;;  %v4349_v3 = vld [vmem:[%s4630_s10 + $0x174] ss:$36 sps:$4 sm:$0xff]  }
  0x2c   : > { %v4342_v0 = vld [vmem:[%s4630_s10 + $0x128] ss:$36 sps:$4 sm:$0xff]   ;;  %v4361_v5 = vld [vmem:[%s5753_s1 + $0x1d8] sm:$0xff]   ;;  %v4352_v8 = vld [vmem:[%s4630_s10 + $0x170] ss:$36 sps:$4 sm:$0xff]  }
  0x2d   : > { %3681 = vmatpush3.bf16.msra.mxu0 %v4295_v23  ;;  %v4347_v1 = vld [vmem:[%s4630_s10 + $0x16c] ss:$36 sps:$4 sm:$0xff]   ;;  %v4362_v6 = vld [vmem:[%s5753_s1 + $0x198] sm:$0xff]   ;;  %v4375_v11 = vld [vmem:[%s5753_s1 + $0x160] sm:$0xff]  }
  0x2e   : > { %3793 = vmatpush3.bf16.msra.mxu1 %v4296_v24  ;;  %3682 = vmatprep.subr.bf16.mxu0 %v4297_v25  ;;  %v4351_v7 = vld [vmem:[%s4630_s10 + $0x168] ss:$36 sps:$4 sm:$0xff]   ;;  %v4353_v9 = vld [vmem:[%s4630_s10 + $0x1b4] ss:$36 sps:$4 sm:$0xff]   ;;  %v4355_v10 = vld [vmem:[%s4630_s10 + $0x1bc] ss:$36 sps:$4 sm:$0xff]  }
  0x2f   : > { %3794 = vmatprep.subr.bf16.mxu1 %v4298_v26  ;;  %v4376_v12 = vld [vmem:[%s5753_s1 + $0x120] sm:$0xff]   ;;  %v4357_v15 = vld [vmem:[%s4630_s10 + $0x1b0] ss:$36 sps:$4 sm:$0xff]   ;;  %v4358_v16 = vld [vmem:[%s4630_s10 + $0x1b8] ss:$36 sps:$4 sm:$0xff]  }
  0x30   : > { %v4377_v13 = vld [vmem:[%s5753_s1 + $0x1e0] sm:$0xff]   ;;  %v4391_v19 = vld [vmem:[%s5753_s1 + $0x168] sm:$0xff]   ;;  %v4367_v23 = vld [vmem:[%s4630_s10 + $0x1f8] ss:$36 sps:$4 sm:$0xff]  }
  0x31   : > { %3683 = vmatpush3.bf16.msra.mxu0 %v4299_v27  ;;  %v4378_v14 = vld [vmem:[%s5753_s1 + $0x1a0] sm:$0xff]   ;;  %v4392_v20 = vld [vmem:[%s5753_s1 + $0x128] sm:$0xff]   ;;  %v4407_v27 = vld [vmem:[%s5753_s1 + $0x170] sm:$0xff]  }
  0x32   : > { %3795 = vmatpush3.bf16.msra.mxu1 %v4300_v28  ;;  %3684 = vmatprep.subr.bf16.mxu0 %v4301_v29  ;;  %v4363_v17 = vld [vmem:[%s4630_s10 + $0x1fc] ss:$36 sps:$4 sm:$0xff]   ;;  %v4365_v18 = vld [vmem:[%s4630_s10 + $0x204] ss:$36 sps:$4 sm:$0xff]   ;;  %v4371_v26 = vld [vmem:[%s4630_s10 + $0x24c] ss:$36 sps:$4 sm:$0xff]  }
  0x33   : > { %3796 = vmatprep.subr.bf16.mxu1 %v4302_v30  ;;  %v4393_v21 = vld [vmem:[%s5753_s1 + $0x1e8] sm:$0xff]   ;;  %v4368_v24 = vld [vmem:[%s4630_s10 + $0x200] ss:$36 sps:$4 sm:$0xff]   ;;  %v4408_v28 = vld [vmem:[%s5753_s1 + $0x130] sm:$0xff]  }
  0x34   : > { %v4394_v22 = vld [vmem:[%s5753_s1 + $0x1a8] sm:$0xff]   ;;  %v4409_v29 = vld [vmem:[%s5753_s1 + $0x1f0] sm:$0xff]   ;;  %v4424_v36 = vld [vmem:[%s5753_s1 + $0x138] sm:$0xff]  }
  0x35   : > { %3685 = vmatpush3.bf16.msra.mxu0 %v4303_v31  ;;  %v4369_v25 = vld [vmem:[%s4630_s10 + $0x244] ss:$36 sps:$4 sm:$0xff]   ;;  %v4410_v30 = vld [vmem:[%s5753_s1 + $0x1b0] sm:$0xff]  }
  0x36   : > { %3797 = vmatpush3.bf16.msra.mxu1 %v4304_v32  ;;  %3894 = vmatprep.subr.bf16.mxu0 %v4311_v37  ;;  %v4373_v31 = vld [vmem:[%s4630_s10 + $0x240] ss:$36 sps:$4 sm:$0xff]   ;;  %v4374_v32 = vld [vmem:[%s4630_s10 + $0x248] ss:$36 sps:$4 sm:$0xff]   ;;  %v4381_v34 = vld [vmem:[%s4630_s10 + $0x294] ss:$36 sps:$4 sm:$0xff]  }
  0x37   : > { %4006 = vmatprep.subr.bf16.mxu1 %v4313_v39  ;;  %v4383_v37 = vld [vmem:[%s4630_s10 + $0x288] ss:$36 sps:$4 sm:$0xff]   ;;  %v4426_v39 = vld [vmem:[%s5753_s1 + $0x1b8] sm:$0xff]  }
  0x38   : > { %1785 = vmatmul.mubr.bf16.vlgmr.msra.gmra.mrb[0].mxu0 %v4305_v33  ;;  %v4379_v33 = vld [vmem:[%s4630_s10 + $0x28c] ss:$36 sps:$4 sm:$0xff]  }
  0x39   : > { %1946 = vmatmul.mubr.bf16.vlgmr.msra.gmra.mrb[0].mxu1 %v4308_v35  ;;  %3895 = vmatpush3.bf16.msra.mxu0 %v4312_v38  ;;  %v4423_v35 = vld [vmem:[%s5753_s1 + $0x178] sm:$0xff]  }
  0x3a   : > { %4007 = vmatpush3.bf16.msra.mxu1 %v4314_v40  ;;  %1792 = vmatprep.mubr.bf16.mxu0 %v4315_v41  ;;  %v4425_v38 = vld [vmem:[%s5753_s1 + $0x1f8] sm:$0xff]   ;;  %v4384_v40 = vld [vmem:[%s4630_s10 + $0x290] ss:$36 sps:$4 sm:$0xff]  }
  0x3b   : > { %1953 = vmatprep.mubr.bf16.mxu1 %v4317_v42  ;;  %3896 = vmatprep.subr.bf16.mxu0 %v4327_v47  ;;  %v4385_v41 = vld [vmem:[%s4630_s10 + $0x2d4] ss:$36 sps:$4 sm:$0xff]   ;;  %v4387_v42 = vld [vmem:[%s4630_s10 + $0x2dc] ss:$36 sps:$4 sm:$0xff]  }
  0x3c   : > { %4008 = vmatprep.subr.bf16.mxu1 %v4329_v50  ;;  %v4395_v47 = vld [vmem:[%s4630_s10 + $0x31c] ss:$36 sps:$4 sm:$0xff]  }
  0x3d   : > { %3897 = vmatpush3.bf16.msra.mxu0 %v4328_v48  ;;  %v4397_v48 = vld [vmem:[%s4630_s10 + $0x324] ss:$36 sps:$4 sm:$0xff]  }
  0x3e   : > { %4009 = vmatpush3.bf16.msra.mxu1 %v4330_v51  ;;  %3898 = vmatprep.subr.bf16.mxu0 %v4343_v56  ;;  %v4400_v50 = vld [vmem:[%s4630_s10 + $0x320] ss:$36 sps:$4 sm:$0xff]   ;;  %v4413_v56 = vld [vmem:[%s4630_s10 + $0x3b4] ss:$36 sps:$4 sm:$0xff]  }
  0x3f   : > { %4010 = vmatprep.subr.bf16.mxu1 %v4345_v60  ;;  %v4401_v51 = vld [vmem:[%s4630_s10 + $0x364] ss:$36 sps:$4 sm:$0xff]   ;;  %v4419_v60 = vld [vmem:[%s4630_s10 + $0x3fc] ss:$36 sps:$4 sm:$0xff]  }
  0x40   : > { %1793 = vmatmul.mubr.bf16.gmra.mrb[4].mxu0 %v4319_v43  ;;  %v4439_v43 = vld [vmem:[%s5753_s1 + $0x200] sm:$0xff]  }
  0x41   : > { %1954 = vmatmul.mubr.bf16.gmra.mrb[4].mxu1 %v4320_v44  ;;  %1800 = vmatprep.mubr.bf16.mxu0 %v4321_v45  ;;  %v4440_v44 = vld [vmem:[%s5754_s2] sm:$0xff]   ;;  %v4389_v45 = vld [vmem:[%s4630_s10 + $0x2d0] ss:$36 sps:$4 sm:$0xff]  }
  0x42   : > { %1961 = vmatprep.mubr.bf16.mxu1 %v4323_v46  ;;  %3899 = vmatpush3.bf16.msra.mxu0 %v4344_v59  ;;  %v4390_v46 = vld [vmem:[%s4630_s10 + $0x2d8] ss:$36 sps:$4 sm:$0xff]  }
  0x43   : > { %4011 = vmatpush3.bf16.msra.mxu1 %v4346_v61  ;;  %3900 = vmatprep.subr.bf16.mxu0 %v4359_v2  ;;  %v4417_v59 = vld [vmem:[%s4630_s10 + $0x3f4] ss:$36 sps:$4 sm:$0xff]   ;;  %v4432_v2 = vld [vmem:[%s4630_s10 + $0x440] ss:$36 sps:$4 sm:$0xff]  }
  0x44   : > { %4012 = vmatprep.subr.bf16.mxu1 %v4361_v5  ;;  %v4421_v61 = vld [vmem:[%s4630_s10 + $0x3f0] ss:$36 sps:$4 sm:$0xff]  }
  0x45   : > { %v4901_v5 = vld [vmem:[%s4630_s10 + $0x10] ss:$36 sps:$4 sm:$0xff]  }
  0x46   : > { %3901 = vmatpush3.bf16.msra.mxu0 %v4360_v4  ;;  %v4438_v4 = vld [vmem:[%s4630_s10 + $0x1c] ss:$36 sps:$4 sm:$0xff]  }
  0x47   : > { %4013 = vmatpush3.bf16.msra.mxu1 %v4362_v6  ;;  %3902 = vmatprep.subr.bf16.mxu0 %v4375_v11  ;;  %v4436_v6 = vld [vmem:[%s4630_s10 + $0x18] ss:$36 sps:$4 sm:$0xff]  }
  0x48   : > { %1801 = vmatmul.mubr.bf16.gmra.mrb[8].mxu0 %v4325_v49  ;;  %4014 = vmatprep.subr.bf16.mxu1 %v4377_v13  ;;  %v4399_v49 = vld [vmem:[%s4630_s10 + $0x318] ss:$36 sps:$4 sm:$0xff]   ;;  %v4446_v13 = vld [vmem:[%s4630_s10 + $0x60] ss:$36 sps:$4 sm:$0xff]  }
  0x49   : > { %1962 = vmatmul.mubr.bf16.gmra.mrb[8].mxu1 %v4326_v52  ;;  %1808 = vmatprep.mubr.bf16.mxu0 %v4331_v53  ;;  %v4403_v52 = vld [vmem:[%s4630_s10 + $0x36c] ss:$36 sps:$4 sm:$0xff]   ;;  %v4405_v53 = vld [vmem:[%s4630_s10 + $0x360] ss:$36 sps:$4 sm:$0xff]   ;;  %v4914_v11 = vld [vmem:[%s4630_s10 + $0x58] ss:$36 sps:$4 sm:$0xff]  }
  0x4a   : > { %1969 = vmatprep.mubr.bf16.mxu1 %v4333_v54  ;;  %3903 = vmatpush3.bf16.msra.mxu0 %v4376_v12  ;;  %v4406_v54 = vld [vmem:[%s4630_s10 + $0x368] ss:$36 sps:$4 sm:$0xff]   ;;  %v4467_v12 = vld [vmem:[%s5753_s1 + $0x210] sm:$0xff]  }
  0x4b   : > { %4015 = vmatpush3.bf16.msra.mxu1 %v4378_v14  ;;  %3904 = vmatprep.subr.bf16.mxu0 %v4391_v19  ;;  %v4447_v14 = vld [vmem:[%s4630_s10 + $0xa4] ss:$36 sps:$4 sm:$0xff]  }
  0x4c   : > { %4016 = vmatprep.subr.bf16.mxu1 %v4393_v21  ;;  %v4495_v19 = vld [vmem:[%s5753_s1 + $0x220] sm:$0xff]  }
  0x4d   : > { %v4496_v21 = vld [vmem:[%s5754_s2 + $0x20] sm:$0xff]  }
  0x4e   : > { %3905 = vmatpush3.bf16.msra.mxu0 %v4392_v20  ;;  %v4936_v20 = vld [vmem:[%s4630_s10 + $0xa0] ss:$36 sps:$4 sm:$0xff]  }
  0x4f   : > { %4017 = vmatpush3.bf16.msra.mxu1 %v4394_v22  ;;  %3906 = vmatprep.subr.bf16.mxu0 %v4407_v27  ;;  %v4452_v22 = vld [vmem:[%s4630_s10 + $0xa8] ss:$36 sps:$4 sm:$0xff]   ;;  %v4523_v27 = vld [vmem:[%s5753_s1 + $0x230] sm:$0xff]  }
  0x50   : > { %1809 = vmatmul.mubr.bf16.gmra.mrb[12].mxu0 %v4335_v55  ;;  %4018 = vmatprep.subr.bf16.mxu1 %v4409_v29  ;;  %v4411_v55 = vld [vmem:[%s4630_s10 + $0x3ac] ss:$36 sps:$4 sm:$0xff]  }
  0x51   : > { %1970 = vmatmul.mubr.bf16.gmra.mrb[12].mxu1 %v4336_v57  ;;  %1816 = vmatprep.mubr.bf16.mxu0 %v4337_v58  ;;  %v4415_v57 = vld [vmem:[%s4630_s10 + $0x3a8] ss:$36 sps:$4 sm:$0xff]   ;;  %v4416_v58 = vld [vmem:[%s4630_s10 + $0x3b0] ss:$36 sps:$4 sm:$0xff]  }
  0x52   : > { %1977 = vmatprep.mubr.bf16.mxu1 %v4339_v62  ;;  %3907 = vmatpush3.bf16.msra.mxu0 %v4408_v28  ;;  %v4422_v62 = vld [vmem:[%s4630_s10 + $0x3f8] ss:$36 sps:$4 sm:$0xff]   ;;  %v4955_v28 = vld [vmem:[%s4630_s10 + $0xe8] ss:$36 sps:$4 sm:$0xff]   ;;  %v4524_v29 = vld [vmem:[%s5754_s2 + $0x30] sm:$0xff]  }
  0x53   : > { %4019 = vmatpush3.bf16.msra.mxu1 %v4410_v30  ;;  %3908 = vmatprep.subr.bf16.mxu0 %v4423_v35  ;;  %v4460_v30 = vld [vmem:[%s4630_s10 + $0xf0] ss:$36 sps:$4 sm:$0xff]  }
  0x54   : > { %4020 = vmatprep.subr.bf16.mxu1 %v4425_v38  ;;  %v4971_v35 = vld [vmem:[%s4630_s10 + $0x130] ss:$36 sps:$4 sm:$0xff]   ;;  %v4471_v38 = vld [vmem:[%s4630_s10 + $0x184] ss:$36 sps:$4 sm:$0xff]  }
  0x56   : > { %3909 = vmatpush3.bf16.msra.mxu0 %v4424_v36  ;;  %v4466_v36 = vld [vmem:[%s4630_s10 + $0x138] ss:$36 sps:$4 sm:$0xff]  }
  0x57   : > { %4021 = vmatpush3.bf16.msra.mxu1 %v4426_v39  ;;  %4166 = vmatprep.subr.bf16.mxu0 %v4439_v43  ;;  %v4978_v39 = vld [vmem:[%s4630_s10 + $0x178] ss:$36 sps:$4 sm:$0xff]  }
  0x58   : > { %1817 = vmatmul.mubr.bf16.gmra.mrb[16].mxu0 %v4341_v63  ;;  %4214 = vmatprep.subr.bf16.mxu1 %v4440_v44  ;;  %v4427_v63 = vld [vmem:[%s4630_s10 + $0x43c] ss:$36 sps:$4 sm:$0xff]  }
  0x59   : > { %1978 = vmatmul.mubr.bf16.gmra.mrb[16].mxu1 %v4342_v0  ;;  %1824 = vmatprep.mubr.bf16.mxu0 %v4347_v1  ;;  %v4429_v0 = vld [vmem:[%s4630_s10 + $0x444] ss:$36 sps:$4 sm:$0xff]   ;;  %v4431_v1 = vld [vmem:[%s4630_s10 + $0x438] ss:$36 sps:$4 sm:$0xff]  }
  0x5a   : > { %1985 = vmatprep.mubr.bf16.mxu1 %v4349_v3  ;;  %v4435_v3 = vld [vmem:[%s4630_s10 + $0x14] ss:$36 sps:$4 sm:$0xff]  }
  0x60   : > { %1825 = vmatmul.mubr.bf16.gmra.mrb[20].mxu0 %v4351_v7  ;;  %v4441_v7 = vld [vmem:[%s4630_s10 + $0x5c] ss:$36 sps:$4 sm:$0xff]  }
  0x61   : > { %1986 = vmatmul.mubr.bf16.gmra.mrb[20].mxu1 %v4352_v8  ;;  %1832 = vmatprep.mubr.bf16.mxu0 %v4353_v9  ;;  %v4443_v8 = vld [vmem:[%s4630_s10 + $0x64] ss:$36 sps:$4 sm:$0xff]  }
  0x62   : > { %1993 = vmatprep.mubr.bf16.mxu1 %v4355_v10  ;;  %v4453_v9 = vld [vmem:[%s5753_s1 + $0x208] sm:$0xff]  }
  0x63   : > { %v4454_v10 = vld [vmem:[%s5754_s2 + $0x8] sm:$0xff]  }
  0x68   : > { %1833 = vmatmul.mubr.bf16.gmra.mrb[24].mxu0 %v4357_v15  ;;  %v4468_v15 = vld [vmem:[%s5754_s2 + $0x10] sm:$0xff]  }
  0x69   : > { %1994 = vmatmul.mubr.bf16.gmra.mrb[24].mxu1 %v4358_v16  ;;  %1840 = vmatprep.mubr.bf16.mxu0 %v4363_v17  ;;  %v4449_v16 = vld [vmem:[%s4630_s10 + $0xac] ss:$36 sps:$4 sm:$0xff]   ;;  %v4481_v17 = vld [vmem:[%s5753_s1 + $0x218] sm:$0xff]  }
  0x6a   : > { %2001 = vmatprep.mubr.bf16.mxu1 %v4365_v18  ;;  %v4482_v18 = vld [vmem:[%s5754_s2 + $0x18] sm:$0xff]  }
  0x70   : > { %1841 = vmatmul.mubr.bf16.gmra.mrb[28].mxu0 %v4367_v23  ;;  %v4455_v23 = vld [vmem:[%s4630_s10 + $0xec] ss:$36 sps:$4 sm:$0xff]  }
  0x71   : > { %2002 = vmatmul.mubr.bf16.gmra.mrb[28].mxu1 %v4368_v24  ;;  %1848 = vmatprep.mubr.bf16.mxu0 %v4369_v25  ;;  %v4457_v24 = vld [vmem:[%s4630_s10 + $0xf4] ss:$36 sps:$4 sm:$0xff]   ;;  %v4509_v25 = vld [vmem:[%s5753_s1 + $0x228] sm:$0xff]  }
  0x72   : > { %2009 = vmatprep.mubr.bf16.mxu1 %v4371_v26  ;;  %v4510_v26 = vld [vmem:[%s5754_s2 + $0x28] sm:$0xff]  }
  0x78   : > { %1849 = vmatmul.mubr.bf16.gmra.mrb[32].mxu0 %v4373_v31  ;;  %v4461_v31 = vld [vmem:[%s4630_s10 + $0x134] ss:$36 sps:$4 sm:$0xff]  }
  0x79   : > { %2010 = vmatmul.mubr.bf16.gmra.mrb[32].mxu1 %v4374_v32  ;;  %1856 = vmatprep.mubr.bf16.mxu0 %v4379_v33  ;;  %v4463_v32 = vld [vmem:[%s4630_s10 + $0x13c] ss:$36 sps:$4 sm:$0xff]  }
  0x7a   : > { %2017 = vmatprep.mubr.bf16.mxu1 %v4381_v34  ;;  %v4537_v33 = vld [vmem:[%s5753_s1 + $0x238] sm:$0xff]  }
  0x7b   : > { %v4538_v34 = vld [vmem:[%s5754_s2 + $0x38] sm:$0xff]  }
  0x80   : > { %1857 = vmatmul.mubr.bf16.gmra.mrb[36].mxu0 %v4383_v37  ;;  %v4469_v37 = vld [vmem:[%s4630_s10 + $0x17c] ss:$36 sps:$4 sm:$0xff]  }
  0x81   : > { %2018 = vmatmul.mubr.bf16.gmra.mrb[36].mxu1 %v4384_v40  ;;  %1864 = vmatprep.mubr.bf16.mxu0 %v4385_v41  ;;  %v4474_v40 = vld [vmem:[%s4630_s10 + $0x180] ss:$36 sps:$4 sm:$0xff]  }
  0x82   : > { %2025 = vmatprep.mubr.bf16.mxu1 %v4387_v42  ;;  %v4475_v41 = vld [vmem:[%s4630_s10 + $0x1c4] ss:$36 sps:$4 sm:$0xff]   ;;  %v4477_v42 = vld [vmem:[%s4630_s10 + $0x1cc] ss:$36 sps:$4 sm:$0xff]  }
  0x88   : > { %1865 = vmatmul.mubr.bf16.gmra.mrb[40].mxu0 %v4389_v45  ;;  %v4483_v45 = vld [vmem:[%s4630_s10 + $0x20c] ss:$36 sps:$4 sm:$0xff]  }
  0x89   : > { %2026 = vmatmul.mubr.bf16.gmra.mrb[40].mxu1 %v4390_v46  ;;  %1872 = vmatprep.mubr.bf16.mxu0 %v4395_v47  ;;  %v4485_v46 = vld [vmem:[%s4630_s10 + $0x214] ss:$36 sps:$4 sm:$0xff]   ;;  %v4992_v47 = vld [vmem:[%s4630_s10 + $0x208] ss:$36 sps:$4 sm:$0xff]  }
  0x8a   : > { %2033 = vmatprep.mubr.bf16.mxu1 %v4397_v48  ;;  %v4488_v48 = vld [vmem:[%s4630_s10 + $0x210] ss:$36 sps:$4 sm:$0xff]  }
  0x90   : > { %1873 = vmatmul.mubr.bf16.gmra.mrb[44].mxu0 %v4399_v49  ;;  %v4489_v49 = vld [vmem:[%s4630_s10 + $0x254] ss:$36 sps:$4 sm:$0xff]  }
  0x91   : > { %2034 = vmatmul.mubr.bf16.gmra.mrb[44].mxu1 %v4400_v50  ;;  %1880 = vmatprep.mubr.bf16.mxu0 %v4401_v51  ;;  %v4491_v50 = vld [vmem:[%s4630_s10 + $0x25c] ss:$36 sps:$4 sm:$0xff]   ;;  %v4999_v51 = vld [vmem:[%s4630_s10 + $0x250] ss:$36 sps:$4 sm:$0xff]  }
  0x92   : > { %2041 = vmatprep.mubr.bf16.mxu1 %v4403_v52  ;;  %v4494_v52 = vld [vmem:[%s4630_s10 + $0x258] ss:$36 sps:$4 sm:$0xff]  }
  0x98   : > { %1881 = vmatmul.mubr.bf16.gmra.mrb[48].mxu0 %v4405_v53  ;;  %v4497_v53 = vld [vmem:[%s4630_s10 + $0x29c] ss:$36 sps:$4 sm:$0xff]  }
  0x99   : > { %2042 = vmatmul.mubr.bf16.gmra.mrb[48].mxu1 %v4406_v54  ;;  %1888 = vmatprep.mubr.bf16.mxu0 %v4411_v55  ;;  %v4499_v54 = vld [vmem:[%s4630_s10 + $0x2a4] ss:$36 sps:$4 sm:$0xff]   ;;  %v5006_v55 = vld [vmem:[%s4630_s10 + $0x298] ss:$36 sps:$4 sm:$0xff]  }
  0x9a   : > { %2049 = vmatprep.mubr.bf16.mxu1 %v4413_v56  ;;  %v4502_v56 = vld [vmem:[%s4630_s10 + $0x2a0] ss:$36 sps:$4 sm:$0xff]  }
  0xa0   : > { %1889 = vmatmul.mubr.bf16.gmra.mrb[52].mxu0 %v4415_v57  ;;  %v4503_v57 = vld [vmem:[%s4630_s10 + $0x2e4] ss:$36 sps:$4 sm:$0xff]  }
  0xa1   : > { %2050 = vmatmul.mubr.bf16.gmra.mrb[52].mxu1 %v4416_v58  ;;  %1896 = vmatprep.mubr.bf16.mxu0 %v4417_v59  ;;  %v4505_v58 = vld [vmem:[%s4630_s10 + $0x2ec] ss:$36 sps:$4 sm:$0xff]   ;;  %v5013_v59 = vld [vmem:[%s4630_s10 + $0x2e0] ss:$36 sps:$4 sm:$0xff]  }
  0xa2   : > { %2057 = vmatprep.mubr.bf16.mxu1 %v4419_v60  ;;  %v4508_v60 = vld [vmem:[%s4630_s10 + $0x2e8] ss:$36 sps:$4 sm:$0xff]  }
  0xa8   : > { %1897 = vmatmul.mubr.bf16.gmra.mrb[56].mxu0 %v4421_v61  ;;  %v4511_v61 = vld [vmem:[%s4630_s10 + $0x32c] ss:$36 sps:$4 sm:$0xff]  }
  0xa9   : > { %2058 = vmatmul.mubr.bf16.gmra.mrb[56].mxu1 %v4422_v62  ;;  %1904 = vmatprep.mubr.bf16.mxu0 %v4427_v63  ;;  %v4513_v62 = vld [vmem:[%s4630_s10 + $0x334] ss:$36 sps:$4 sm:$0xff]  }
  0xaa   : > { %2065 = vmatprep.mubr.bf16.mxu1 %v4429_v0 }
  0xb0   : > { %1905 = vmatmul.mubr.bf16.gmra.mrb[60].mxu0 %v4431_v1  ;;  %v5022_v1 = vld [vmem:[%s5755_s3] ss:$0 sm:$0xff] }
  0xb1   : > { %2066 = vmatmul.mubr.bf16.gmra.mrb[60].mxu1 %v4432_v2  ;;  %2106 = vmatprep.mubr.bf16.mxu0 %v4435_v3  ;;  %v5025_v3 = vld [vmem:[%s4630_s10 + $0x328] ss:$36 sps:$4 sm:$0xff]  }
  0xb2   : > { %2267 = vmatprep.mubr.bf16.mxu1 %v4438_v4 }
  0xb8   : > { %2107 = vmatmul.mubr.bf16.vlgmr.msra.gmra.mrb[64].mxu0 %v4901_v5 }
  0xb9   : > { %2268 = vmatmul.mubr.bf16.vlgmr.msra.gmra.mrb[64].mxu1 %v4436_v6  ;;  %4167 = vmatpush3.bf16.msra.mxu0 %v4439_v43  ;;  %v4985_v43 = vld [vmem:[%s4630_s10 + $0x1c0] ss:$36 sps:$4 sm:$0xff]  }
  0xba   : > { %4215 = vmatpush3.bf16.msra.mxu1 %v4440_v44  ;;  %2114 = vmatprep.mubr.bf16.mxu0 %v4441_v7  ;;  %v4480_v44 = vld [vmem:[%s4630_s10 + $0x1c8] ss:$36 sps:$4 sm:$0xff]  }
  0xbb   : > { %2275 = vmatprep.mubr.bf16.mxu1 %v4443_v8  ;;  %4168 = vmatprep.subr.bf16.mxu0 %v4453_v9  ;;  %v4516_v8 = vld [vmem:[%s4630_s10 + $0x330] ss:$36 sps:$4 sm:$0xff]  }
  0xbc   : > { %4216 = vmatprep.subr.bf16.mxu1 %v4454_v10 }
  0xbd   : > { %4169 = vmatpush3.bf16.msra.mxu0 %v4453_v9  ;;  %v4517_v9 = vld [vmem:[%s4630_s10 + $0x374] ss:$36 sps:$4 sm:$0xff]  }
  0xbe   : > { %4217 = vmatpush3.bf16.msra.mxu1 %v4454_v10  ;;  %4170 = vmatprep.subr.bf16.mxu0 %v4467_v12 }
  0xbf   : > { %4218 = vmatprep.subr.bf16.mxu1 %v4468_v15 }
  0xc0   : > { %2115 = vmatmul.mubr.bf16.gmra.mrb[68].mxu0 %v4914_v11 }
  0xc1   : > { %2276 = vmatmul.mubr.bf16.gmra.mrb[68].mxu1 %v4446_v13  ;;  %2122 = vmatprep.mubr.bf16.mxu0 %v4447_v14  ;;  %v4519_v14 = vld [vmem:[%s4630_s10 + $0x37c] ss:$36 sps:$4 sm:$0xff]  }
  0xc2   : > { %2283 = vmatprep.mubr.bf16.mxu1 %v4449_v16  ;;  %4171 = vmatpush3.bf16.msra.mxu0 %v4467_v12 }
  0xc3   : > { %4219 = vmatpush3.bf16.msra.mxu1 %v4468_v15  ;;  %4172 = vmatprep.subr.bf16.mxu0 %v4481_v17 }
  0xc4   : > { %4220 = vmatprep.subr.bf16.mxu1 %v4482_v18 }
  0xc6   : > { %4173 = vmatpush3.bf16.msra.mxu0 %v4481_v17 }
  0xc7   : > { %4221 = vmatpush3.bf16.msra.mxu1 %v4482_v18  ;;  %4174 = vmatprep.subr.bf16.mxu0 %v4495_v19 }
  0xc8   : > { %2123 = vmatmul.mubr.bf16.gmra.mrb[72].mxu0 %v4936_v20  ;;  %4222 = vmatprep.subr.bf16.mxu1 %v4496_v21 }
  0xc9   : > { %2284 = vmatmul.mubr.bf16.gmra.mrb[72].mxu1 %v4452_v22  ;;  %2130 = vmatprep.mubr.bf16.mxu0 %v4455_v23 }
  0xca   : > { %2291 = vmatprep.mubr.bf16.mxu1 %v4457_v24  ;;  %4175 = vmatpush3.bf16.msra.mxu0 %v4495_v19 }
  0xcb   : > { %4223 = vmatpush3.bf16.msra.mxu1 %v4496_v21  ;;  %4176 = vmatprep.subr.bf16.mxu0 %v4509_v25 }
  0xcc   : > { %4224 = vmatprep.subr.bf16.mxu1 %v4510_v26 }
  0xce   : > { %4177 = vmatpush3.bf16.msra.mxu0 %v4509_v25 }
  0xcf   : > { %4225 = vmatpush3.bf16.msra.mxu1 %v4510_v26  ;;  %4178 = vmatprep.subr.bf16.mxu0 %v4523_v27  ;;  %v5038_v26 = vld [vmem:[%s4630_s10 + $0x370] ss:$36 sps:$4 sm:$0xff]  }
  0xd0   : > { %2131 = vmatmul.mubr.bf16.gmra.mrb[76].mxu0 %v4955_v28  ;;  %4226 = vmatprep.subr.bf16.mxu1 %v4524_v29 }
  0xd1   : > { %2292 = vmatmul.mubr.bf16.gmra.mrb[76].mxu1 %v4460_v30  ;;  %2138 = vmatprep.mubr.bf16.mxu0 %v4461_v31  ;;  %v4522_v31 = vld [vmem:[%s4630_s10 + $0x378] ss:$36 sps:$4 sm:$0xff]  }
  0xd2   : > { %2299 = vmatprep.mubr.bf16.mxu1 %v4463_v32  ;;  %4179 = vmatpush3.bf16.msra.mxu0 %v4523_v27  ;;  %v4525_v32 = vld [vmem:[%s4630_s10 + $0x3bc] ss:$36 sps:$4 sm:$0xff]  }
  0xd3   : > { %4227 = vmatpush3.bf16.msra.mxu1 %v4524_v29  ;;  %4180 = vmatprep.subr.bf16.mxu0 %v4537_v33 }
  0xd4   : > { %4228 = vmatprep.subr.bf16.mxu1 %v4538_v34 }
  0xd6   : > { %4181 = vmatpush3.bf16.msra.mxu0 %v4537_v33 }
  0xd7   : > { %4229 = vmatpush3.bf16.msra.mxu1 %v4538_v34 }
  0xd8   : > { %2139 = vmatmul.mubr.bf16.gmra.mrb[80].mxu0 %v4971_v35 }
  0xd9   : > { %2300 = vmatmul.mubr.bf16.gmra.mrb[80].mxu1 %v4466_v36  ;;  %2146 = vmatprep.mubr.bf16.mxu0 %v4469_v37  ;;  %v4527_v37 = vld [vmem:[%s4630_s10 + $0x3c4] ss:$36 sps:$4 sm:$0xff]  }
  0xda   : > { %2307 = vmatprep.mubr.bf16.mxu1 %v4471_v38 }
  0xe0   : > { %2147 = vmatmul.mubr.bf16.gmra.mrb[84].mxu0 %v4978_v39 }
  0xe1   : > { %2308 = vmatmul.mubr.bf16.gmra.mrb[84].mxu1 %v4474_v40  ;;  %2154 = vmatprep.mubr.bf16.mxu0 %v4475_v41 }
  0xe2   : > { %2315 = vmatprep.mubr.bf16.mxu1 %v4477_v42 }
  0xe8   : > { %2155 = vmatmul.mubr.bf16.gmra.mrb[88].mxu0 %v4985_v43 }
  0xe9   : > { %2316 = vmatmul.mubr.bf16.gmra.mrb[88].mxu1 %v4480_v44  ;;  %2162 = vmatprep.mubr.bf16.mxu0 %v4483_v45 }
  0xea   : > { %2323 = vmatprep.mubr.bf16.mxu1 %v4485_v46 }
  0xf0   : > { %2163 = vmatmul.mubr.bf16.gmra.mrb[92].mxu0 %v4992_v47 }
  0xf1   : > { %2324 = vmatmul.mubr.bf16.gmra.mrb[92].mxu1 %v4488_v48  ;;  %2170 = vmatprep.mubr.bf16.mxu0 %v4489_v49 }
  0xf2   : > { %2331 = vmatprep.mubr.bf16.mxu1 %v4491_v50 }
  0xf8   : > { %2171 = vmatmul.mubr.bf16.gmra.mrb[96].mxu0 %v4999_v51 }
  0xf9   : > { %2332 = vmatmul.mubr.bf16.gmra.mrb[96].mxu1 %v4494_v52  ;;  %2178 = vmatprep.mubr.bf16.mxu0 %v4497_v53  ;;  %v5051_v52 = vld [vmem:[%s4630_s10 + $0x3b8] ss:$36 sps:$4 sm:$0xff]  }
  0xfa   : > { %2339 = vmatprep.mubr.bf16.mxu1 %v4499_v54 }
 0x100   : > { %2179 = vmatmul.mubr.bf16.gmra.mrb[100].mxu0 %v5006_v55 }
 0x101   : > { %2340 = vmatmul.mubr.bf16.gmra.mrb[100].mxu1 %v4502_v56  ;;  %2186 = vmatprep.mubr.bf16.mxu0 %v4503_v57  ;;  %v4530_v57 = vld [vmem:[%s4630_s10 + $0x3c0] ss:$36 sps:$4 sm:$0xff]  }
 0x102   : > { %2347 = vmatprep.mubr.bf16.mxu1 %v4505_v58  ;;  %v4531_v58 = vld [vmem:[%s4630_s10 + $0x404] ss:$36 sps:$4 sm:$0xff]  }
 0x108   : > { %2187 = vmatmul.mubr.bf16.gmra.mrb[104].mxu0 %v5013_v59 }
 0x109   : > { %2348 = vmatmul.mubr.bf16.gmra.mrb[104].mxu1 %v4508_v60  ;;  %2194 = vmatprep.mubr.bf16.mxu0 %v4511_v61 }
 0x10a   : > { %2355 = vmatprep.mubr.bf16.mxu1 %v4513_v62 }
 0x10b   : > { %v3686_v63 = vpop.f32.mrb[0].mxu0 }
 0x10c   : > { %v3798_v0 = vpop.f32.mrb[0].mxu1  ;;  %v3687_v2 = vpop.f32.mrb[1].mxu0 }
 0x10d   : > { %v3688_v4 = vadd.f32 %v3687_v2, %v3686_v63  ;;  %v3799_v6 = vpop.f32.mrb[1].mxu1  ;;  %v3689_v7 = vpop.f32.mrb[2].mxu0  ;;  %v4533_v63 = vld [vmem:[%s4630_s10 + $0x40c] ss:$36 sps:$4 sm:$0xff]  }
 0x10e   : > { %v3800_v10 = vadd.f32 %v3799_v6, %v3798_v0  ;;  %v3801_v12 = vpop.f32.mrb[2].mxu1  ;;  %v3690_v13 = vpop.f32.mrb[3].mxu0 }
 0x10f   : > { %v1787_v15 = vadd.f32 %v3688_v4, %v5022_v1  ;;  %v3691_v16 = vadd.f32 %v3690_v13, %v3689_v7  ;;  %v3802_v17 = vpop.f32.mrb[3].mxu1 }
 0x110   : > { %v3803_v18 = vadd.f32 %v3802_v17, %v3801_v12  ;;  %2195 = vmatmul.mubr.bf16.gmra.mrb[108].mxu0 %v5025_v3 }
 0x111   : > { %v5032_v19 = vadd.f32 %v3800_v10, %v1787_v15  ;;  %v1790_v21 = vadd.f32 %v3691_v16, %v5022_v1  ;;  %2356 = vmatmul.mubr.bf16.gmra.mrb[108].mxu1 %v4516_v8  ;;  %2202 = vmatprep.mubr.bf16.mxu0 %v4517_v9 }
 0x112   : > { %2363 = vmatprep.mubr.bf16.mxu1 %v4519_v14  ;;  %v5064_v14 = vld [vmem:[%s4630_s10 + $0x400] ss:$36 sps:$4 sm:$0xff]  }
 0x113   : > { %v5035_v22 = vadd.f32 %v3803_v18, %v1790_v21  ;;  %v3692_v23 = vpop.f32.mrb[4].mxu0  ;;  %v4536_v18 = vld [vmem:[%s4630_s10 + $0x408] ss:$36 sps:$4 sm:$0xff]  }
 0x114   : > { %v3804_v24 = vpop.f32.mrb[4].mxu1  ;;  %v3693_v25 = vpop.f32.mrb[5].mxu0  ;;  %v4539_v21 = vld [vmem:[%s4630_s10 + $0x44c] ss:$36 sps:$4 sm:$0xff]  }
 0x115   : > { %v3694_v27 = vadd.f32 %v3693_v25, %v3692_v23  ;;  %v3805_v29 = vpop.f32.mrb[5].mxu1  ;;  %v3695_v30 = vpop.f32.mrb[6].mxu0 }
 0x116   : > { %v3806_v33 = vadd.f32 %v3805_v29, %v3804_v24  ;;  %v3807_v34 = vpop.f32.mrb[6].mxu1  ;;  %v3696_v36 = vpop.f32.mrb[7].mxu0 }
 0x117   : > { %v1795_v38 = vadd.f32 %v3694_v27, %v5022_v1  ;;  %v3697_v40 = vadd.f32 %v3696_v36, %v3695_v30  ;;  %v3808_v41 = vpop.f32.mrb[7].mxu1  ;;  %v4541_v27 = vld [vmem:[%s4630_s10 + $0x454] ss:$36 sps:$4 sm:$0xff]  }
 0x118   : > { %v3809_v42 = vadd.f32 %v3808_v41, %v3807_v34  ;;  %2203 = vmatmul.mubr.bf16.gmra.mrb[112].mxu0 %v5038_v26  ;;  %v5077_v41 = vld [vmem:[%s4630_s10 + $0x448] ss:$36 sps:$4 sm:$0xff]  }
 0x119   : > { %v5045_v44 = vadd.f32 %v3806_v33, %v1795_v38  ;;  %v1798_v45 = vadd.f32 %v3697_v40, %v5022_v1  ;;  %2364 = vmatmul.mubr.bf16.gmra.mrb[112].mxu1 %v4522_v31  ;;  %2210 = vmatprep.mubr.bf16.mxu0 %v4525_v32 }
 0x11a   : > { %2371 = vmatprep.mubr.bf16.mxu1 %v4527_v37 }
 0x11b   : > { %v5048_v46 = vadd.f32 %v3809_v42, %v1798_v45  ;;  %v3698_v48 = vpop.f32.mrb[8].mxu0 }
 0x11c   : > { %v3810_v49 = vpop.f32.mrb[8].mxu1  ;;  %v3699_v50 = vpop.f32.mrb[9].mxu0 }
 0x11d   : > { %v3700_v53 = vadd.f32 %v3699_v50, %v3698_v48  ;;  %v3811_v54 = vpop.f32.mrb[9].mxu1  ;;  %v3701_v56 = vpop.f32.mrb[10].mxu0  ;;  %v4545_v50 = vld [vmem:[%s4630_s10 + $0x20] ss:$36 sps:$4 sm:$0xff]  }
 0x11e   : > { %v3812_v60 = vadd.f32 %v3811_v54, %v3810_v49  ;;  %v3813_v61 = vpop.f32.mrb[10].mxu1  ;;  %v3702_v62 = vpop.f32.mrb[11].mxu0  ;;  %v4544_v49 = vld [vmem:[%s4630_s10 + $0x450] ss:$36 sps:$4 sm:$0xff]  }
 0x11f   : > { %v1803_v0 = vadd.f32 %v3700_v53, %v5022_v1  ;;  %v3703_v2 = vadd.f32 %v3702_v62, %v3701_v56  ;;  %v3814_v4 = vpop.f32.mrb[11].mxu1 }
 0x120   : > { %v3815_v6 = vadd.f32 %v3814_v4, %v3813_v61  ;;  %2211 = vmatmul.mubr.bf16.gmra.mrb[116].mxu0 %v5051_v52 }
 0x121   : > { %v5058_v7 = vadd.f32 %v3812_v60, %v1803_v0  ;;  %v1806_v8 = vadd.f32 %v3703_v2, %v5022_v1  ;;  %2372 = vmatmul.mubr.bf16.gmra.mrb[116].mxu1 %v4530_v57  ;;  %2218 = vmatprep.mubr.bf16.mxu0 %v4531_v58 }
 0x122   : > { %2379 = vmatprep.mubr.bf16.mxu1 %v4533_v63 }
 0x123   : > { %v5061_v9 = vadd.f32 %v3815_v6, %v1806_v8  ;;  %v3704_v10 = vpop.f32.mrb[12].mxu0  ;;  %v4546_v8 = vld [vmem:[%s4630_s10 + $0x68] ss:$36 sps:$4 sm:$0xff]  }
 0x124   : > { %v3816_v12 = vpop.f32.mrb[12].mxu1  ;;  %v3705_v13 = vpop.f32.mrb[13].mxu0 }
 0x125   : > { %v3706_v15 = vadd.f32 %v3705_v13, %v3704_v10  ;;  %v3817_v16 = vpop.f32.mrb[13].mxu1  ;;  %v3707_v17 = vpop.f32.mrb[14].mxu0 }
 0x126   : > { %v3818_v23 = vadd.f32 %v3817_v16, %v3816_v12  ;;  %v3819_v24 = vpop.f32.mrb[14].mxu1  ;;  %v3708_v25 = vpop.f32.mrb[15].mxu0 }
 0x127   : > { %v1811_v29 = vadd.f32 %v3706_v15, %v5022_v1  ;;  %v3709_v30 = vadd.f32 %v3708_v25, %v3707_v17  ;;  %v3820_v31 = vpop.f32.mrb[15].mxu1  ;;  %v4547_v15 = vld [vmem:[%s4630_s10 + $0xb0] ss:$36 sps:$4 sm:$0xff]  }
 0x128   : > { %v3821_v32 = vadd.f32 %v3820_v31, %v3819_v24  ;;  %2219 = vmatmul.mubr.bf16.gmra.mrb[120].mxu0 %v5064_v14 }
 0x129   : > { %v5071_v33 = vadd.f32 %v3818_v23, %v1811_v29  ;;  %v1814_v34 = vadd.f32 %v3709_v30, %v5022_v1  ;;  %2380 = vmatmul.mubr.bf16.gmra.mrb[120].mxu1 %v4536_v18  ;;  %2226 = vmatprep.mubr.bf16.mxu0 %v4539_v21 }
 0x12a   : > { %2387 = vmatprep.mubr.bf16.mxu1 %v4541_v27 }
 0x12b   : > { %v5074_v36 = vadd.f32 %v3821_v32, %v1814_v34  ;;  %v3710_v37 = vpop.f32.mrb[16].mxu0  ;;  %v4548_v34 = vld [vmem:[%s4630_s10 + $0xf8] ss:$36 sps:$4 sm:$0xff]  }
 0x12c   : > { %v3822_v38 = vpop.f32.mrb[16].mxu1  ;;  %v3711_v40 = vpop.f32.mrb[17].mxu0 }
 0x12d   : > { %v3712_v42 = vadd.f32 %v3711_v40, %v3710_v37  ;;  %v3823_v45 = vpop.f32.mrb[17].mxu1  ;;  %v3713_v48 = vpop.f32.mrb[18].mxu0 }
 0x12e   : > { %v3824_v53 = vadd.f32 %v3823_v45, %v3822_v38  ;;  %v3825_v54 = vpop.f32.mrb[18].mxu1  ;;  %v3714_v56 = vpop.f32.mrb[19].mxu0 }
 0x12f   : > { %v1819_v57 = vadd.f32 %v3712_v42, %v5022_v1  ;;  %v3715_v58 = vadd.f32 %v3714_v56, %v3713_v48  ;;  %v3826_v60 = vpop.f32.mrb[19].mxu1  ;;  %v4549_v42 = vld [vmem:[%s4630_s10 + $0x140] ss:$36 sps:$4 sm:$0xff]  }
 0x130   : > { %v3827_v61 = vadd.f32 %v3826_v60, %v3825_v54  ;;  %2227 = vmatmul.mubr.bf16.gmra.mrb[124].mxu0 %v5077_v41 }
 0x131   : > { %v5083_v62 = vadd.f32 %v3824_v53, %v1819_v57  ;;  %v1822_v63 = vadd.f32 %v3715_v58, %v5022_v1  ;;  %2388 = vmatmul.mubr.bf16.gmra.mrb[124].mxu1 %v4544_v49  ;;  %4182 = vmatprep.mubr.bf16.mxu0 %v4545_v50 }
 0x132   : > { %4230 = vmatprep.mubr.bf16.mxu1 %v4901_v5 }
 0x133   : > { %v5087_v0 = vadd.f32 %v3827_v61, %v1822_v63  ;;  %v3716_v2 = vpop.f32.mrb[20].mxu0  ;;  %v4550_v63 = vld [vmem:[%s4630_s10 + $0x188] ss:$36 sps:$4 sm:$0xff]  }
 0x134   : > { %v3828_v4 = vpop.f32.mrb[20].mxu1  ;;  %v3717_v6 = vpop.f32.mrb[21].mxu0 }
 0x135   : > { %v3718_v10 = vadd.f32 %v3717_v6, %v3716_v2  ;;  %v3829_v12 = vpop.f32.mrb[21].mxu1  ;;  %v3719_v13 = vpop.f32.mrb[22].mxu0 }
 0x136   : > { %v3830_v16 = vadd.f32 %v3829_v12, %v3828_v4  ;;  %v3831_v17 = vpop.f32.mrb[22].mxu1  ;;  %v3720_v18 = vpop.f32.mrb[23].mxu0 }
 0x137   : > { %v1827_v21 = vadd.f32 %v3718_v10, %v5022_v1  ;;  %v3721_v23 = vadd.f32 %v3720_v18, %v3719_v13  ;;  %v3832_v24 = vpop.f32.mrb[23].mxu1 }
 0x138   : > { %v3833_v5 = vadd.f32 %v3832_v24, %v3831_v17  ;;  %4183 = vmatmul.mubr.bf16.vlgmr.msra.gmra.mrb[128].mxu0 %v4546_v8  ;;  %v4551_v8 = vld [vmem:[%s4630_s10 + $0x1d0] ss:$36 sps:$4 sm:$0xff]  }
 0x139   : > { %v5092_v25 = vadd.f32 %v3830_v16, %v1827_v21  ;;  %v1830_v27 = vadd.f32 %v3721_v23, %v5022_v1  ;;  %4231 = vmatmul.mubr.bf16.vlgmr.msra.gmra.mrb[128].mxu1 %v4914_v11  ;;  %4186 = vmatprep.mubr.bf16.mxu0 %v4547_v15 }
 0x13a   : > { %4234 = vmatprep.mubr.bf16.mxu1 %v4936_v20 }
 0x13b   : > { %v5097_v29 = vadd.f32 %v3833_v5, %v1830_v27  ;;  %v3722_v30 = vpop.f32.mrb[24].mxu0  ;;  %v4552_v27 = vld [vmem:[%s4630_s10 + $0x218] ss:$36 sps:$4 sm:$0xff]  }
 0x13c   : > { %v3834_v31 = vpop.f32.mrb[24].mxu1  ;;  %v3723_v32 = vpop.f32.mrb[25].mxu0 }
 0x13d   : > { %v3724_v37 = vadd.f32 %v3723_v32, %v3722_v30  ;;  %v3835_v38 = vpop.f32.mrb[25].mxu1  ;;  %v3725_v40 = vpop.f32.mrb[26].mxu0 }
 0x13e   : > { %v3836_v45 = vadd.f32 %v3835_v38, %v3834_v31  ;;  %v3837_v48 = vpop.f32.mrb[26].mxu1  ;;  %v3726_v49 = vpop.f32.mrb[27].mxu0 }
 0x13f   : > { %v1835_v50 = vadd.f32 %v3724_v37, %v5022_v1  ;;  %v3727_v11 = vadd.f32 %v3726_v49, %v3725_v40  ;;  %v3838_v53 = vpop.f32.mrb[27].mxu1 }
 0x140   : > { %v3839_v20 = vadd.f32 %v3838_v53, %v3837_v48  ;;  %4187 = vmatmul.mubr.bf16.gmra.mrb[132].mxu0 %v4548_v34  ;;  %v4553_v34 = vld [vmem:[%s4630_s10 + $0x260] ss:$36 sps:$4 sm:$0xff]  }
 0x141   : > { %v5102_v54 = vadd.f32 %v3836_v45, %v1835_v50  ;;  %v1838_v56 = vadd.f32 %v3727_v11, %v5022_v1  ;;  %4235 = vmatmul.mubr.bf16.gmra.mrb[132].mxu1 %v4955_v28  ;;  %4190 = vmatprep.mubr.bf16.mxu0 %v4549_v42 }
 0x142   : > { %4238 = vmatprep.mubr.bf16.mxu1 %v4971_v35 }
 0x143   : > { %v5107_v57 = vadd.f32 %v3839_v20, %v1838_v56  ;;  %v3728_v58 = vpop.f32.mrb[28].mxu0  ;;  %v4554_v56 = vld [vmem:[%s4630_s10 + $0x2a8] ss:$36 sps:$4 sm:$0xff]  }
 0x144   : > { %v3840_v60 = vpop.f32.mrb[28].mxu1  ;;  %v3729_v61 = vpop.f32.mrb[29].mxu0 }
 0x145   : > { %v3730_v2 = vadd.f32 %v3729_v61, %v3728_v58  ;;  %v3841_v4 = vpop.f32.mrb[29].mxu1  ;;  %v3731_v6 = vpop.f32.mrb[30].mxu0 }
 0x146   : > { %v3842_v10 = vadd.f32 %v3841_v4, %v3840_v60  ;;  %v3843_v12 = vpop.f32.mrb[30].mxu1  ;;  %v3732_v13 = vpop.f32.mrb[31].mxu0 }
 0x147   : > { %v1843_v15 = vadd.f32 %v3730_v2, %v5022_v1  ;;  %v3733_v28 = vadd.f32 %v3732_v13, %v3731_v6  ;;  %v3844_v16 = vpop.f32.mrb[31].mxu1 }
 0x148   : > { %v3845_v35 = vadd.f32 %v3844_v16, %v3843_v12  ;;  %4191 = vmatmul.mubr.bf16.gmra.mrb[136].mxu0 %v4550_v63  ;;  %v4555_v63 = vld [vmem:[%s4630_s10 + $0x2f0] ss:$36 sps:$4 sm:$0xff]  }
 0x149   : > { %v5112_v17 = vadd.f32 %v3842_v10, %v1843_v15  ;;  %v1846_v18 = vadd.f32 %v3733_v28, %v5022_v1  ;;  %4239 = vmatmul.mubr.bf16.gmra.mrb[136].mxu1 %v4978_v39  ;;  %4194 = vmatprep.mubr.bf16.mxu0 %v4551_v8 }
 0x14a   : > { %4242 = vmatprep.mubr.bf16.mxu1 %v4985_v43 }
 0x14b   : > { %v5117_v21 = vadd.f32 %v3845_v35, %v1846_v18  ;;  %v3734_v23 = vpop.f32.mrb[32].mxu0  ;;  %v4556_v18 = vld [vmem:[%s4630_s10 + $0x338] ss:$36 sps:$4 sm:$0xff]  }
 0x14c   : > { %v3846_v24 = vpop.f32.mrb[32].mxu1  ;;  %v3735_v5 = vpop.f32.mrb[33].mxu0 }
 0x14d   : > { %v3736_v30 = vadd.f32 %v3735_v5, %v3734_v23  ;;  %v3847_v31 = vpop.f32.mrb[33].mxu1  ;;  %v3737_v32 = vpop.f32.mrb[34].mxu0 }
 0x14e   : > { %v3848_v37 = vadd.f32 %v3847_v31, %v3846_v24  ;;  %v3849_v38 = vpop.f32.mrb[34].mxu1  ;;  %v3738_v40 = vpop.f32.mrb[35].mxu0 }
 0x14f   : > { %v1851_v42 = vadd.f32 %v3736_v30, %v5022_v1  ;;  %v3739_v39 = vadd.f32 %v3738_v40, %v3737_v32  ;;  %v3850_v45 = vpop.f32.mrb[35].mxu1 }
 0x150   : > { %v3851_v43 = vadd.f32 %v3850_v45, %v3849_v38  ;;  %4195 = vmatmul.mubr.bf16.gmra.mrb[140].mxu0 %v4552_v27  ;;  %v4557_v27 = vld [vmem:[%s4630_s10 + $0x380] ss:$36 sps:$4 sm:$0xff]  }
 0x151   : > { %v5122_v48 = vadd.f32 %v3848_v37, %v1851_v42  ;;  %v1854_v49 = vadd.f32 %v3739_v39, %v5022_v1  ;;  %4243 = vmatmul.mubr.bf16.gmra.mrb[140].mxu1 %v4992_v47  ;;  %4198 = vmatprep.mubr.bf16.mxu0 %v4553_v34 }
 0x152   : > { %4246 = vmatprep.mubr.bf16.mxu1 %v4999_v51 }
 0x153   : > { %v5127_v50 = vadd.f32 %v3851_v43, %v1854_v49  ;;  %v3740_v11 = vpop.f32.mrb[36].mxu0  ;;  %v4558_v49 = vld [vmem:[%s4630_s10 + $0x3c8] ss:$36 sps:$4 sm:$0xff]  }
 0x154   : > { %v3852_v53 = vpop.f32.mrb[36].mxu1  ;;  %v3741_v20 = vpop.f32.mrb[37].mxu0 }
 0x155   : > { %v3742_v58 = vadd.f32 %v3741_v20, %v3740_v11  ;;  %v3853_v60 = vpop.f32.mrb[37].mxu1  ;;  %v3743_v61 = vpop.f32.mrb[38].mxu0 }
 0x156   : > { %v3854_v2 = vadd.f32 %v3853_v60, %v3852_v53  ;;  %v3855_v4 = vpop.f32.mrb[38].mxu1  ;;  %v3744_v6 = vpop.f32.mrb[39].mxu0 }
 0x157   : > { %v1859_v8 = vadd.f32 %v3742_v58, %v5022_v1  ;;  %v3745_v47 = vadd.f32 %v3744_v6, %v3743_v61  ;;  %v3856_v10 = vpop.f32.mrb[39].mxu1 }
 0x158   : > { %v3857_v51 = vadd.f32 %v3856_v10, %v3855_v4  ;;  %4199 = vmatmul.mubr.bf16.gmra.mrb[144].mxu0 %v4554_v56  ;;  %v4559_v56 = vld [vmem:[%s4630_s10 + $0x410] ss:$36 sps:$4 sm:$0xff]  }
 0x159   : > { %v5132_v12 = vadd.f32 %v3854_v2, %v1859_v8  ;;  %v1862_v13 = vadd.f32 %v3745_v47, %v5022_v1  ;;  %4247 = vmatmul.mubr.bf16.gmra.mrb[144].mxu1 %v5006_v55  ;;  %4202 = vmatprep.mubr.bf16.mxu0 %v4555_v63 }
 0x15a   : > { %4250 = vmatprep.mubr.bf16.mxu1 %v5013_v59 }
 0x15b   : > { %v5137_v15 = vadd.f32 %v3857_v51, %v1862_v13  ;;  %v3746_v28 = vpop.f32.mrb[40].mxu0  ;;  %v4560_v13 = vld [vmem:[%s4630_s10 + $0x458] ss:$36 sps:$4 sm:$0xff]   ;;  %s3635_s10 = sshll.u32 %s4612_s22, 8 }
 0x15c   : > { %v3858_v16 = vpop.f32.mrb[40].mxu1  ;;  %v3747_v35 = vpop.f32.mrb[41].mxu0 }
 0x15d   : > { %v3748_v23 = vadd.f32 %v3747_v35, %v3746_v28  ;;  %v3859_v24 = vpop.f32.mrb[41].mxu1  ;;  %v3749_v5 = vpop.f32.mrb[42].mxu0 }
 0x15e   : > { %v3860_v30 = vadd.f32 %v3859_v24, %v3858_v16  ;;  %v3861_v31 = vpop.f32.mrb[42].mxu1  ;;  %v3750_v32 = vpop.f32.mrb[43].mxu0 }
 0x15f   : > { %v1867_v34 = vadd.f32 %v3748_v23, %v5022_v1  ;;  %v3751_v55 = vadd.f32 %v3750_v32, %v3749_v5  ;;  %v3862_v37 = vpop.f32.mrb[43].mxu1 }
 0x160   : > { %v3863_v59 = vadd.f32 %v3862_v37, %v3861_v31  ;;  %4203 = vmatmul.mubr.bf16.gmra.mrb[148].mxu0 %v4556_v18 }
 0x161   : > { %v5142_v38 = vadd.f32 %v3860_v30, %v1867_v34  ;;  %v1870_v40 = vadd.f32 %v3751_v55, %v5022_v1  ;;  %4251 = vmatmul.mubr.bf16.gmra.mrb[148].mxu1 %v5025_v3  ;;  %4206 = vmatprep.mubr.bf16.mxu0 %v4557_v27 }
 0x162   : > { %4254 = vmatprep.mubr.bf16.mxu1 %v5038_v26 }
 0x163   : > { %v5147_v42 = vadd.f32 %v3863_v59, %v1870_v40  ;;  %v3752_v39 = vpop.f32.mrb[44].mxu0 }
 0x164   : > { %v3864_v45 = vpop.f32.mrb[44].mxu1  ;;  %v3753_v43 = vpop.f32.mrb[45].mxu0 }
 0x165   : > { %v3754_v11 = vadd.f32 %v3753_v43, %v3752_v39  ;;  %v3865_v53 = vpop.f32.mrb[45].mxu1  ;;  %v3755_v20 = vpop.f32.mrb[46].mxu0 }
 0x166   : > { %v3866_v58 = vadd.f32 %v3865_v53, %v3864_v45  ;;  %v3867_v60 = vpop.f32.mrb[46].mxu1  ;;  %v3756_v61 = vpop.f32.mrb[47].mxu0 }
 0x167   : > { %v1875_v63 = vadd.f32 %v3754_v11, %v5022_v1  ;;  %v3757_v3 = vadd.f32 %v3756_v61, %v3755_v20  ;;  %v3868_v2 = vpop.f32.mrb[47].mxu1 }
 0x168   : > { %v3869_v4 = vadd.f32 %v3868_v2, %v3867_v60  ;;  %4207 = vmatmul.mubr.bf16.gmra.mrb[152].mxu0 %v4558_v49 }
 0x169   : > { %v5152_v26 = vadd.f32 %v3866_v58, %v1875_v63  ;;  %v1878_v6 = vadd.f32 %v3757_v3, %v5022_v1  ;;  %4255 = vmatmul.mubr.bf16.gmra.mrb[152].mxu1 %v5051_v52  ;;  %4210 = vmatprep.mubr.bf16.mxu0 %v4559_v56 }
 0x16a   : > { %4258 = vmatprep.mubr.bf16.mxu1 %v5064_v14 }
 0x16b   : > { %v5157_v8 = vadd.f32 %v3869_v4, %v1878_v6  ;;  %v3758_v47 = vpop.f32.mrb[48].mxu0 }
 0x16c   : > { %v3870_v10 = vpop.f32.mrb[48].mxu1  ;;  %v3759_v51 = vpop.f32.mrb[49].mxu0 }
 0x16d   : > { %v3760_v28 = vadd.f32 %v3759_v51, %v3758_v47  ;;  %v3871_v16 = vpop.f32.mrb[49].mxu1  ;;  %v3761_v35 = vpop.f32.mrb[50].mxu0 }
 0x16e   : > { %v3872_v18 = vadd.f32 %v3871_v16, %v3870_v10  ;;  %v3873_v23 = vpop.f32.mrb[50].mxu1  ;;  %v3762_v24 = vpop.f32.mrb[51].mxu0 }
 0x16f   : > { %v1883_v5 = vadd.f32 %v3760_v28, %v5022_v1  ;;  %v3763_v27 = vadd.f32 %v3762_v24, %v3761_v35  ;;  %v3874_v30 = vpop.f32.mrb[51].mxu1 }
 0x170   : > { %v3875_v52 = vadd.f32 %v3874_v30, %v3873_v23  ;;  %4211 = vmatmul.mubr.bf16.gmra.mrb[156].mxu0 %v4560_v13 }
 0x171   : > { %v5161_v31 = vadd.f32 %v3872_v18, %v1883_v5  ;;  %v1886_v14 = vadd.f32 %v3763_v27, %v5022_v1  ;;  %4259 = vmatmul.mubr.bf16.gmra.mrb[156].mxu1 %v5077_v41 }
 0x173   : > { %v5165_v32 = vadd.f32 %v3875_v52, %v1886_v14  ;;  %v3764_v34 = vpop.f32.mrb[52].mxu0 }
 0x174   : > { %v3876_v55 = vpop.f32.mrb[52].mxu1  ;;  %v3765_v37 = vpop.f32.mrb[53].mxu0 }
 0x175   : > { %v3766_v59 = vadd.f32 %v3765_v37, %v3764_v34  ;;  %v3877_v40 = vpop.f32.mrb[53].mxu1  ;;  %v3767_v39 = vpop.f32.mrb[54].mxu0 }
 0x176   : > { %v3878_v45 = vadd.f32 %v3877_v40, %v3876_v55  ;;  %v3879_v43 = vpop.f32.mrb[54].mxu1  ;;  %v3768_v49 = vpop.f32.mrb[55].mxu0 }
 0x177   : > { %v1891_v11 = vadd.f32 %v3766_v59, %v5022_v1  ;;  %v3769_v53 = vadd.f32 %v3768_v49, %v3767_v39  ;;  %v3880_v20 = vpop.f32.mrb[55].mxu1 }
 0x178   : > { %v3881_v56 = vadd.f32 %v3880_v20, %v3879_v43 }
 0x179   : > { %v5168_v58 = vadd.f32 %v3878_v45, %v1891_v11  ;;  %v1894_v41 = vadd.f32 %v3769_v53, %v5022_v1 }
 0x17b   : > { %v5171_v60 = vadd.f32 %v3881_v56, %v1894_v41  ;;  %v3770_v61 = vpop.f32.mrb[56].mxu0 }
 0x17c   : > { %v3882_v63 = vpop.f32.mrb[56].mxu1  ;;  %v3771_v3 = vpop.f32.mrb[57].mxu0 }
 0x17d   : > { %v3772_v2 = vadd.f32 %v3771_v3, %v3770_v61  ;;  %v3883_v4 = vpop.f32.mrb[57].mxu1  ;;  %v3773_v6 = vpop.f32.mrb[58].mxu0 }
 0x17e   : > { %v3884_v47 = vadd.f32 %v3883_v4, %v3882_v63  ;;  %v3885_v10 = vpop.f32.mrb[58].mxu1  ;;  %v3774_v51 = vpop.f32.mrb[59].mxu0 }
 0x17f   : > { %v1899_v13 = vadd.f32 %v3772_v2, %v5022_v1  ;;  %v3775_v28 = vadd.f32 %v3774_v51, %v3773_v6  ;;  %v3886_v16 = vpop.f32.mrb[59].mxu1 }
 0x180   : > { %v3887_v35 = vadd.f32 %v3886_v16, %v3885_v10 }
 0x181   : > { %v5174_v18 = vadd.f32 %v3884_v47, %v1899_v13  ;;  %v1902_v23 = vadd.f32 %v3775_v28, %v5022_v1 }
 0x183   : > { %v5177_v24 = vadd.f32 %v3887_v35, %v1902_v23  ;;  %v3776_v5 = vpop.f32.mrb[60].mxu0 }
 0x184   : > { %v3888_v27 = vpop.f32.mrb[60].mxu1  ;;  %v3777_v30 = vpop.f32.mrb[61].mxu0 }
 0x185   : > { %v3778_v52 = vadd.f32 %v3777_v30, %v3776_v5  ;;  %v3889_v14 = vpop.f32.mrb[61].mxu1  ;;  %v3779_v34 = vpop.f32.mrb[62].mxu0 }
 0x186   : > { %v3890_v55 = vadd.f32 %v3889_v14, %v3888_v27  ;;  %v3891_v37 = vpop.f32.mrb[62].mxu1  ;;  %v3780_v59 = vpop.f32.mrb[63].mxu0 }
 0x187   : > { %v1907_v40 = vadd.f32 %v3778_v52, %v5022_v1  ;;  %v3781_v39 = vadd.f32 %v3780_v59, %v3779_v34  ;;  %v3892_v45 = vpop.f32.mrb[63].mxu1 }
 0x188   : > { %v3893_v43 = vadd.f32 %v3892_v45, %v3891_v37 }
 0x189   : > { %v5180_v49 = vadd.f32 %v3890_v55, %v1907_v40  ;;  %v1910_v11 = vadd.f32 %v3781_v39, %v5022_v1 }
 0x18b   : > { %v5183_v53 = vadd.f32 %v3893_v43, %v1910_v11  ;;  %v3910_v20 = vpop.f32.mrb[64].mxu0 }
 0x18c   : > { %v4022_v56 = vpop.f32.mrb[64].mxu1  ;;  %v3911_v41 = vpop.f32.mrb[65].mxu0 }
 0x18d   : > { %v3912_v61 = vadd.f32 %v3911_v41, %v3910_v20  ;;  %v4023_v63 = vpop.f32.mrb[65].mxu1  ;;  %v3913_v3 = vpop.f32.mrb[66].mxu0 }
 0x18e   : > { %v4024_v2 = vadd.f32 %v4023_v63, %v4022_v56  ;;  %v4025_v4 = vpop.f32.mrb[66].mxu1  ;;  %v3914_v6 = vpop.f32.mrb[67].mxu0 }
 0x18f   : > { %v2109_v47 = vadd.f32 %v3912_v61, %v5032_v19  ;;  %v3915_v10 = vadd.f32 %v3914_v6, %v3913_v3  ;;  %v4026_v51 = vpop.f32.mrb[67].mxu1 }
 0x190   : > { %v4027_v13 = vadd.f32 %v4026_v51, %v4025_v4 }
 0x191   : > { %v2112_v28 = vadd.f32 %v3915_v10, %v5035_v22  ;;  %v5187_v16 = vadd.f32 %v4024_v2, %v2109_v47 }
 0x193   : > { %v3916_v1 = vpop.f32.mrb[68].mxu0  ;;  %v5189_v35 = vadd.f32 %v4027_v13, %v2112_v28 }
 0x194   : > { %v4028_v23 = vpop.f32.mrb[68].mxu1  ;;  %v3917_v5 = vpop.f32.mrb[69].mxu0 }
 0x195   : > { %v3918_v27 = vadd.f32 %v3917_v5, %v3916_v1  ;;  %v4029_v30 = vpop.f32.mrb[69].mxu1  ;;  %v3919_v52 = vpop.f32.mrb[70].mxu0 }
 0x196   : > { %v4030_v14 = vadd.f32 %v4029_v30, %v4028_v23  ;;  %v4031_v34 = vpop.f32.mrb[70].mxu1  ;;  %v3920_v55 = vpop.f32.mrb[71].mxu0 }
 0x197   : > { %v2117_v19 = vadd.f32 %v3918_v27, %v5045_v44  ;;  %v3921_v37 = vadd.f32 %v3920_v55, %v3919_v52  ;;  %v4032_v59 = vpop.f32.mrb[71].mxu1 }
 0x198   : > { %v4033_v40 = vadd.f32 %v4032_v59, %v4031_v34 }
 0x199   : > { %v2120_v22 = vadd.f32 %v3921_v37, %v5048_v46  ;;  %v5193_v39 = vadd.f32 %v4030_v14, %v2117_v19 }
 0x19b   : > { %v3922_v45 = vpop.f32.mrb[72].mxu0  ;;  %v5195_v43 = vadd.f32 %v4033_v40, %v2120_v22 }
 0x19c   : > { %v4034_v11 = vpop.f32.mrb[72].mxu1  ;;  %v3923_v20 = vpop.f32.mrb[73].mxu0 }
 0x19d   : > { %v3924_v56 = vadd.f32 %v3923_v20, %v3922_v45  ;;  %v4035_v41 = vpop.f32.mrb[73].mxu1  ;;  %v3925_v61 = vpop.f32.mrb[74].mxu0 }
 0x19e   : > { %v4036_v63 = vadd.f32 %v4035_v41, %v4034_v11  ;;  %v4037_v3 = vpop.f32.mrb[74].mxu1  ;;  %v3926_v2 = vpop.f32.mrb[75].mxu0 }
 0x19f   : > { %v2125_v44 = vadd.f32 %v3924_v56, %v5058_v7  ;;  %v3927_v4 = vadd.f32 %v3926_v2, %v3925_v61  ;;  %v4038_v6 = vpop.f32.mrb[75].mxu1 }
 0x1a0   : > { %v4039_v47 = vadd.f32 %v4038_v6, %v4037_v3 }
 0x1a1   : > { %v2128_v46 = vadd.f32 %v3927_v4, %v5061_v9  ;;  %v5199_v10 = vadd.f32 %v4036_v63, %v2125_v44 }
 0x1a3   : > { %v3928_v51 = vpop.f32.mrb[76].mxu0  ;;  %v5201_v13 = vadd.f32 %v4039_v47, %v2128_v46 }
 0x1a4   : > { %v4040_v28 = vpop.f32.mrb[76].mxu1  ;;  %v3929_v1 = vpop.f32.mrb[77].mxu0 }
 0x1a5   : > { %v3930_v23 = vadd.f32 %v3929_v1, %v3928_v51  ;;  %v4041_v5 = vpop.f32.mrb[77].mxu1  ;;  %v3931_v27 = vpop.f32.mrb[78].mxu0 }
 0x1a6   : > { %v4042_v30 = vadd.f32 %v4041_v5, %v4040_v28  ;;  %v4043_v52 = vpop.f32.mrb[78].mxu1  ;;  %v3932_v14 = vpop.f32.mrb[79].mxu0 }
 0x1a7   : > { %v2133_v7 = vadd.f32 %v3930_v23, %v5071_v33  ;;  %v3933_v34 = vadd.f32 %v3932_v14, %v3931_v27  ;;  %v4044_v55 = vpop.f32.mrb[79].mxu1 }
 0x1a8   : > { %v4045_v19 = vadd.f32 %v4044_v55, %v4043_v52 }
 0x1a9   : > { %v2136_v9 = vadd.f32 %v3933_v34, %v5074_v36  ;;  %v5205_v37 = vadd.f32 %v4042_v30, %v2133_v7 }
 0x1ab   : > { %v3934_v59 = vpop.f32.mrb[80].mxu0  ;;  %v5207_v40 = vadd.f32 %v4045_v19, %v2136_v9 }
 0x1ac   : > { %v4046_v22 = vpop.f32.mrb[80].mxu1  ;;  %v3935_v45 = vpop.f32.mrb[81].mxu0 }
 0x1ad   : > { %v3936_v11 = vadd.f32 %v3935_v45, %v3934_v59  ;;  %v4047_v20 = vpop.f32.mrb[81].mxu1  ;;  %v3937_v56 = vpop.f32.mrb[82].mxu0 }
 0x1ae   : > { %v4048_v41 = vadd.f32 %v4047_v20, %v4046_v22  ;;  %v4049_v61 = vpop.f32.mrb[82].mxu1  ;;  %v3938_v63 = vpop.f32.mrb[83].mxu0 }
 0x1af   : > { %v2141_v33 = vadd.f32 %v3936_v11, %v5083_v62  ;;  %v3939_v3 = vadd.f32 %v3938_v63, %v3937_v56  ;;  %v4050_v2 = vpop.f32.mrb[83].mxu1 }
 0x1b0   : > { %v4051_v44 = vadd.f32 %v4050_v2, %v4049_v61 }
 0x1b1   : > { %v2144_v36 = vadd.f32 %v3939_v3, %v5087_v0  ;;  %v5211_v4 = vadd.f32 %v4048_v41, %v2141_v33 }
 0x1b3   : > { %v3940_v6 = vpop.f32.mrb[84].mxu0  ;;  %v5213_v47 = vadd.f32 %v4051_v44, %v2144_v36 }
 0x1b4   : > { %v4052_v46 = vpop.f32.mrb[84].mxu1  ;;  %v3941_v51 = vpop.f32.mrb[85].mxu0 }
 0x1b5   : > { %v3942_v28 = vadd.f32 %v3941_v51, %v3940_v6  ;;  %v4053_v1 = vpop.f32.mrb[85].mxu1  ;;  %v3943_v23 = vpop.f32.mrb[86].mxu0 }
 0x1b6   : > { %v4054_v5 = vadd.f32 %v4053_v1, %v4052_v46  ;;  %v4055_v27 = vpop.f32.mrb[86].mxu1  ;;  %v3944_v30 = vpop.f32.mrb[87].mxu0 }
 0x1b7   : > { %v2149_v62 = vadd.f32 %v3942_v28, %v5092_v25  ;;  %v3945_v52 = vadd.f32 %v3944_v30, %v3943_v23  ;;  %v4056_v14 = vpop.f32.mrb[87].mxu1 }
 0x1b8   : > { %v4057_v7 = vadd.f32 %v4056_v14, %v4055_v27 }
 0x1b9   : > { %v2152_v0 = vadd.f32 %v3945_v52, %v5097_v29  ;;  %v5217_v34 = vadd.f32 %v4054_v5, %v2149_v62 }
 0x1bb   : > { %v3946_v55 = vpop.f32.mrb[88].mxu0  ;;  %v5219_v19 = vadd.f32 %v4057_v7, %v2152_v0 }
 0x1bc   : > { %v4058_v9 = vpop.f32.mrb[88].mxu1  ;;  %v3947_v59 = vpop.f32.mrb[89].mxu0 }
 0x1bd   : > { %v3948_v22 = vadd.f32 %v3947_v59, %v3946_v55  ;;  %v4059_v45 = vpop.f32.mrb[89].mxu1  ;;  %v3949_v11 = vpop.f32.mrb[90].mxu0 }
 0x1be   : > { %v4060_v20 = vadd.f32 %v4059_v45, %v4058_v9  ;;  %v4061_v56 = vpop.f32.mrb[90].mxu1  ;;  %v3950_v41 = vpop.f32.mrb[91].mxu0 }
 0x1bf   : > { %v2157_v25 = vadd.f32 %v3948_v22, %v5102_v54  ;;  %v3951_v61 = vadd.f32 %v3950_v41, %v3949_v11  ;;  %v4062_v63 = vpop.f32.mrb[91].mxu1 }
 0x1c0   : > { %v4063_v33 = vadd.f32 %v4062_v63, %v4061_v56 }
 0x1c1   : > { %v2160_v29 = vadd.f32 %v3951_v61, %v5107_v57  ;;  %v5223_v3 = vadd.f32 %v4060_v20, %v2157_v25 }
 0x1c3   : > { %v3952_v2 = vpop.f32.mrb[92].mxu0  ;;  %v5225_v44 = vadd.f32 %v4063_v33, %v2160_v29 }
 0x1c4   : > { %v4064_v36 = vpop.f32.mrb[92].mxu1  ;;  %v3953_v6 = vpop.f32.mrb[93].mxu0 }
 0x1c5   : > { %v3954_v46 = vadd.f32 %v3953_v6, %v3952_v2  ;;  %v4065_v51 = vpop.f32.mrb[93].mxu1  ;;  %v3955_v28 = vpop.f32.mrb[94].mxu0 }
 0x1c6   : > { %v4066_v1 = vadd.f32 %v4065_v51, %v4064_v36  ;;  %v4067_v23 = vpop.f32.mrb[94].mxu1  ;;  %v3956_v5 = vpop.f32.mrb[95].mxu0 }
 0x1c7   : > { %v2165_v54 = vadd.f32 %v3954_v46, %v5112_v17  ;;  %v3957_v27 = vadd.f32 %v3956_v5, %v3955_v28  ;;  %v4068_v30 = vpop.f32.mrb[95].mxu1 }
 0x1c8   : > { %v4069_v62 = vadd.f32 %v4068_v30, %v4067_v23 }
 0x1c9   : > { %v2168_v57 = vadd.f32 %v3957_v27, %v5117_v21  ;;  %v5229_v52 = vadd.f32 %v4066_v1, %v2165_v54  ;;  %v2852_v54 = vlaneseq }
 0x1cb   : > { %v3958_v14 = vpop.f32.mrb[96].mxu0  ;;  %v5231_v7 = vadd.f32 %v4069_v62, %v2168_v57  ;;  %v5243_v57 = vshrl.u32 %v2852_v54, 7 }
 0x1cc   : > { %v4070_v0 = vpop.f32.mrb[96].mxu1  ;;  %v3959_v55 = vpop.f32.mrb[97].mxu0 }
 0x1cd   : > { %v3960_v9 = vadd.f32 %v3959_v55, %v3958_v14  ;;  %v4071_v59 = vpop.f32.mrb[97].mxu1  ;;  %v3961_v22 = vpop.f32.mrb[98].mxu0 }
 0x1ce   : > { %v4072_v45 = vadd.f32 %v4071_v59, %v4070_v0  ;;  %v4073_v11 = vpop.f32.mrb[98].mxu1  ;;  %v3962_v20 = vpop.f32.mrb[99].mxu0 }
 0x1cf   : > { %v2173_v17 = vadd.f32 %v3960_v9, %v5122_v48  ;;  %v3963_v56 = vadd.f32 %v3962_v20, %v3961_v22  ;;  %v4074_v41 = vpop.f32.mrb[99].mxu1 }
 0x1d0   : > { %v4075_v25 = vadd.f32 %v4074_v41, %v4073_v11 }
 0x1d1   : > { %v2176_v21 = vadd.f32 %v3963_v56, %v5127_v50  ;;  %v5235_v61 = vadd.f32 %v4072_v45, %v2173_v17  ;;  %v2855_v56 = vadd.s32 16, %v5243_v57 }
 0x1d3   : > { %v3964_v63 = vpop.f32.mrb[100].mxu0  ;;  %v5237_v33 = vadd.f32 %v4075_v25, %v2176_v21  ;;  %v5250_v25 = vstv %s3635_s10 }
 0x1d4   : > { %v4076_v29 = vpop.f32.mrb[100].mxu1  ;;  %v3965_v2 = vpop.f32.mrb[101].mxu0 }
 0x1d5   : > { %5772 = vst [vmem:[#allocation2_spill] sm:$0xff] %v5237_v33  ;;  %v3966_v36 = vadd.f32 %v3965_v2, %v3964_v63  ;;  %v4077_v6 = vpop.f32.mrb[101].mxu1  ;;  %v3967_v46 = vpop.f32.mrb[102].mxu0  ;;  %v2856_v63 = vadd.s32 24, %v5243_v57 }
 0x1d6   : > { %v4078_v51 = vadd.f32 %v4077_v6, %v4076_v29  ;;  %v4079_v28 = vpop.f32.mrb[102].mxu1  ;;  %v3968_v1 = vpop.f32.mrb[103].mxu0 }
 0x1d7   : > { %v2181_v48 = vadd.f32 %v3966_v36, %v5132_v12  ;;  %v3969_v23 = vadd.f32 %v3968_v1, %v3967_v46  ;;  %v4080_v5 = vpop.f32.mrb[103].mxu1  ;;  %v2888_v36 = vadd.s32 %v5250_v25, %v2855_v56 }
 0x1d8   : > { %v4081_v50 = vadd.f32 %v4080_v5, %v4079_v28  ;;  %v2854_v28 = vadd.s32 8, %v5243_v57  ;;  %v2859_v5 = vadd.s32 48, %v5243_v57 }
 0x1d9   : > { %v2184_v27 = vadd.f32 %v3969_v23, %v5137_v15  ;;  %v5241_v30 = vadd.f32 %v4078_v51, %v2181_v48  ;;  %v2886_v51 = vadd.s32 %v5250_v25, %v5243_v57  ;;  %vm2920_vm0 = vcmp.lt.s32.totalorder %v2888_v36, 512 }
 0x1db   : > { %v3970_v62 = vpop.f32.mrb[104].mxu0  ;;  %v5245_v14 = vadd.f32 %v4081_v50, %v2184_v27  ;;  %vm2918_vm1 = vcmp.lt.s32.totalorder %v2886_v51, 512  ;;  %v2858_v51 = vadd.s32 40, %v5243_v57 }
 0x1dc   : > { %v4082_v0 = vpop.f32.mrb[104].mxu1  ;;  %v3971_v55 = vpop.f32.mrb[105].mxu0 }
 0x1dd   : > { %5773 = vst [vmem:[#allocation3_spill] sm:$0xff] %v5245_v14  ;;  %v3972_v9 = vadd.f32 %v3971_v55, %v3970_v62  ;;  %v4083_v59 = vpop.f32.mrb[105].mxu1  ;;  %v3973_v22 = vpop.f32.mrb[106].mxu0  ;;  %v2857_v62 = vadd.s32 32, %v5243_v57 }
 0x1de   : > { %v4084_v12 = vadd.f32 %v4083_v59, %v4082_v0  ;;  %v4085_v45 = vpop.f32.mrb[106].mxu1  ;;  %v3974_v11 = vpop.f32.mrb[107].mxu0 }
 0x1df   : > { %v2189_v20 = vadd.f32 %v3972_v9, %v5142_v38  ;;  %v3975_v17 = vadd.f32 %v3974_v11, %v3973_v22  ;;  %v4086_v15 = vpop.f32.mrb[107].mxu1  ;;  %v2887_v22 = vadd.s32 %v5250_v25, %v2854_v28  ;;  %v2863_v28 = vadd.s32 80, %v5243_v57 }
 0x1e0   : > { %v4087_v41 = vadd.f32 %v4086_v15, %v4085_v45  ;;  %v2892_v45 = vadd.s32 %v5250_v25, %v2859_v5  ;;  %v5759_v15 = vmov 0.0   ;;  %v2864_v5 = vadd.s32 88, %v5243_v57 }
 0x1e1   : > { %v2192_v21 = vadd.f32 %v3975_v17, %v5147_v42  ;;  %v5254_v29 = vadd.f32 %v4084_v12, %v2189_v20  ;;  %v2889_v42 = vadd.s32 %v5250_v25, %v2856_v63  ;;  %v2890_v20 = vadd.s32 %v5250_v25, %v2857_v62 }
 0x1e2   : > { %v5278_v63 = vsel %vm2918_vm1, 1.0, %v5759_v15  ;;  %vm2919_vm3 = vcmp.lt.s32.totalorder %v2887_v22, 512  ;;  %vm2924_vm4 = vcmp.lt.s32.totalorder %v2892_v45, 512  ;;  %v2862_v62 = vadd.s32 72, %v5243_v57 }
 0x1e3   : > { %5774 = vst [vmem:[#allocation4_spill] sm:$0xff] %v5254_v29  ;;  %v3976_v2 = vpop.f32.mrb[108].mxu0  ;;  %v5257_v6 = vadd.f32 %v4087_v41, %v2192_v21  ;;  %vm2921_vm2 = vcmp.lt.s32.totalorder %v2889_v42, 512  ;;  %vm2922_vm5 = vcmp.lt.s32.totalorder %v2890_v20, 512  ;;  %v2861_v42 = vadd.s32 64, %v5243_v57 }
 0x1e4   : > { %v4088_v46 = vpop.f32.mrb[108].mxu1  ;;  %v3977_v38 = vpop.f32.mrb[109].mxu0 }
 0x1e5   : > { %5775 = vst [vmem:[#allocation5_spill] sm:$0xff] %v5257_v6  ;;  %v3978_v1 = vadd.f32 %v3977_v38, %v3976_v2  ;;  %v4089_v48 = vpop.f32.mrb[109].mxu1  ;;  %v3979_v23 = vpop.f32.mrb[110].mxu0  ;;  %v2860_v2 = vadd.s32 56, %v5243_v57  ;;  %v5781_v6 = vmov 0.0  }
 0x1e6   : > { %v4090_v54 = vadd.f32 %v4089_v48, %v4088_v46  ;;  %v4091_v50 = vpop.f32.mrb[110].mxu1  ;;  %v3980_v27 = vpop.f32.mrb[111].mxu0 }
 0x1e7   : > { %v2197_v0 = vadd.f32 %v3978_v1, %v5152_v26  ;;  %v3981_v55 = vadd.f32 %v3980_v27, %v3979_v23  ;;  %v4092_v9 = vpop.f32.mrb[111].mxu1  ;;  %v5273_v26 = vsel %vm2920_vm0, 1.0, %v5759_v15 }
 0x1e8   : > { %v4093_v59 = vadd.f32 %v4092_v9, %v4091_v50  ;;  %v2893_v9 = vadd.s32 %v5250_v25, %v2860_v2  ;;  %v2894_v2 = vadd.s32 %v5250_v25, %v2861_v42 }
 0x1e9   : > { %v2200_v12 = vadd.f32 %v3981_v55, %v5157_v8  ;;  %v5269_v11 = vadd.f32 %v4090_v54, %v2197_v0  ;;  %v5281_v8 = vsel %vm2921_vm2, 1.0, %v5759_v15  ;;  %v2867_v0 = vadd.s32 112, %v5243_v57 }
 0x1ea   : > { %vm2925_vm6 = vcmp.lt.s32.totalorder %v2893_v9, 512  ;;  %vm2926_vm9 = vcmp.lt.s32.totalorder %v2894_v2, 512 }
 0x1eb   : > { %5776 = vst [vmem:[#allocation6_spill] sm:$0xff] %v5269_v11  ;;  %v3982_v17 = vpop.f32.mrb[112].mxu0  ;;  %v5275_v56 = vadd.f32 %v4093_v59, %v2200_v12  ;;  %v2865_v59 = vadd.s32 96, %v5243_v57  ;;  %v2868_v12 = vadd.s32 120, %v5243_v57 }
 0x1ec   : > { %v4094_v41 = vpop.f32.mrb[112].mxu1  ;;  %v3983_v21 = vpop.f32.mrb[113].mxu0 }
 0x1ed   : > { %5777 = vst [vmem:[#allocation7_spill] sm:$0xff] %v5275_v56  ;;  %v3984_v36 = vadd.f32 %v3983_v21, %v3982_v17  ;;  %v4095_v46 = vpop.f32.mrb[113].mxu1  ;;  %v3985_v38 = vpop.f32.mrb[114].mxu0  ;;  %v2896_v21 = vadd.s32 %v5250_v25, %v2863_v28  ;;  %v2900_v28 = vadd.s32 %v5250_v25, %v2867_v0  ;;  %v2898_v45 = vadd.s32 %v5250_v25, %v2865_v59 }
 0x1ee   : > { %v4096_v1 = vadd.f32 %v4095_v46, %v4094_v41  ;;  %v4097_v48 = vpop.f32.mrb[114].mxu1  ;;  %v3986_v23 = vpop.f32.mrb[115].mxu0  ;;  %v2891_v41 = vadd.s32 %v5250_v25, %v2858_v51  ;;  %v5305_v46 = vsel %vm2924_vm4, 1.0, %v5759_v15  ;;  %v2895_v51 = vadd.s32 %v5250_v25, %v2862_v62 }
 0x1ef   : > { %v2205_v54 = vadd.f32 %v3984_v36, %v5161_v31  ;;  %v3987_v50 = vadd.f32 %v3986_v23, %v3985_v38  ;;  %v4098_v27 = vpop.f32.mrb[115].mxu1  ;;  %v5301_v36 = vsel %vm2919_vm3, 1.0, %v5759_v15  ;;  %v2897_v38 = vadd.s32 %v5250_v25, %v2864_v5 }
 0x1f0   : > { %v4099_v55 = vadd.f32 %v4098_v27, %v4097_v48  ;;  %v2901_v42 = vadd.s32 %v5250_v25, %v2868_v12  ;;  %v2866_v5 = vadd.s32 104, %v5243_v57  ;;  %vm2923_vm7 = vcmp.lt.s32.totalorder %v2891_v41, 512 }
 0x1f1   : > { %v2208_v17 = vadd.f32 %v3987_v50, %v5165_v32  ;;  %v5297_v31 = vadd.f32 %v4096_v1, %v2205_v54  ;;  %v5311_v32 = vsel %vm2922_vm5, 1.0, %v5759_v15  ;;  %vm2928_vm8 = vcmp.lt.s32.totalorder %v2896_v21, 512 }
 0x1f2   : > { %v2871_v27 = vadd.s32 144, %v5243_v57  ;;  %vm2929_vm10 = vcmp.lt.s32.totalorder %v2897_v38, 512  ;;  %vm2927_vm11 = vcmp.lt.s32.totalorder %v2895_v51, 512  ;;  %vm2932_vm12 = vcmp.lt.s32.totalorder %v2900_v28, 512 }
 0x1f3   : > { %5778 = vst [vmem:[#allocation8_spill] sm:$0xff] %v5297_v31  ;;  %v3988_v48 = vpop.f32.mrb[116].mxu0  ;;  %v5315_v22 = vadd.f32 %v4099_v55, %v2208_v17  ;;  %v2869_v17 = vadd.s32 128, %v5243_v57  ;;  %vm2930_vm13 = vcmp.lt.s32.totalorder %v2898_v45, 512  ;;  %vm2933_vm14 = vcmp.lt.s32.totalorder %v2901_v42, 512 }
 0x1f4   : > { %v4100_v1 = vpop.f32.mrb[116].mxu1  ;;  %v3989_v23 = vpop.f32.mrb[117].mxu0  ;;  %v5348_v9 = vsel %vm2929_vm10, 1.0, %v5781_v6  ;;  %v5352_v41 = vsel %vm2927_vm11, 1.0, %v5781_v6  ;;  %v5362_v2 = vsel %vm2930_vm13, 1.0, %v5781_v6  ;;  %v5366_v38 = vsel %vm2933_vm14, 1.0, %v5781_v6 }
 0x1f5   : > { %5779 = vst [vmem:[#allocation9_spill] sm:$0xff] %v5315_v22  ;;  %v3990_v54 = vadd.f32 %v3989_v23, %v3988_v48  ;;  %v4101_v50 = vpop.f32.mrb[117].mxu1  ;;  %v3991_v20 = vpop.f32.mrb[118].mxu0  ;;  %v2899_v23 = vadd.s32 %v5250_v25, %v2866_v5  ;;  %v5344_v5 = vsel %vm2926_vm9, 1.0, %v5781_v6  ;;  %v2875_v45 = vadd.s32 176, %v5243_v57 }
 0x1f6   : > { %v4102_v62 = vadd.f32 %v4101_v50, %v4100_v1  ;;  %v4103_v0 = vpop.f32.mrb[118].mxu1  ;;  %v3992_v55 = vpop.f32.mrb[119].mxu0  ;;  %v2904_v1 = vadd.s32 %v5250_v25, %v2871_v27  ;;  %v2872_v50 = vadd.s32 152, %v5243_v57 }
 0x1f7   : > { %v2213_v59 = vadd.f32 %v3990_v54, %v5168_v58  ;;  %v3993_v15 = vadd.f32 %v3992_v55, %v3991_v20  ;;  %v4104_v12 = vpop.f32.mrb[119].mxu1  ;;  %v5331_v58 = vsel %vm2925_vm6, 1.0, %v5781_v6  ;;  %v5335_v54 = vsel %vm2923_vm7, 1.0, %v5781_v6 }
 0x1f8   : > { %v4105_v48 = vadd.f32 %v4104_v12, %v4103_v0  ;;  %v5339_v20 = vsel %vm2928_vm8, 1.0, %v5781_v6  ;;  %v5358_v0 = vsel %vm2932_vm12, 1.0, %v5781_v6  ;;  %vm2931_vm15 = vcmp.lt.s32.totalorder %v2899_v23, 512 }
 0x1f9   : > { %v2216_v22 = vadd.f32 %v3993_v15, %v5171_v60  ;;  %v5327_v31 = vadd.f32 %v4102_v62, %v2213_v59  ;;  %v2902_v60 = vadd.s32 %v5250_v25, %v2869_v17  ;;  %vm2936_vm0 = vcmp.lt.s32.totalorder %v2904_v1, 512 }
 0x1fa   : > { %v2870_v59 = vadd.s32 136, %v5243_v57 }
 0x1fb   : > { %5780 = vst [vmem:[#allocation10_spill] sm:$0xff] %v5327_v31  ;;  %v3994_v15 = vpop.f32.mrb[120].mxu0  ;;  %v5354_v27 = vadd.f32 %v4105_v48, %v2216_v22  ;;  %v2905_v22 = vadd.s32 %v5250_v25, %v2872_v50  ;;  %vm2934_vm1 = vcmp.lt.s32.totalorder %v2902_v60, 512  ;;  %v2879_v50 = vadd.s32 208, %v5243_v57 }
 0x1fc   : > { %v4106_v21 = vpop.f32.mrb[120].mxu1  ;;  %v3995_v62 = vpop.f32.mrb[121].mxu0  ;;  %v2903_v33 = vadd.s32 %v5250_v25, %v2870_v59 }
 0x1fd   : > { %5782 = vst [vmem:[#allocation11_spill] sm:$0xff] %v5354_v27  ;;  %v3996_v51 = vadd.f32 %v3995_v62, %v3994_v15  ;;  %v4107_v55 = vpop.f32.mrb[121].mxu1  ;;  %v3997_v17 = vpop.f32.mrb[122].mxu0  ;;  %v2873_v27 = vadd.s32 160, %v5243_v57  ;;  %v2876_v15 = vadd.s32 184, %v5243_v57  ;;  %v2874_v62 = vadd.s32 168, %v5243_v57 }
 0x1fe   : > { %v4108_v28 = vadd.f32 %v4107_v55, %v4106_v21  ;;  %v4109_v12 = vpop.f32.mrb[122].mxu1  ;;  %v3998_v48 = vpop.f32.mrb[123].mxu0  ;;  %v2877_v21 = vadd.s32 192, %v5243_v57  ;;  %v2880_v55 = vadd.s32 216, %v5243_v57  ;;  %vm2937_vm2 = vcmp.lt.s32.totalorder %v2905_v22, 512 }
 0x1ff   : > { %v2221_v42 = vadd.f32 %v3996_v51, %v5174_v18  ;;  %v3999_v31 = vadd.f32 %v3998_v48, %v3997_v17  ;;  %v4110_v56 = vpop.f32.mrb[123].mxu1  ;;  %v5384_v18 = vsel %vm2931_vm15, 1.0, %v5781_v6  ;;  %v2908_v51 = vadd.s32 %v5250_v25, %v2875_v45 }
 0x200   : > { %v4111_v29 = vadd.f32 %v4110_v56, %v4109_v12  ;;  %v5388_v56 = vsel %vm2936_vm0, 1.0, %v5781_v6  ;;  %v2906_v17 = vadd.s32 %v5250_v25, %v2873_v27  ;;  %v2907_v22 = vadd.s32 %v5250_v25, %v2874_v62 }
 0x201   : > { %v2224_v11 = vadd.f32 %v3999_v31, %v5177_v24  ;;  %v5380_v14 = vadd.f32 %v4108_v28, %v2221_v42  ;;  %v5394_v24 = vsel %vm2934_vm1, 1.0, %v5781_v6  ;;  %v2909_v31 = vadd.s32 %v5250_v25, %v2876_v15 }
 0x202   : > { %5784 = vst [vmem:[#allocation13_spill] sm:$0xff] %v5394_v24  ;;  %v5401_v1 = vsel %vm2937_vm2, 1.0, %v5781_v6  ;;  %v2912_v48 = vadd.s32 %v5250_v25, %v2879_v50  ;;  %v2910_v27 = vadd.s32 %v5250_v25, %v2877_v21  ;;  %v2913_v45 = vadd.s32 %v5250_v25, %v2880_v55 }
 0x203   : > { %5783 = vst [vmem:[#allocation12_spill] sm:$0xff] %v5380_v14  ;;  %v4000_v12 = vpop.f32.mrb[124].mxu0  ;;  %v5398_v23 = vadd.f32 %v4111_v29, %v2224_v11  ;;  %5786 = vst [vmem:[#allocation15_spill] sm:$0xff] %v5401_v1  ;;  %vm2935_vm3 = vcmp.lt.s32.totalorder %v2903_v33, 512  ;;  %v2878_v15 = vadd.s32 200, %v5243_v57  ;;  %v2883_v29 = vadd.s32 240, %v5243_v57 }
 0x204   : > { %v4112_v59 = vpop.f32.mrb[124].mxu1  ;;  %v4001_v28 = vpop.f32.mrb[125].mxu0  ;;  %vm2940_vm4 = vcmp.lt.s32.totalorder %v2908_v51, 512  ;;  %vm2938_vm5 = vcmp.lt.s32.totalorder %v2906_v17, 512  ;;  %v2881_v1 = vadd.s32 224, %v5243_v57  ;;  %vm2941_vm6 = vcmp.lt.s32.totalorder %v2909_v31, 512 }
 0x205   : > { %5785 = vst [vmem:[#allocation14_spill] sm:$0xff] %v5398_v23  ;;  %v4002_v60 = vadd.f32 %v4001_v28, %v4000_v12  ;;  %v4113_v42 = vpop.f32.mrb[125].mxu1  ;;  %v4003_v14 = vpop.f32.mrb[126].mxu0  ;;  %vm2939_vm7 = vcmp.lt.s32.totalorder %v2907_v22, 512  ;;  %vm2944_vm8 = vcmp.lt.s32.totalorder %v2912_v48, 512  ;;  %vm2942_vm9 = vcmp.lt.s32.totalorder %v2910_v27, 512 }
 0x206   : > { %v4114_v11 = vadd.f32 %v4113_v42, %v4112_v59  ;;  %v4115_v62 = vpop.f32.mrb[126].mxu1  ;;  %v4004_v23 = vpop.f32.mrb[127].mxu0  ;;  %vm2945_vm10 = vcmp.lt.s32.totalorder %v2913_v45, 512  ;;  %v2911_v59 = vadd.s32 %v5250_v25, %v2878_v15  ;;  %v2916_v42 = vadd.s32 %v5250_v25, %v2883_v29 }
 0x207   : > { %v2229_v50 = vadd.f32 %v4002_v60, %v5180_v49  ;;  %v4005_v21 = vadd.f32 %v4004_v23, %v4003_v14  ;;  %v4116_v24 = vpop.f32.mrb[127].mxu1  ;;  %v5418_v49 = vld [vmem:[%s5755_s3 + $0x1] ss:$0 sm:$0xff]  ;;  %v5422_v14 = vsel %vm2935_vm3, 1.0, %v5781_v6  ;;  %v2914_v23 = vadd.s32 %v5250_v25, %v2881_v1 }
 0x208   : > { %v4117_v55 = vadd.f32 %v4116_v24, %v4115_v62  ;;  %v5426_v24 = vsel %vm2940_vm4, 1.0, %v5781_v6  ;;  %v5435_v60 = vsel %vm2941_vm6, 1.0, %v5781_v6  ;;  %v5439_v33 = vsel %vm2939_vm7, 1.0, %v5781_v6 }
 0x209   : > { %v2232_v12 = vadd.f32 %v4005_v21, %v5183_v53  ;;  %v5412_v28 = vadd.f32 %v4114_v11, %v2229_v50  ;;  %v5430_v53 = vsel %vm2938_vm5, 1.0, %v5781_v6  ;;  %5788 = vst [vmem:[#allocation17_spill] sm:$0xff] %v5439_v33  ;;  %v5442_v51 = vsel %vm2944_vm8, 1.0, %v5781_v6 }
 0x20a   : > { %5789 = vst [vmem:[#allocation18_spill] sm:$0xff] %v5442_v51  ;;  %v5449_v1 = vsel %vm2942_vm9, 1.0, %v5781_v6  ;;  %v5453_v31 = vsel %vm2945_vm10, 1.0, %v5781_v6  ;;  %v2884_v22 = vadd.s32 248, %v5243_v57  ;;  %vm2943_vm11 = vcmp.lt.s32.totalorder %v2911_v59, 512 }
 0x20b   : > { %5787 = vst [vmem:[#allocation16_spill] sm:$0xff] %v5412_v28  ;;  %v4184_v48 = vpop.f32.mrb[128].mxu0  ;;  %v5444_v15 = vadd.f32 %v4117_v55, %v2232_v12  ;;  %5791 = vst [vmem:[#allocation20_spill] sm:$0xff] %v5449_v1  ;;  %vm2948_vm12 = vcmp.lt.s32.totalorder %v2916_v42, 512  ;;  %vm2946_vm13 = vcmp.lt.s32.totalorder %v2914_v23, 512  ;;  %vm3290_vm0 = vcmask 1040384  }
 0x20c   : > { %v2439_v17 = vadd.f32 %v4184_v48, %v5193_v39  ;;  %v4232_v29 = vpop.f32.mrb[128].mxu1  ;;  %v2430_v11 = vpop.f32.mrb[129].mxu0  ;;  %5792 = vst [vmem:[#allocation21_spill] sm:$0xff] %v5453_v31  ;;  %vm3292_vm1 = vcmask 1041408   ;;  %vm3294_vm2 = vcmask 1042432   ;;  %vm3296_vm3 = vcmask 1043456  }
 0x20d   : > { %5790 = vst [vmem:[#allocation19_spill] sm:$0xff] %v5444_v15  ;;  %v2669_v62 = vadd.f32 %v4232_v29, %v5418_v49  ;;  %v2431_v50 = vadd.f32 %v2430_v11, %v5187_v16  ;;  %v2660_v21 = vpop.f32.mrb[129].mxu1  ;;  %v4185_v39 = vpop.f32.mrb[130].mxu0 }
 0x20e   : > { %2789 = vst [vmem:[%s4620_s28 + $0x10] sm:$0xff] %v2439_v17  ;;  %v3016_v27 = vmul.f32 %v5273_v26, %v2439_v17  ;;  %v2661_v45 = vadd.f32 %v5418_v49, %v2660_v21  ;;  %v2442_v55 = vadd.f32 %v4185_v39, %v5195_v43  ;;  %v4233_v12 = vpop.f32.mrb[130].mxu1  ;;  %v2433_v48 = vpop.f32.mrb[131].mxu0  ;;  %v5474_v39 = vsel %vm2943_vm11, 1.0, %v5781_v6 }
 0x20f   : > { %2821 = vst [vmem:[%s4625_s7 + $0x10] sm:$0xff] %v2669_v62  ;;  %v3048_v16 = vmul.f32 %v5273_v26, %v2669_v62  ;;  %2787 = vst [vmem:[%s4620_s28] sm:$0xff] %v2431_v50  ;;  %v3014_v29 = vmul.f32 %v5278_v63, %v2431_v50  ;;  %v2672_v11 = vadd.f32 %v4233_v12, %v5418_v49  ;;  %v2663_v31 = vpop.f32.mrb[131].mxu1 }
 0x210   : > { %v2434_v15 = vadd.f32 %v2433_v48, %v5189_v35  ;;  %2819 = vst [vmem:[%s4625_s7] sm:$0xff] %v2661_v45  ;;  %v3046_v43 = vmul.f32 %v5278_v63, %v2661_v45  ;;  %2790 = vst [vmem:[%s4620_s28 + $0x18] sm:$0xff] %v2442_v55  ;;  %v2664_v21 = vadd.f32 %v5418_v49, %v2663_v31  ;;  %v5484_v35 = vsel %vm2948_vm12, 1.0, %v5781_v6 }
 0x211   : > { %5793 = vst [vmem:[#allocation22_spill] sm:$0xff] %v5474_v39  ;;  %v5477_v26 = vadd.s32 %v5250_v25, %v2884_v22  ;;  %2822 = vst [vmem:[%s4625_s7 + $0x18] sm:$0xff] %v2672_v11  ;;  %v5488_v63 = vsel %vm2946_vm13, 1.0, %v5781_v6  ;;  %v2882_v31 = vadd.s32 232, %v5243_v57  ;;  %v3117_v59 = vmul.f32 %v3016_v27, %v2439_v17 }
 0x212   : > { %2788 = vst [vmem:[%s4620_s28 + $0x8] sm:$0xff] %v2434_v15  ;;  %v3015_v12 = vmul.f32 %v5301_v36, %v2434_v15  ;;  %5795 = vst [vmem:[#allocation24_spill] sm:$0xff] %v5484_v35  ;;  %v3223_v48 = vmul.f32 %v3048_v16, %v2669_v62  ;;  %v3017_v39 = vmul.f32 %v5281_v8, %v2442_v55 }
 0x213   : > { %5794 = vst [vmem:[#allocation23_spill] sm:$0xff] %v5477_v26  ;;  %5796 = vst [vmem:[#allocation25_spill] sm:$0xff] %v5488_v63  ;;  %v3047_v22 = vmul.f32 %v5301_v36, %v2664_v21  ;;  %v3115_v51 = vmul.f32 %v3014_v29, %v2431_v50  ;;  %v3049_v28 = vmul.f32 %v5281_v8, %v2672_v11  ;;  %v4188_v26 = vpop.f32.mrb[132].mxu0 }
 0x214   : > { %2820 = vst [vmem:[%s4625_s7 + $0x8] sm:$0xff] %v2664_v21  ;;  %v3078_v1 = vadd.f32 %v3015_v12, %v3014_v29  ;;  %v3116_v42 = vmul.f32 %v3015_v12, %v2434_v15  ;;  %v3221_v35 = vmul.f32 %v3046_v43, %v2661_v45  ;;  %v2455_v63 = vadd.f32 %v4188_v26, %v5205_v37  ;;  %v4236_v57 = vpop.f32.mrb[132].mxu1  ;;  %v2446_v17 = vpop.f32.mrb[133].mxu0 }
 0x215   : > { %v3184_v23 = vadd.f32 %v3047_v22, %v3046_v43  ;;  %v3222_v6 = vmul.f32 %v3047_v22, %v2664_v21  ;;  %v2685_v36 = vadd.f32 %v4236_v57, %v5418_v49  ;;  %v2447_v50 = vadd.f32 %v2446_v17, %v5199_v10  ;;  %v2676_v8 = vpop.f32.mrb[133].mxu1  ;;  %v4189_v29 = vpop.f32.mrb[134].mxu0 }
 0x216   : > { %v3079_v62 = vadd.f32 %v3078_v1, %v3016_v27  ;;  %v3147_v33 = vadd.f32 %v3116_v42, %v3115_v51  ;;  %v3118_v15 = vmul.f32 %v3017_v39, %v2442_v55  ;;  %2793 = vst [vmem:[%s4620_s28 + $0x30] sm:$0xff] %v2455_v63  ;;  %v2677_v43 = vadd.f32 %v5418_v49, %v2676_v8  ;;  %v4237_v37 = vpop.f32.mrb[134].mxu1  ;;  %v2449_v21 = vpop.f32.mrb[135].mxu0 }
 0x217   : > { %v3185_v12 = vadd.f32 %v3184_v23, %v3048_v16  ;;  %v3253_v45 = vadd.f32 %v3222_v6, %v3221_v35  ;;  %v3224_v26 = vmul.f32 %v3049_v28, %v2672_v11  ;;  %2825 = vst [vmem:[%s4625_s7 + $0x30] sm:$0xff] %v2685_v36  ;;  %2791 = vst [vmem:[%s4620_s28 + $0x20] sm:$0xff] %v2447_v50  ;;  %v2679_v27 = vpop.f32.mrb[135].mxu1 }
 0x218   : > { %v3148_v22 = vadd.f32 %v3147_v33, %v3117_v59  ;;  %v3018_v51 = vmul.f32 %v5311_v32, %v2447_v50  ;;  %v3080_v1 = vadd.f32 %v3079_v62, %v3017_v39  ;;  %v3020_v42 = vmul.f32 %v5305_v46, %v2455_v63  ;;  %2823 = vst [vmem:[%s4625_s7 + $0x20] sm:$0xff] %v2677_v43 }
 0x219   : > { %v3254_v10 = vadd.f32 %v3253_v45, %v3223_v48  ;;  %v3050_v55 = vmul.f32 %v5311_v32, %v2677_v43  ;;  %v3186_v6 = vadd.f32 %v3185_v12, %v3049_v28  ;;  %v3052_v16 = vmul.f32 %v5305_v46, %v2685_v36 }
 0x21a   : > { %v3081_v35 = vadd.f32 %v3080_v1, %v3018_v51  ;;  %v3119_v23 = vmul.f32 %v3018_v51, %v2447_v50  ;;  %v3149_v11 = vadd.f32 %v3148_v22, %v3118_v15  ;;  %v2458_v39 = vadd.f32 %v4189_v29, %v5207_v40 }
 0x21b   : > { %v3187_v33 = vadd.f32 %v3186_v6, %v3050_v55  ;;  %v3225_v59 = vmul.f32 %v3050_v55, %v2677_v43  ;;  %v3255_v57 = vadd.f32 %v3254_v10, %v3224_v26  ;;  %v2688_v17 = vadd.f32 %v4237_v37, %v5418_v49  ;;  %v4192_v62 = vpop.f32.mrb[136].mxu0 }
 0x21c   : > { %v3150_v48 = vadd.f32 %v3149_v11, %v3119_v23  ;;  %v2450_v32 = vadd.f32 %v2449_v21, %v5201_v13  ;;  %v2680_v28 = vadd.f32 %v5418_v49, %v2679_v27  ;;  %2794 = vst [vmem:[%s4620_s28 + $0x38] sm:$0xff] %v2458_v39  ;;  %v3021_v50 = vmul.f32 %v5331_v58, %v2458_v39  ;;  %v4240_v15 = vpop.f32.mrb[136].mxu1  ;;  %v2462_v12 = vpop.f32.mrb[137].mxu0 }
 0x21d   : > { %v3256_v46 = vadd.f32 %v3255_v57, %v3225_v59  ;;  %v2471_v8 = vadd.f32 %v4192_v62, %v5217_v34  ;;  %v5515_v40 = vadd.s32 %v5250_v25, %v2882_v31  ;;  %2826 = vst [vmem:[%s4625_s7 + $0x38] sm:$0xff] %v2688_v17  ;;  %v3053_v29 = vmul.f32 %v5331_v58, %v2688_v17  ;;  %v2692_v37 = vpop.f32.mrb[137].mxu1  ;;  %v4193_v21 = vpop.f32.mrb[138].mxu0 }
 0x21e   : > { %2792 = vst [vmem:[%s4620_s28 + $0x28] sm:$0xff] %v2450_v32  ;;  %v3019_v13 = vmul.f32 %v5335_v54, %v2450_v32  ;;  %2824 = vst [vmem:[%s4625_s7 + $0x28] sm:$0xff] %v2680_v28  ;;  %v3051_v45 = vmul.f32 %v5335_v54, %v2680_v28  ;;  %v2701_v43 = vadd.f32 %v4240_v15, %v5418_v49  ;;  %v4241_v31 = vpop.f32.mrb[138].mxu1  ;;  %v2465_v22 = vpop.f32.mrb[139].mxu0 }
 0x21f   : > { %v3121_v34 = vmul.f32 %v3020_v42, %v2455_v63  ;;  %v3227_v26 = vmul.f32 %v3052_v16, %v2685_v36  ;;  %2797 = vst [vmem:[%s4620_s28 + $0x50] sm:$0xff] %v2471_v8  ;;  %v2463_v25 = vadd.f32 %v2462_v12, %v5211_v4  ;;  %v2693_v58 = vadd.f32 %v5418_v49, %v2692_v37  ;;  %v2695_v54 = vpop.f32.mrb[139].mxu1 }
 0x220   : > { %v3122_v51 = vmul.f32 %v3021_v50, %v2458_v39  ;;  %v3082_v1 = vadd.f32 %v3081_v35, %v3019_v13  ;;  %v3120_v27 = vmul.f32 %v3019_v13, %v2450_v32  ;;  %v3188_v10 = vadd.f32 %v3187_v33, %v3051_v45  ;;  %2829 = vst [vmem:[%s4625_s7 + $0x50] sm:$0xff] %v2701_v43 }
 0x221   : > { %v3228_v55 = vmul.f32 %v3053_v29, %v2688_v17  ;;  %v3226_v6 = vmul.f32 %v3051_v45, %v2680_v28  ;;  %v3024_v63 = vmul.f32 %v5339_v20, %v2471_v8  ;;  %2795 = vst [vmem:[%s4620_s28 + $0x40] sm:$0xff] %v2463_v25  ;;  %v3022_v36 = vmul.f32 %v5344_v5, %v2463_v25 }
 0x222   : > { %2827 = vst [vmem:[%s4625_s7 + $0x40] sm:$0xff] %v2693_v58  ;;  %v3083_v4 = vadd.f32 %v3082_v1, %v3020_v42  ;;  %v3151_v23 = vadd.f32 %v3150_v48, %v3120_v27  ;;  %v3189_v11 = vadd.f32 %v3188_v10, %v3052_v16  ;;  %v3054_v59 = vmul.f32 %v5344_v5, %v2693_v58 }
 0x223   : > { %v3257_v57 = vadd.f32 %v3256_v46, %v3226_v6  ;;  %v3056_v35 = vmul.f32 %v5339_v20, %v2701_v43  ;;  %v3123_v33 = vmul.f32 %v3022_v36, %v2463_v25  ;;  %v2474_v39 = vadd.f32 %v4193_v21, %v5219_v19  ;;  %v4196_v15 = vpop.f32.mrb[140].mxu0 }
 0x224   : > { %v3152_v17 = vadd.f32 %v3151_v23, %v3121_v34  ;;  %v3084_v32 = vadd.f32 %v3083_v4, %v3021_v50  ;;  %v3190_v28 = vadd.f32 %v3189_v11, %v3053_v29  ;;  %v3229_v62 = vmul.f32 %v3054_v59, %v2693_v58  ;;  %v4244_v48 = vpop.f32.mrb[140].mxu1  ;;  %v2478_v20 = vpop.f32.mrb[141].mxu0 }
 0x225   : > { %v3258_v12 = vadd.f32 %v3257_v57, %v3227_v26  ;;  %2798 = vst [vmem:[%s4620_s28 + $0x58] sm:$0xff] %v2474_v39  ;;  %v3025_v42 = vmul.f32 %v5348_v9, %v2474_v39  ;;  %v2704_v16 = vadd.f32 %v4241_v31, %v5418_v49  ;;  %v2466_v5 = vadd.f32 %v2465_v22, %v5213_v47  ;;  %v2708_v29 = vpop.f32.mrb[141].mxu1  ;;  %v4197_v45 = vpop.f32.mrb[142].mxu0 }
 0x226   : > { %v3085_v46 = vadd.f32 %v3084_v32, %v3022_v36  ;;  %v3153_v19 = vadd.f32 %v3152_v17, %v3122_v51  ;;  %v3191_v13 = vadd.f32 %v3190_v28, %v3054_v59  ;;  %v2696_v50 = vadd.f32 %v5418_v49, %v2695_v54  ;;  %v4245_v25 = vpop.f32.mrb[142].mxu1  ;;  %v2481_v47 = vpop.f32.mrb[143].mxu0 }
 0x227   : > { %v3125_v37 = vmul.f32 %v3024_v63, %v2471_v8  ;;  %v3259_v21 = vadd.f32 %v3258_v12, %v3228_v55  ;;  %2830 = vst [vmem:[%s4625_s7 + $0x58] sm:$0xff] %v2704_v16  ;;  %v3057_v34 = vmul.f32 %v5348_v9, %v2704_v16  ;;  %2796 = vst [vmem:[%s4620_s28 + $0x48] sm:$0xff] %v2466_v5  ;;  %v2711_v8 = vpop.f32.mrb[143].mxu1  ;;  %vm2947_vm15 = vcmp.lt.s32.totalorder %v5515_v40, 512 }
 0x228   : > { %v3023_v26 = vmul.f32 %v5352_v41, %v2466_v5  ;;  %v3154_v58 = vadd.f32 %v3153_v19, %v3123_v33  ;;  %2828 = vst [vmem:[%s4625_s7 + $0x48] sm:$0xff] %v2696_v50  ;;  %v3055_v31 = vmul.f32 %v5352_v41, %v2696_v50  ;;  %v2487_v22 = vadd.f32 %v4196_v15, %v5229_v52 }
 0x229   : > { %v2717_v51 = vadd.f32 %v4244_v48, %v5418_v49  ;;  %v3231_v1 = vmul.f32 %v3056_v35, %v2701_v43  ;;  %v3260_v27 = vadd.f32 %v3259_v21, %v3229_v62  ;;  %v3126_v54 = vmul.f32 %v3025_v42, %v2474_v39 }
 0x22a   : > { %v3086_v10 = vadd.f32 %v3085_v46, %v3023_v26  ;;  %v3124_v9 = vmul.f32 %v3023_v26, %v2466_v5  ;;  %v3232_v55 = vmul.f32 %v3057_v34, %v2704_v16  ;;  %v3192_v6 = vadd.f32 %v3191_v13, %v3055_v31  ;;  %2801 = vst [vmem:[%s4620_s28 + $0x70] sm:$0xff] %v2487_v22 }
 0x22b   : > { %v3230_v36 = vmul.f32 %v3055_v31, %v2696_v50  ;;  %2833 = vst [vmem:[%s4625_s7 + $0x70] sm:$0xff] %v2717_v51  ;;  %v2479_v41 = vadd.f32 %v2478_v20, %v5223_v3  ;;  %v2709_v52 = vadd.f32 %v5418_v49, %v2708_v29  ;;  %v5553_v43 = vmul.f32 %v5358_v0, %v2487_v22  ;;  %v4200_v33 = vpop.f32.mrb[144].mxu0 }
 0x22c   : > { %v3087_v4 = vadd.f32 %v3086_v10, %v3024_v63  ;;  %v3155_v23 = vadd.f32 %v3154_v58, %v3124_v9  ;;  %v3193_v11 = vadd.f32 %v3192_v6, %v3056_v35  ;;  %v5556_v57 = vmul.f32 %v5358_v0, %v2717_v51  ;;  %v4248_v3 = vpop.f32.mrb[144].mxu1  ;;  %v2494_v28 = vpop.f32.mrb[145].mxu0 }
 0x22d   : > { %v3261_v59 = vadd.f32 %v3260_v27, %v3230_v36  ;;  %2799 = vst [vmem:[%s4620_s28 + $0x60] sm:$0xff] %v2479_v41  ;;  %v3026_v17 = vmul.f32 %v5362_v2, %v2479_v41  ;;  %2831 = vst [vmem:[%s4625_s7 + $0x60] sm:$0xff] %v2709_v52  ;;  %v3058_v63 = vmul.f32 %v5362_v2, %v2709_v52  ;;  %v2724_v12 = vpop.f32.mrb[145].mxu1  ;;  %v4201_v16 = vpop.f32.mrb[146].mxu0 }
 0x22e   : > { %v3156_v39 = vadd.f32 %v3155_v23, %v3125_v37  ;;  %v3088_v32 = vadd.f32 %v3087_v4, %v3025_v42  ;;  %v3194_v35 = vadd.f32 %v3193_v11, %v3057_v34  ;;  %v2490_v15 = vadd.f32 %v4197_v45, %v5231_v7  ;;  %v4249_v42 = vpop.f32.mrb[146].mxu1  ;;  %v2497_v19 = vpop.f32.mrb[147].mxu0  ;;  %v5798_v4 = vld [vmem:[#allocation13_spill] sm:$0xff] }
 0x22f   : > { %v3262_v62 = vadd.f32 %v3261_v59, %v3231_v1  ;;  %v2720_v0 = vadd.f32 %v4245_v25, %v5418_v49  ;;  %v3127_v48 = vmul.f32 %v3026_v17, %v2479_v41  ;;  %v3233_v46 = vmul.f32 %v3058_v63, %v2709_v52  ;;  %v2727_v7 = vpop.f32.mrb[147].mxu1 }
 0x230   : > { %v3089_v5 = vadd.f32 %v3088_v32, %v3026_v17  ;;  %v3157_v20 = vadd.f32 %v3156_v39, %v3126_v54  ;;  %v3129_v2 = vmul.f32 %v5553_v43, %v2487_v22  ;;  %v3235_v13 = vmul.f32 %v5556_v57, %v2717_v51  ;;  %2802 = vst [vmem:[%s4620_s28 + $0x78] sm:$0xff] %v2490_v15 }
 0x231   : > { %v3195_v50 = vadd.f32 %v3194_v35, %v3058_v63  ;;  %v3263_v29 = vadd.f32 %v3262_v62, %v3232_v55  ;;  %2834 = vst [vmem:[%s4625_s7 + $0x78] sm:$0xff] %v2720_v0  ;;  %v2482_v37 = vadd.f32 %v2481_v47, %v5225_v44  ;;  %v2712_v21 = vadd.f32 %v5418_v49, %v2711_v8  ;;  %v5797_v8 = vld [vmem:[#allocation3_spill] sm:$0xff] }
 0x232   : > { %v3158_v45 = vadd.f32 %v3157_v20, %v3127_v48  ;;  %v2503_v34 = vadd.f32 %v4200_v33, %v5241_v30  ;;  %v3029_v25 = vmul.f32 %v5366_v38, %v2490_v15  ;;  %v3061_v58 = vmul.f32 %v5366_v38, %v2720_v0  ;;  %v5800_v20 = vld [vmem:[#allocation2_spill] sm:$0xff] }
 0x233   : > { %v3264_v26 = vadd.f32 %v3263_v29, %v3233_v46  ;;  %v2733_v31 = vadd.f32 %v4248_v3, %v5418_v49  ;;  %2800 = vst [vmem:[%s4620_s28 + $0x68] sm:$0xff] %v2482_v37  ;;  %v3027_v22 = vmul.f32 %v5384_v18, %v2482_v37  ;;  %2832 = vst [vmem:[%s4625_s7 + $0x68] sm:$0xff] %v2712_v21  ;;  %v4204_v27 = vpop.f32.mrb[148].mxu0 }
 0x234   : > { %v3059_v51 = vmul.f32 %v5384_v18, %v2712_v21  ;;  %2805 = vst [vmem:[%s4620_s28 + $0x90] sm:$0xff] %v2503_v34  ;;  %v5580_v44 = vmul.f32 %v5388_v56, %v2503_v34  ;;  %v2495_v30 = vadd.f32 %v2494_v28, %v5235_v61  ;;  %v2725_v38 = vadd.f32 %v5418_v49, %v2724_v12  ;;  %v4252_v55 = vpop.f32.mrb[148].mxu1  ;;  %v2510_v6 = vpop.f32.mrb[149].mxu0 }
 0x235   : > { %2837 = vst [vmem:[%s4625_s7 + $0x90] sm:$0xff] %v2733_v31  ;;  %v5585_v47 = vmul.f32 %v5388_v56, %v2733_v31  ;;  %v5589_v1 = vadd.f32 %v4201_v16, %v5797_v8  ;;  %v5592_v18 = vadd.f32 %v4249_v42, %v5418_v49  ;;  %v3090_v10 = vadd.f32 %v3089_v5, %v3027_v22  ;;  %v2740_v52 = vpop.f32.mrb[149].mxu1  ;;  %v5602_v11 = vpop.f32.mrb[150].mxu0 }
 0x236   : > { %v3128_v9 = vmul.f32 %v3027_v22, %v2482_v37  ;;  %v3196_v54 = vadd.f32 %v3195_v50, %v3059_v51  ;;  %v3234_v61 = vmul.f32 %v3059_v51, %v2712_v21  ;;  %2803 = vst [vmem:[%s4620_s28 + $0x80] sm:$0xff] %v2495_v30  ;;  %v3130_v56 = vmul.f32 %v3029_v25, %v2490_v15  ;;  %v4253_v32 = vpop.f32.mrb[150].mxu1  ;;  %v2513_v63 = vpop.f32.mrb[151].mxu0  ;;  %v5801_v21 = vld [vmem:[#allocation6_spill] sm:$0xff] }
 0x237   : > { %v3236_v36 = vmul.f32 %v3061_v58, %v2720_v0  ;;  %v3030_v23 = vmul.f32 %v5798_v4, %v2495_v30  ;;  %2835 = vst [vmem:[%s4625_s7 + $0x80] sm:$0xff] %v2725_v38  ;;  %v3062_v41 = vmul.f32 %v5798_v4, %v2725_v38  ;;  %2806 = vst [vmem:[%s4620_s28 + $0x98] sm:$0xff] %v5589_v1  ;;  %v2743_v15 = vpop.f32.mrb[151].mxu1 }
 0x238   : > { %2838 = vst [vmem:[%s4625_s7 + $0x98] sm:$0xff] %v5592_v18  ;;  %v3091_v59 = vadd.f32 %v3090_v10, %v5553_v43  ;;  %v3159_v33 = vadd.f32 %v3158_v45, %v3128_v9  ;;  %v3197_v39 = vadd.f32 %v3196_v54, %v5556_v57  ;;  %v3265_v17 = vadd.f32 %v3264_v26, %v3234_v61  ;;  %v5799_v43 = vld [vmem:[#allocation15_spill] sm:$0xff] }
 0x239   : > { %v3133_v3 = vmul.f32 %v5580_v44, %v2503_v34  ;;  %v3239_v28 = vmul.f32 %v5585_v47, %v2733_v31  ;;  %v3131_v62 = vmul.f32 %v3030_v23, %v2495_v30  ;;  %v3237_v35 = vmul.f32 %v3062_v41, %v2725_v38 }
 0x23a   : > { %v3160_v0 = vadd.f32 %v3159_v33, %v3129_v2  ;;  %v3266_v12 = vadd.f32 %v3265_v17, %v3235_v13  ;;  %v3092_v16 = vadd.f32 %v3091_v59, %v3029_v25  ;;  %v3198_v5 = vadd.f32 %v3197_v39, %v3061_v58  ;;  %v5802_v58 = vld [vmem:[#allocation4_spill] sm:$0xff] }
 0x23b   : > { %v3033_v48 = vmul.f32 %v5799_v43, %v5589_v1  ;;  %v3065_v57 = vmul.f32 %v5799_v43, %v5592_v18  ;;  %v2498_v46 = vadd.f32 %v2497_v19, %v5800_v20  ;;  %v2728_v42 = vadd.f32 %v5418_v49, %v2727_v7  ;;  %v4208_v19 = vpop.f32.mrb[152].mxu0 }
 0x23c   : > { %v3093_v50 = vadd.f32 %v3092_v16, %v3030_v23  ;;  %v3161_v29 = vadd.f32 %v3160_v0, %v3130_v56  ;;  %v3199_v45 = vadd.f32 %v3198_v5, %v3062_v41  ;;  %v3267_v37 = vadd.f32 %v3266_v12, %v3236_v36  ;;  %v4256_v51 = vpop.f32.mrb[152].mxu1  ;;  %v5626_v30 = vpop.f32.mrb[153].mxu0  ;;  %v5804_v12 = vld [vmem:[#allocation5_spill] sm:$0xff] }
 0x23d   : > { %2804 = vst [vmem:[%s4620_s28 + $0x88] sm:$0xff] %v2498_v46  ;;  %v3031_v2 = vmul.f32 %v5422_v14, %v2498_v46  ;;  %2836 = vst [vmem:[%s4625_s7 + $0x88] sm:$0xff] %v2728_v42  ;;  %v3063_v13 = vmul.f32 %v5422_v14, %v2728_v42  ;;  %v5619_v34 = vadd.f32 %v4204_v27, %v5801_v21  ;;  %v5632_v10 = vpop.f32.mrb[153].mxu1  ;;  %v5634_v9 = vpop.f32.mrb[154].mxu0 }
 0x23e   : > { %v5622_v26 = vadd.f32 %v4252_v55, %v5418_v49  ;;  %v3162_v7 = vadd.f32 %v3161_v29, %v3131_v62  ;;  %v3268_v25 = vadd.f32 %v3267_v37, %v3237_v35  ;;  %v2511_v31 = vadd.f32 %v2510_v6, %v5802_v58  ;;  %v5642_v56 = vpop.f32.mrb[154].mxu1  ;;  %v5644_v36 = vpop.f32.mrb[155].mxu0  ;;  %v5803_v35 = vld [vmem:[#allocation7_spill] sm:$0xff]  ;;  %v5806_v29 = vld [vmem:[#allocation10_spill] sm:$0xff] }
 0x23f   : > { %v2741_v22 = vadd.f32 %v5418_v49, %v2740_v52  ;;  %v3094_v38 = vadd.f32 %v3093_v50, %v3031_v2  ;;  %v3132_v14 = vmul.f32 %v3031_v2, %v2498_v46  ;;  %v3200_v8 = vadd.f32 %v3199_v45, %v3063_v13  ;;  %2809 = vst [vmem:[%s4620_s28 + $0xb0] sm:$0xff] %v5619_v34  ;;  %v5648_v59 = vpop.f32.mrb[155].mxu1 }
 0x240   : > { %v3238_v27 = vmul.f32 %v3063_v13, %v2728_v42  ;;  %2841 = vst [vmem:[%s4625_s7 + $0xb0] sm:$0xff] %v5622_v26  ;;  %v3134_v54 = vmul.f32 %v3033_v48, %v5589_v1  ;;  %v3240_v61 = vmul.f32 %v3065_v57, %v5592_v18  ;;  %2807 = vst [vmem:[%s4620_s28 + $0xa0] sm:$0xff] %v2511_v31 }
 0x241   : > { %v3034_v55 = vmul.f32 %v5430_v53, %v2511_v31  ;;  %2839 = vst [vmem:[%s4625_s7 + $0xa0] sm:$0xff] %v2741_v22  ;;  %v3066_v6 = vmul.f32 %v5430_v53, %v2741_v22  ;;  %v3095_v4 = vadd.f32 %v3094_v38, %v5580_v44  ;;  %v3163_v23 = vadd.f32 %v3162_v7, %v3132_v14  ;;  %v5807_v7 = vld [vmem:[#allocation23_spill] sm:$0xff] }
 0x242   : > { %v3201_v41 = vadd.f32 %v3200_v8, %v5585_v47  ;;  %v3269_v52 = vadd.f32 %v3268_v25, %v3238_v27  ;;  %v3036_v1 = vmul.f32 %v5426_v24, %v5619_v34  ;;  %v3068_v18 = vmul.f32 %v5426_v24, %v5622_v26  ;;  %v5808_v27 = vld [vmem:[#allocation8_spill] sm:$0xff] }
 0x243   : > { %v3135_v53 = vmul.f32 %v3034_v55, %v2511_v31  ;;  %v3241_v33 = vmul.f32 %v3066_v6, %v2741_v22  ;;  %v3164_v39 = vadd.f32 %v3163_v23, %v3133_v3  ;;  %v3096_v44 = vadd.f32 %v3095_v4, %v3033_v48  ;;  %v4212_v42 = vpop.f32.mrb[156].mxu0  ;;  %v5805_v48 = vld [vmem:[#allocation17_spill] sm:$0xff]  ;;  %v5809_v23 = vld [vmem:[#allocation20_spill] sm:$0xff] }
 0x244   : > { %v3270_v17 = vadd.f32 %v3269_v52, %v3239_v28  ;;  %v3202_v62 = vadd.f32 %v3201_v41, %v3065_v57  ;;  %v2522_v47 = vadd.f32 %v5602_v11, %v5803_v35  ;;  %v2752_v0 = vadd.f32 %v4253_v32, %v5418_v49  ;;  %v2542_v57 = vpop.f32.mrb[157].mxu0 }
 0x245   : > { %v2514_v16 = vadd.f32 %v2513_v63, %v5804_v12  ;;  %v2744_v5 = vadd.f32 %v5418_v49, %v2743_v15  ;;  %v3097_v24 = vadd.f32 %v3096_v44, %v3034_v55  ;;  %v3165_v43 = vadd.f32 %v3164_v39, %v3134_v54  ;;  %v4260_v63 = vpop.f32.mrb[156].mxu1 }
 0x246   : > { %v3203_v20 = vadd.f32 %v3202_v62, %v3066_v6  ;;  %v3271_v46 = vadd.f32 %v3270_v17, %v3240_v61  ;;  %2810 = vst [vmem:[%s4620_s28 + $0xb8] sm:$0xff] %v2522_v47  ;;  %v3037_v3 = vmul.f32 %v5435_v60, %v2522_v47  ;;  %2842 = vst [vmem:[%s4625_s7 + $0xb8] sm:$0xff] %v2752_v0  ;;  %v2772_v2 = vpop.f32.mrb[157].mxu1  ;;  %vm2949_vm14 = vcmp.lt.s32.totalorder %v5807_v7, 512 }
 0x247   : > { %v3069_v28 = vmul.f32 %v5435_v60, %v2752_v0  ;;  %2808 = vst [vmem:[%s4620_s28 + $0xa8] sm:$0xff] %v2514_v16  ;;  %v3035_v11 = vmul.f32 %v5805_v48, %v2514_v16  ;;  %2840 = vst [vmem:[%s4625_s7 + $0xa8] sm:$0xff] %v2744_v5  ;;  %v3067_v32 = vmul.f32 %v5805_v48, %v2744_v5  ;;  %v4213_v60 = vpop.f32.mrb[158].mxu0  ;;  %v4261_v25 = vpop.f32.mrb[158].mxu1 }
 0x248   : > { %v3166_v15 = vadd.f32 %v3165_v43, %v3135_v53  ;;  %v3272_v50 = vadd.f32 %v3271_v46, %v3241_v33  ;;  %v5668_v45 = vadd.f32 %v4208_v19, %v5806_v29  ;;  %v5671_v37 = vadd.f32 %v4256_v51, %v5418_v49  ;;  %v5674_v58 = vpop.f32.mrb[159].mxu0  ;;  %v5683_v51 = vpop.f32.mrb[159].mxu1  ;;  %v5813_v43 = vld [vmem:[#allocation16_spill] sm:$0xff]  ;;  %v5814_v46 = vld [vmem:[#allocation18_spill] sm:$0xff] }
 0x249   : > { %v3098_v13 = vadd.f32 %v3097_v24, %v3035_v11  ;;  %v3136_v21 = vmul.f32 %v3035_v11, %v2514_v16  ;;  %v3137_v31 = vmul.f32 %v3036_v1, %v5619_v34  ;;  %v3243_v19 = vmul.f32 %v3068_v18, %v5622_v26  ;;  %v5812_v16 = vld [vmem:[#allocation9_spill] sm:$0xff] }
 0x24a   : > { %v3204_v22 = vadd.f32 %v3203_v20, %v3067_v32  ;;  %v3242_v38 = vmul.f32 %v3067_v32, %v2744_v5  ;;  %2813 = vst [vmem:[%s4620_s28 + $0xd0] sm:$0xff] %v5668_v45  ;;  %2845 = vst [vmem:[%s4625_s7 + $0xd0] sm:$0xff] %v5671_v37  ;;  %v2527_v54 = vadd.f32 %v5626_v30, %v5808_v27  ;;  %v5810_v30 = vld [vmem:[#allocation11_spill] sm:$0xff]  ;;  %v5815_v11 = vld [vmem:[#allocation21_spill] sm:$0xff] }
 0x24b   : > { %v3099_v14 = vadd.f32 %v3098_v13, %v3036_v1  ;;  %v3167_v8 = vadd.f32 %v3166_v15, %v3136_v21  ;;  %v2757_v34 = vadd.f32 %v5418_v49, %v5632_v10  ;;  %v3138_v61 = vmul.f32 %v3037_v3, %v2522_v47  ;;  %v5816_v15 = vld [vmem:[#allocation22_spill] sm:$0xff]  ;;  %v5818_v13 = vld [vmem:[#allocation19_spill] sm:$0xff] }
 0x24c   : > { %v3244_v55 = vmul.f32 %v3069_v28, %v2752_v0  ;;  %v3205_v26 = vadd.f32 %v3204_v22, %v3068_v18  ;;  %v3273_v6 = vadd.f32 %v3272_v50, %v3242_v38  ;;  %2811 = vst [vmem:[%s4620_s28 + $0xc0] sm:$0xff] %v2527_v54  ;;  %v3038_v41 = vmul.f32 %v5809_v23, %v2527_v54 }
 0x24d   : > { %v3168_v4 = vadd.f32 %v3167_v8, %v3137_v31  ;;  %v3100_v52 = vadd.f32 %v3099_v14, %v3037_v3  ;;  %2843 = vst [vmem:[%s4625_s7 + $0xc0] sm:$0xff] %v2757_v34  ;;  %v3070_v1 = vmul.f32 %v5809_v23, %v2757_v34  ;;  %v2538_v39 = vadd.f32 %v5634_v9, %v5810_v30  ;;  %v5819_v8 = vld [vmem:[#allocation25_spill] sm:$0xff] }
 0x24e   : > { %v3274_v53 = vadd.f32 %v3273_v6, %v3243_v19  ;;  %v3206_v33 = vadd.f32 %v3205_v26, %v3069_v28  ;;  %v2768_v10 = vadd.f32 %v5642_v56, %v5418_v49  ;;  %v3139_v17 = vmul.f32 %v3038_v41, %v2527_v54 }
 0x24f   : > { %v3101_v18 = vadd.f32 %v3100_v52, %v3038_v41  ;;  %v3169_v44 = vadd.f32 %v3168_v4, %v3138_v61  ;;  %v3245_v62 = vmul.f32 %v3070_v1, %v2757_v34  ;;  %2814 = vst [vmem:[%s4620_s28 + $0xd8] sm:$0xff] %v2538_v39  ;;  %v5811_v0 = vmov 0.0   ;;  %v5820_v41 = vld [vmem:[#allocation24_spill] sm:$0xff] }
 0x250   : > { %v3207_v35 = vadd.f32 %v3206_v33, %v3070_v1  ;;  %v3275_v47 = vadd.f32 %v3274_v53, %v3244_v55  ;;  %2846 = vst [vmem:[%s4625_s7 + $0xd8] sm:$0xff] %v2768_v10  ;;  %v3667_v12 = vsel %vm2949_vm14, 1.0, %v5811_v0  ;;  %v3665_v9 = vsel %vm2947_vm15, 1.0, %v5811_v0  ;;  %v5821_v53 = vld [vmem:[#allocation14_spill] sm:$0xff] }
 0x251   : > { %v3170_v56 = vadd.f32 %v3169_v44, %v3139_v17  ;;  %v2530_v5 = vadd.f32 %v5644_v36, %v5812_v16  ;;  %v2760_v24 = vadd.f32 %v5418_v49, %v5648_v59  ;;  %v2551_v20 = vadd.f32 %v4212_v42, %v5813_v43  ;;  %v5817_v42 = vld [vmem:[#allocation12_spill] sm:$0xff] }
 0x252   : > { %v3040_v3 = vmul.f32 %v5814_v46, %v5668_v45  ;;  %v3072_v28 = vmul.f32 %v5814_v46, %v5671_v37  ;;  %v3276_v48 = vadd.f32 %v3275_v47, %v3245_v62  ;;  %v2781_v40 = vadd.f32 %v4260_v63, %v5418_v49 }
 0x253   : > { %v3041_v32 = vmul.f32 %v5815_v11, %v2538_v39  ;;  %2812 = vst [vmem:[%s4620_s28 + $0xc8] sm:$0xff] %v2530_v5  ;;  %v3039_v36 = vmul.f32 %v5816_v15, %v2530_v5  ;;  %2844 = vst [vmem:[%s4625_s7 + $0xc8] sm:$0xff] %v2760_v24  ;;  %v3071_v59 = vmul.f32 %v5816_v15, %v2760_v24 }
 0x254   : > { %2817 = vst [vmem:[%s4620_s28 + $0xf0] sm:$0xff] %v2551_v20  ;;  %v2543_v50 = vadd.f32 %v2542_v57, %v5817_v42  ;;  %v3073_v29 = vmul.f32 %v5815_v11, %v2768_v10  ;;  %2849 = vst [vmem:[%s4625_s7 + $0xf0] sm:$0xff] %v2781_v40  ;;  %v2773_v63 = vadd.f32 %v5418_v49, %v2772_v2 }
 0x255   : > { %v2554_v21 = vadd.f32 %v4213_v60, %v5818_v13  ;;  %v2784_v7 = vadd.f32 %v4261_v25, %v5418_v49  ;;  %v3102_v31 = vadd.f32 %v3101_v18, %v3039_v36  ;;  %v3140_v19 = vmul.f32 %v3039_v36, %v2530_v5 }
 0x256   : > { %v3208_v22 = vadd.f32 %v3207_v35, %v3071_v59  ;;  %v3246_v38 = vmul.f32 %v3071_v59, %v2760_v24  ;;  %2815 = vst [vmem:[%s4620_s28 + $0xe0] sm:$0xff] %v2543_v50  ;;  %v3141_v14 = vmul.f32 %v3040_v3, %v5668_v45  ;;  %v3247_v57 = vmul.f32 %v3072_v28, %v5671_v37 }
 0x257   : > { %v3042_v27 = vmul.f32 %v5819_v8, %v2543_v50  ;;  %2847 = vst [vmem:[%s4625_s7 + $0xe0] sm:$0xff] %v2773_v63  ;;  %v3074_v54 = vmul.f32 %v5819_v8, %v2773_v63  ;;  %2818 = vst [vmem:[%s4620_s28 + $0xf8] sm:$0xff] %v2554_v21  ;;  %v3103_v2 = vadd.f32 %v3102_v31, %v3040_v3 }
 0x258   : > { %2850 = vst [vmem:[%s4625_s7 + $0xf8] sm:$0xff] %v2784_v7  ;;  %v3171_v60 = vadd.f32 %v3170_v56, %v3140_v19  ;;  %v3209_v34 = vadd.f32 %v3208_v22, %v3072_v28  ;;  %v3277_v25 = vadd.f32 %v3276_v48, %v3246_v38  ;;  %v3142_v61 = vmul.f32 %v3041_v32, %v2538_v39 }
 0x259   : > { %v3248_v55 = vmul.f32 %v3073_v29, %v2768_v10  ;;  %v3143_v26 = vmul.f32 %v3042_v27, %v2543_v50  ;;  %v3249_v6 = vmul.f32 %v3074_v54, %v2773_v63  ;;  %v3104_v37 = vadd.f32 %v3103_v2, %v3041_v32 }
 0x25a   : > { %v3172_v45 = vadd.f32 %v3171_v60, %v3141_v14  ;;  %v3278_v4 = vadd.f32 %v3277_v25, %v3247_v57  ;;  %v3210_v23 = vadd.f32 %v3209_v34, %v3073_v29  ;;  %v3044_v52 = vmul.f32 %v5820_v41, %v2551_v20 }
 0x25b   : > { %v3076_v1 = vmul.f32 %v5820_v41, %v2781_v40  ;;  %v2546_v33 = vadd.f32 %v5674_v58, %v5821_v53  ;;  %v2776_v30 = vadd.f32 %v5418_v49, %v5683_v51  ;;  %v3105_v39 = vadd.f32 %v3104_v37, %v3042_v27 }
 0x25c   : > { %v3173_v18 = vadd.f32 %v3172_v45, %v3142_v61  ;;  %v3211_v10 = vadd.f32 %v3210_v23, %v3074_v54  ;;  %v3279_v17 = vadd.f32 %v3278_v4, %v3248_v55  ;;  %v3045_v0 = vmul.f32 %v3667_v12, %v2554_v21  ;;  %v3298_v45 = vld [vmem:[%s5758_s6] sm:$0xff] }
 0x25d   : > { %2816 = vst [vmem:[%s4620_s28 + $0xe8] sm:$0xff] %v2546_v33  ;;  %v3043_v44 = vmul.f32 %v3665_v9, %v2546_v33  ;;  %2848 = vst [vmem:[%s4625_s7 + $0xe8] sm:$0xff] %v2776_v30  ;;  %v3075_v62 = vmul.f32 %v3665_v9, %v2776_v30  ;;  %v3077_v56 = vmul.f32 %v3667_v12, %v2784_v7 }
 0x25e   : > { %v3174_v35 = vadd.f32 %v3173_v18, %v3143_v26  ;;  %v3280_v47 = vadd.f32 %v3279_v17, %v3249_v6  ;;  %v3145_v58 = vmul.f32 %v3044_v52, %v2551_v20  ;;  %v3251_v46 = vmul.f32 %v3076_v1, %v2781_v40 }
 0x25f   : > { %v3106_v16 = vadd.f32 %v3105_v39, %v3043_v44  ;;  %v3144_v5 = vmul.f32 %v3043_v44, %v2546_v33  ;;  %v3212_v24 = vadd.f32 %v3211_v10, %v3075_v62  ;;  %v3250_v43 = vmul.f32 %v3075_v62, %v2776_v30 }
 0x260   : > { %v3146_v48 = vmul.f32 %v3045_v0, %v2554_v21  ;;  %v3252_v11 = vmul.f32 %v3077_v56, %v2784_v7 }
 0x261   : > { %v3107_v3 = vadd.f32 %v3106_v16, %v3044_v52  ;;  %v3175_v49 = vadd.f32 %v3174_v35, %v3144_v5  ;;  %v3213_v51 = vadd.f32 %v3212_v24, %v3076_v1  ;;  %v3281_v28 = vadd.f32 %v3280_v47, %v3250_v43 }
 0x263   : > { %v3108_v32 = vadd.f32 %v3107_v3, %v3045_v0  ;;  %v3176_v15 = vadd.f32 %v3175_v49, %v3145_v58  ;;  %v3214_v36 = vadd.f32 %v3213_v51, %v3077_v56  ;;  %v3282_v9 = vadd.f32 %v3281_v28, %v3251_v46 }
 0x265   : > { %v3109_v59 = vrot.slane %v3108_v32, 4  ;;  %v3177_v42 = vadd.f32 %v3176_v15, %v3146_v48  ;;  %v3215_v50 = vrot.slane %v3214_v36, 4  ;;  %v3283_v12 = vadd.f32 %v3282_v9, %v3252_v11 }
 0x267   : > { %v3110_v29 = vadd.f32 %v3109_v59, %v3108_v32  ;;  %v3178_v63 = vrot.slane %v3177_v42, 4  ;;  %v3216_v13 = vadd.f32 %v3215_v50, %v3214_v36  ;;  %v3284_v31 = vrot.slane %v3283_v12, 4 }
 0x269   : > { %v3111_v20 = vrot.slane %v3110_v29, 2  ;;  %v3179_v40 = vadd.f32 %v3178_v63, %v3177_v42  ;;  %v3217_v19 = vrot.slane %v3216_v13, 2  ;;  %v3285_v22 = vadd.f32 %v3284_v31, %v3283_v12 }
 0x26b   : > { %v3112_v38 = vadd.f32 %v3111_v20, %v3110_v29  ;;  %v3180_v14 = vrot.slane %v3179_v40, 2  ;;  %v3218_v21 = vadd.f32 %v3217_v19, %v3216_v13  ;;  %v3286_v7 = vrot.slane %v3285_v22, 2 }
 0x26d   : > { %v3113_v57 = vrot.slane %v3112_v38, 1  ;;  %v3181_v8 = vadd.f32 %v3180_v14, %v3179_v40  ;;  %v3287_v27 = vadd.f32 %v3286_v7, %v3285_v22  ;;  %v3219_v54 = vrot.slane %v3218_v21, 1 }
 0x26f   : > { %v3182_v2 = vrot.slane %v3181_v8, 1  ;;  %v3288_v60 = vrot.slane %v3287_v27, 1  ;;  %v3114_v34 = vadd.f32 %v3113_v57, %v3112_v38  ;;  %v3220_v61 = vadd.f32 %v3219_v54, %v3218_v21 }
 0x271   : > { %v3183_v25 = vadd.f32 %v3182_v2, %v3181_v8  ;;  %v3289_v26 = vadd.f32 %v3288_v60, %v3287_v27 }
 0x273   : > { %v3291_v55 = vsel %vm3290_vm0, %v3114_v34, %v3183_v25 }
 0x274   : > { %v3293_v6 = vsel %vm3292_vm1, %v3291_v55, %v3220_v61 }
 0x275   : > { %v3295_v4 = vsel %vm3294_vm2, %v3293_v6, %v3289_v26 }
 0x276   : > { %v3297_v37 = vsel %vm3296_vm3, %v3295_v4, 0.0 }
 0x277   : > { %v3299_v23 = vadd.f32 %v3298_v45, %v3297_v37 }
 0x279   : > { %3300 = vst [vmem:[%s5758_s6] sm:$0xff] %v3299_v23 }
 0x27a PF: > { %s17_s21 = sadd.s32 1, %s4567_s21  }
 0x27b   : > { %p14_p5 = scmp.ge.s32.totalorder %s17_s21, 4  }
 0x27d   :  { %16 = sbr.rel (!%p14_p5) target bundleno = 1 (0x1), region = 90 }

// kernel: postres2d_forward.6
= control target key start
LH: loop header
LB: loop body
LE: loop exit
PB: predicated region body
PF: predicated region fallthrough
CT: control target
= control target key end

     0   :  { %s4016_s15 = smov 0   ;;  %s5064_s0 = inlined_call_operand.vmem [shape: bf16[512,1152], index: 0, kind: input, shape index: {}]   ;;  %s5065_s1 = inlined_call_operand.vmem [shape: bf16[1152,128], index: 1, kind: input, shape index: {}]   ;;  %s5066_s2 = inlined_call_operand.vmem [shape: f32[8,128], index: 2, kind: input, shape index: {}]   ;;  %s5067_s3 = inlined_call_operand.vmem [shape: f32[512,128], index: 3, kind: output, shape index: {0}]   ;;  %s5068_s4 = inlined_call_operand.vmem [shape: f32[8,128], index: 4, kind: output, shape index: {1}]  }
   0x1 LB: > { %s4022_s16 = sadd.s32 4294967295, %s3987_s15   ;;  %p2896_p0 = scmp.ge.s32.totalorder %s3987_s15, 1  ;;  %s3987_s15 = sphi %s4016_s15, %s15_s15  }
   0x2   : > { %p162_p1 = scmp.lt.s32.totalorder %s3987_s15, 3 }
   0x4   : > { %p163_p2 = pnand %p2896_p0, %p162_p1 }
   0x6   : > { %166 = sbr.rel (%p163_p2) target bundleno = 580 (0x244), region = 32 }
   0xd   : > { %s2897_s17 = sshll.u32 %s4022_s16, 5  ;;  %p2901_p4 = scmp.ne.s32.totalorder %s4022_s16, 0 }
   0xe   : > { %p190_p3 = scmp.lt.s32.totalorder %s2897_s17, 63  ;;  %v3989_v0 = vmov (!%p2901_p4), 0.0  }
   0xf   : > { %206 = sbr.rel (%p2901_p4) target bundleno = 22 (0x16), region = 36  ;;  %207 = vst [vmem:[%s5068_s4] sm:$0xff] (!%p2901_p4), %v3989_v0 }
  0x10   : > { %s5085_s17 = smov (!%p190_p3, %s2897_s17), 63 }
  0x11   : > { %s3690_s18 = smul.u32 36, %s5085_s17  ;;  %s2900_s19 = sshll.u32 %s5085_s17, 3 }
  0x12   : > { %s4030_s22 = scalar_lea.vmem %s5067_s3, %s2900_s19 }
  0x13   : > { %s4035_s25 = scalar_lea.vmem %s5064_s0, %s3690_s18 }
  0x16 PF: > { %v3701_v1 = vld [vmem:[%s5065_s1 + $0x40] sm:$0xff]   ;;  %v3703_v3 = vld [vmem:[%s5065_s1 + $0x48] sm:$0xff]   ;;  %v3705_v5 = vld [vmem:[%s5065_s1 + $0x50] sm:$0xff]  }
  0x17   : > { %v3702_v2 = vld [vmem:[%s5065_s1] sm:$0xff]   ;;  %3154 = vmatprep.subr.bf16.mxu0 %v3701_v1  ;;  %3674 = vmatprep.subr.bf16.mxu1 %v3701_v1  ;;  %v3704_v4 = vld [vmem:[%s5065_s1 + $0x8] sm:$0xff]   ;;  %v3706_v6 = vld [vmem:[%s5065_s1 + $0x10] sm:$0xff]  }
  0x18   : > { %3155 = vmatpush3.bf16.msra.mxu0 %v3702_v2  ;;  %3682 = vmatpush3.bf16.msra.mxu1 %v3702_v2  ;;  %v3707_v7 = vld [vmem:[%s5065_s1 + $0x58] sm:$0xff]   ;;  %v3709_v9 = vld [vmem:[%s5065_s1 + $0x60] sm:$0xff]   ;;  %v3711_v11 = vld [vmem:[%s5065_s1 + $0x68] sm:$0xff]  }
  0x19   : > { %3156 = vmatprep.subr.bf16.mxu0 %v3703_v3  ;;  %3675 = vmatprep.subr.bf16.mxu1 %v3703_v3  ;;  %v3708_v8 = vld [vmem:[%s5065_s1 + $0x18] sm:$0xff]   ;;  %v3710_v10 = vld [vmem:[%s5065_s1 + $0x20] sm:$0xff]   ;;  %v3712_v14 = vld [vmem:[%s5065_s1 + $0x28] sm:$0xff]  }
  0x1a   : > { %v3719_v12 = vld [vmem:[%s4035_s25 + $0x4] ss:$36 sps:$4 sm:$0xff]   ;;  %v3713_v15 = vld [vmem:[%s5065_s1 + $0x70] sm:$0xff]   ;;  %v3715_v17 = vld [vmem:[%s5065_s1 + $0x78] sm:$0xff]  }
  0x1b   : > { %v3722_v13 = vld [vmem:[%s4035_s25 + $0x364] ss:$36 sps:$4 sm:$0xff]   ;;  %1717 = vmatprep.mubr.bf16.mxu0 %v3719_v12  ;;  %v3714_v16 = vld [vmem:[%s5065_s1 + $0x30] sm:$0xff]   ;;  %v3716_v18 = vld [vmem:[%s5065_s1 + $0x38] sm:$0xff]  }
  0x1c   : > { %3157 = vmatpush3.bf16.msra.mxu0 %v3704_v4  ;;  %3683 = vmatpush3.bf16.msra.mxu1 %v3704_v4  ;;  %v3723_v19 = vld [vmem:[%s5065_s1 + $0xc0] sm:$0xff]   ;;  %v3727_v25 = vld [vmem:[%s5065_s1 + $0xc8] sm:$0xff]   ;;  %v3735_v33 = vld [vmem:[%s5065_s1 + $0xd0] sm:$0xff]  }
  0x1d   : > { %3158 = vmatprep.subr.bf16.mxu0 %v3705_v5  ;;  %3676 = vmatprep.subr.bf16.mxu1 %v3705_v5  ;;  %v3717_v20 = vld [vmem:[%s4035_s25] ss:$36 sps:$4 sm:$0xff]   ;;  %v3729_v26 = vld [vmem:[%s4035_s25 + $0x4c] ss:$36 sps:$4 sm:$0xff]   ;;  %v3737_v35 = vld [vmem:[%s5065_s1 + $0xd8] sm:$0xff]  }
  0x1e   : > { %1813 = vmatprep.mubr.bf16.mxu1 %v3722_v13  ;;  %v3720_v21 = vld [vmem:[%s4035_s25 + $0x360] ss:$36 sps:$4 sm:$0xff]   ;;  %v3731_v27 = vld [vmem:[%s4035_s25 + $0x3ac] ss:$36 sps:$4 sm:$0xff]   ;;  %v3741_v36 = vld [vmem:[%s4035_s25 + $0x94] ss:$36 sps:$4 sm:$0xff]  }
  0x1f   : > { %v3724_v22 = vld [vmem:[%s5065_s1 + $0x140] sm:$0xff]   ;;  %v3738_v28 = vld [vmem:[%s5065_s1 + $0x148] sm:$0xff]   ;;  %v3736_v34 = vld [vmem:[%s5065_s1 + $0x90] sm:$0xff]  }
  0x20   : > { %3159 = vmatpush3.bf16.msra.mxu0 %v3706_v6  ;;  %3684 = vmatpush3.bf16.msra.mxu1 %v3706_v6  ;;  %v3725_v23 = vld [vmem:[%s5065_s1 + $0x80] sm:$0xff]   ;;  %v3728_v29 = vld [vmem:[%s5065_s1 + $0x88] sm:$0xff]   ;;  %v3743_v37 = vld [vmem:[%s4035_s25 + $0x3f4] ss:$36 sps:$4 sm:$0xff]  }
  0x21   : > { %3160 = vmatprep.subr.bf16.mxu0 %v3707_v7  ;;  %3677 = vmatprep.subr.bf16.mxu1 %v3707_v7  ;;  %v3726_v24 = vld [vmem:[%s5065_s1 + $0x100] sm:$0xff]   ;;  %v3740_v30 = vld [vmem:[%s5065_s1 + $0x108] sm:$0xff]   ;;  %v3739_v38 = vld [vmem:[%s5065_s1 + $0x98] sm:$0xff]  }
  0x22   : > { %v3733_v31 = vld [vmem:[%s4035_s25 + $0x48] ss:$36 sps:$4 sm:$0xff]   ;;  %v3747_v39 = vld [vmem:[%s5065_s1 + $0xe0] sm:$0xff]   ;;  %v3745_v40 = vld [vmem:[%s4035_s25 + $0x90] ss:$36 sps:$4 sm:$0xff]  }
  0x23   : > { %v3734_v32 = vld [vmem:[%s4035_s25 + $0x3a8] ss:$36 sps:$4 sm:$0xff]   ;;  %v3746_v41 = vld [vmem:[%s4035_s25 + $0x3f0] ss:$36 sps:$4 sm:$0xff]   ;;  %v3748_v43 = vld [vmem:[%s5065_s1 + $0xa0] sm:$0xff]  }
  0x24   : > { %3161 = vmatpush3.bf16.msra.mxu0 %v3708_v8  ;;  %3685 = vmatpush3.bf16.msra.mxu1 %v3708_v8  ;;  %v3758_v42 = vld [vmem:[%s5065_s1 + $0x150] sm:$0xff]   ;;  %v3749_v44 = vld [vmem:[%s5065_s1 + $0xe8] sm:$0xff]   ;;  %v3751_v46 = vld [vmem:[%s4035_s25 + $0xdc] ss:$36 sps:$4 sm:$0xff]  }
  0x25   : > { %3162 = vmatprep.subr.bf16.mxu0 %v3709_v9  ;;  %3678 = vmatprep.subr.bf16.mxu1 %v3709_v9  ;;  %v3760_v45 = vld [vmem:[%s5065_s1 + $0x110] sm:$0xff]   ;;  %v3753_v47 = vld [vmem:[%s4035_s25 + $0x43c] ss:$36 sps:$4 sm:$0xff]   ;;  %v3750_v48 = vld [vmem:[%s5065_s1 + $0xa8] sm:$0xff]  }
  0x26   : > { %v3755_v49 = vld [vmem:[%s4035_s25 + $0xd8] ss:$36 sps:$4 sm:$0xff]   ;;  %v3757_v51 = vld [vmem:[%s5065_s1 + $0xf0] sm:$0xff]   ;;  %v3763_v53 = vld [vmem:[%s4035_s25 + $0x124] ss:$36 sps:$4 sm:$0xff]  }
  0x27   : > { %v3756_v50 = vld [vmem:[%s4035_s25 + $0x438] ss:$36 sps:$4 sm:$0xff]   ;;  %v3759_v52 = vld [vmem:[%s5065_s1 + $0xb0] sm:$0xff]   ;;  %v3765_v59 = vld [vmem:[%s4035_s25 + $0x8] ss:$36 sps:$4 sm:$0xff]  }
  0x28   : > { %3163 = vmatpush3.bf16.msra.mxu0 %v3710_v10  ;;  %3686 = vmatpush3.bf16.msra.mxu1 %v3710_v10  ;;  %v3761_v54 = vld [vmem:[%s5065_s1 + $0xf8] sm:$0xff]   ;;  %v3767_v57 = vld [vmem:[%s4035_s25 + $0xc] ss:$36 sps:$4 sm:$0xff]   ;;  %v3768_v60 = vld [vmem:[%s4035_s25 + $0x120] ss:$36 sps:$4 sm:$0xff]  }
  0x29   : > { %3164 = vmatprep.subr.bf16.mxu0 %v3711_v11  ;;  %3679 = vmatprep.subr.bf16.mxu1 %v3711_v11  ;;  %v3771_v55 = vld [vmem:[%s5065_s1 + $0x158] sm:$0xff]   ;;  %v3769_v61 = vld [vmem:[%s5065_s1 + $0x1c0] sm:$0xff]   ;;  %v3773_v63 = vld [vmem:[%s4035_s25 + $0x16c] ss:$36 sps:$4 sm:$0xff]  }
  0x2a   : > { %v3772_v56 = vld [vmem:[%s5065_s1 + $0x118] sm:$0xff]   ;;  %v3770_v62 = vld [vmem:[%s5065_s1 + $0x180] sm:$0xff]   ;;  %v3786_v3 = vld [vmem:[%s5065_s1 + $0x1c8] sm:$0xff]  }
  0x2b   : > { %v3762_v58 = vld [vmem:[%s5065_s1 + $0xb8] sm:$0xff]   ;;  %v3785_v0 = vld [vmem:[%s5065_s1 + $0x160] sm:$0xff]   ;;  %v3788_v4 = vld [vmem:[%s5065_s1 + $0x188] sm:$0xff]  }
  0x2c   : > { %3165 = vmatpush3.bf16.msra.mxu0 %v3712_v14  ;;  %3687 = vmatpush3.bf16.msra.mxu1 %v3712_v14  ;;  %v3775_v1 = vld [vmem:[%s4035_s25 + $0x54] ss:$36 sps:$4 sm:$0xff]   ;;  %v3787_v2 = vld [vmem:[%s5065_s1 + $0x120] sm:$0xff]   ;;  %v3777_v5 = vld [vmem:[%s4035_s25 + $0x168] ss:$36 sps:$4 sm:$0xff]  }
  0x2d   : > { %3166 = vmatprep.subr.bf16.mxu0 %v3713_v15  ;;  %3680 = vmatprep.subr.bf16.mxu1 %v3713_v15  ;;  %v3795_v6 = vld [vmem:[%s5065_s1 + $0x168] sm:$0xff]   ;;  %v3778_v8 = vld [vmem:[%s4035_s25 + $0x50] ss:$36 sps:$4 sm:$0xff]   ;;  %v3781_v10 = vld [vmem:[%s4035_s25 + $0x9c] ss:$36 sps:$4 sm:$0xff]  }
  0x2e   : > { %v3796_v7 = vld [vmem:[%s5065_s1 + $0x128] sm:$0xff]   ;;  %v3779_v9 = vld [vmem:[%s4035_s25 + $0x1b4] ss:$36 sps:$4 sm:$0xff]   ;;  %v3789_v15 = vld [vmem:[%s4035_s25 + $0x1fc] ss:$36 sps:$4 sm:$0xff]  }
  0x2f   : > { %v3803_v11 = vld [vmem:[%s5065_s1 + $0x1d0] sm:$0xff]   ;;  %v3784_v14 = vld [vmem:[%s4035_s25 + $0x98] ss:$36 sps:$4 sm:$0xff]  }
  0x30   : > { %3167 = vmatpush3.bf16.msra.mxu0 %v3714_v16  ;;  %3688 = vmatpush3.bf16.msra.mxu1 %v3714_v16  ;;  %v3804_v12 = vld [vmem:[%s5065_s1 + $0x190] sm:$0xff]  }
  0x31   : > { %3168 = vmatprep.subr.bf16.mxu0 %v3715_v17  ;;  %3681 = vmatprep.subr.bf16.mxu1 %v3715_v17  ;;  %v3783_v13 = vld [vmem:[%s4035_s25 + $0x1b0] ss:$36 sps:$4 sm:$0xff]  }
  0x32   : > { %v3811_v16 = vld [vmem:[%s5065_s1 + $0x170] sm:$0xff]  }
  0x33   : > { %v3812_v17 = vld [vmem:[%s5065_s1 + $0x130] sm:$0xff]  }
  0x34   : > { %3169 = vmatpush3.bf16.msra.mxu0 %v3716_v18  ;;  %3689 = vmatpush3.bf16.msra.mxu1 %v3716_v18  ;;  %v3791_v18 = vld [vmem:[%s4035_s25 + $0xe4] ss:$36 sps:$4 sm:$0xff]  }
  0x35   : > { %3266 = vmatprep.subr.bf16.mxu1 %v3723_v19  ;;  %3378 = vmatprep.subr.bf16.mxu0 %v3724_v22  ;;  %v3819_v19 = vld [vmem:[%s5065_s1 + $0x1d8] sm:$0xff]  }
  0x36   : > { %v3821_v22 = vld [vmem:[%s5065_s1 + $0x178] sm:$0xff]  }
  0x37   : > { %1718 = vmatmul.mubr.bf16.vlgmr.msra.gmra.mrb[0].mxu0 %v3717_v20  ;;  %1814 = vmatmul.mubr.bf16.vlgmr.msra.gmra.mrb[0].mxu1 %v3720_v21  ;;  %v3820_v20 = vld [vmem:[%s5065_s1 + $0x198] sm:$0xff]  }
  0x38   : > { %3267 = vmatpush3.bf16.msra.mxu1 %v3725_v23  ;;  %3379 = vmatpush3.bf16.msra.mxu0 %v3726_v24  ;;  %v3793_v21 = vld [vmem:[%s4035_s25 + $0x1f8] ss:$36 sps:$4 sm:$0xff]   ;;  %v3794_v24 = vld [vmem:[%s4035_s25 + $0xe0] ss:$36 sps:$4 sm:$0xff]  }
  0x39   : > { %3268 = vmatprep.subr.bf16.mxu1 %v3727_v25  ;;  %1725 = vmatprep.mubr.bf16.mxu0 %v3729_v26  ;;  %v3822_v23 = vld [vmem:[%s5065_s1 + $0x138] sm:$0xff]   ;;  %v3797_v25 = vld [vmem:[%s4035_s25 + $0x244] ss:$36 sps:$4 sm:$0xff]   ;;  %v3799_v26 = vld [vmem:[%s4035_s25 + $0x12c] ss:$36 sps:$4 sm:$0xff]  }
  0x3a   : > { %1821 = vmatprep.mubr.bf16.mxu1 %v3731_v27  ;;  %3380 = vmatprep.subr.bf16.mxu0 %v3738_v28  ;;  %v3835_v27 = vld [vmem:[%s5065_s1 + $0x1e0] sm:$0xff]  }
  0x3b   : > { %v3801_v28 = vld [vmem:[%s4035_s25 + $0x240] ss:$36 sps:$4 sm:$0xff]  }
  0x3c   : > { %3269 = vmatpush3.bf16.msra.mxu1 %v3728_v29  ;;  %3381 = vmatpush3.bf16.msra.mxu0 %v3740_v30  ;;  %v3836_v29 = vld [vmem:[%s5065_s1 + $0x200] sm:$0xff]  }
  0x3d   : > { %3270 = vmatprep.subr.bf16.mxu1 %v3735_v33  ;;  %3382 = vmatprep.subr.bf16.mxu0 %v3758_v42  ;;  %v3837_v30 = vld [vmem:[%s5065_s1 + $0x1a0] sm:$0xff]   ;;  %v3807_v33 = vld [vmem:[%s4035_s25 + $0x174] ss:$36 sps:$4 sm:$0xff]  }
  0x3e   : > { %v3865_v42 = vld [vmem:[%s5065_s1 + $0x1f0] sm:$0xff]  }
  0x3f   : > { %1726 = vmatmul.mubr.bf16.gmra.mrb[4].mxu0 %v3733_v31  ;;  %1822 = vmatmul.mubr.bf16.gmra.mrb[4].mxu1 %v3734_v32  ;;  %v3802_v31 = vld [vmem:[%s4035_s25 + $0x128] ss:$36 sps:$4 sm:$0xff]  }
  0x40   : > { %3271 = vmatpush3.bf16.msra.mxu1 %v3736_v34  ;;  %1733 = vmatprep.mubr.bf16.mxu0 %v3741_v36  ;;  %v3805_v32 = vld [vmem:[%s4035_s25 + $0x28c] ss:$36 sps:$4 sm:$0xff]  }
  0x41   : > { %3272 = vmatprep.subr.bf16.mxu1 %v3737_v35  ;;  %1829 = vmatprep.mubr.bf16.mxu1 %v3743_v37  ;;  %v3850_v34 = vld [vmem:[%s5065_s1 + $0x1e8] sm:$0xff]   ;;  %v3810_v36 = vld [vmem:[%s4035_s25 + $0x170] ss:$36 sps:$4 sm:$0xff]  }
  0x42   : > { %3383 = vmatpush3.bf16.msra.mxu0 %v3760_v45  ;;  %v3809_v35 = vld [vmem:[%s4035_s25 + $0x288] ss:$36 sps:$4 sm:$0xff]  }
  0x43   : > { %3384 = vmatprep.subr.bf16.mxu0 %v3771_v55  ;;  %v3852_v37 = vld [vmem:[%s5065_s1 + $0x1a8] sm:$0xff]   ;;  %v3840_v55 = vld [vmem:[%s4035_s25 + $0x5c] ss:$36 sps:$4 sm:$0xff]  }
  0x44   : > { %3273 = vmatpush3.bf16.msra.mxu1 %v3739_v38  ;;  %v3813_v38 = vld [vmem:[%s4035_s25 + $0x2d4] ss:$36 sps:$4 sm:$0xff]   ;;  %v3825_v45 = vld [vmem:[%s4035_s25 + $0x204] ss:$36 sps:$4 sm:$0xff]  }
  0x45   : > { %3274 = vmatprep.subr.bf16.mxu1 %v3747_v39  ;;  %v3815_v39 = vld [vmem:[%s4035_s25 + $0x1bc] ss:$36 sps:$4 sm:$0xff]  }
  0x46   : > { %3385 = vmatpush3.bf16.msra.mxu0 %v3772_v56  ;;  %v3851_v56 = vld [vmem:[%s5065_s1 + $0x208] sm:$0xff]  }
  0x47   : > { %1734 = vmatmul.mubr.bf16.gmra.mrb[8].mxu0 %v3745_v40  ;;  %1830 = vmatmul.mubr.bf16.gmra.mrb[8].mxu1 %v3746_v41  ;;  %v3817_v40 = vld [vmem:[%s4035_s25 + $0x2d0] ss:$36 sps:$4 sm:$0xff]   ;;  %v3818_v41 = vld [vmem:[%s4035_s25 + $0x1b8] ss:$36 sps:$4 sm:$0xff]  }
  0x48   : > { %3275 = vmatpush3.bf16.msra.mxu1 %v3748_v43  ;;  %1741 = vmatprep.mubr.bf16.mxu0 %v3751_v46  ;;  %v3823_v43 = vld [vmem:[%s4035_s25 + $0x31c] ss:$36 sps:$4 sm:$0xff]  }
  0x49   : > { %3276 = vmatprep.subr.bf16.mxu1 %v3749_v44  ;;  %1837 = vmatprep.mubr.bf16.mxu1 %v3753_v47  ;;  %v3867_v44 = vld [vmem:[%s5065_s1 + $0x1b0] sm:$0xff]   ;;  %v3827_v46 = vld [vmem:[%s4035_s25 + $0x318] ss:$36 sps:$4 sm:$0xff]   ;;  %v3828_v47 = vld [vmem:[%s4035_s25 + $0x200] ss:$36 sps:$4 sm:$0xff]  }
  0x4a   : > { %3386 = vmatprep.subr.bf16.mxu0 %v3785_v0  ;;  %v3848_v0 = vld [vmem:[%s4035_s25 + $0x2d8] ss:$36 sps:$4 sm:$0xff]  }
  0x4b   : > { %3387 = vmatpush3.bf16.msra.mxu0 %v3787_v2  ;;  %v3853_v2 = vld [vmem:[%s4035_s25 + $0x324] ss:$36 sps:$4 sm:$0xff]  }
  0x4c   : > { %3277 = vmatpush3.bf16.msra.mxu1 %v3750_v48  ;;  %3388 = vmatprep.subr.bf16.mxu0 %v3795_v6  ;;  %v3880_v48 = vld [vmem:[%s5065_s1 + $0x1f8] sm:$0xff]   ;;  %v3858_v6 = vld [vmem:[%s4035_s25 + $0xe8] ss:$36 sps:$4 sm:$0xff]  }
  0x4d   : > { %3278 = vmatprep.subr.bf16.mxu1 %v3757_v51  ;;  %v3833_v51 = vld [vmem:[%s4035_s25 + $0x14] ss:$36 sps:$4 sm:$0xff]  }
  0x4f   : > { %1742 = vmatmul.mubr.bf16.gmra.mrb[12].mxu0 %v3755_v49  ;;  %1838 = vmatmul.mubr.bf16.gmra.mrb[12].mxu1 %v3756_v50  ;;  %v3829_v49 = vld [vmem:[%s4035_s25 + $0x24c] ss:$36 sps:$4 sm:$0xff]   ;;  %v3882_v50 = vld [vmem:[%s5065_s1 + $0x1b8] sm:$0xff]  }
  0x50   : > { %3279 = vmatpush3.bf16.msra.mxu1 %v3759_v52  ;;  %1749 = vmatprep.mubr.bf16.mxu0 %v3763_v53  ;;  %v3831_v52 = vld [vmem:[%s4035_s25 + $0x10] ss:$36 sps:$4 sm:$0xff]   ;;  %v3834_v53 = vld [vmem:[%s4035_s25 + $0x248] ss:$36 sps:$4 sm:$0xff]  }
  0x51   : > { %3280 = vmatprep.subr.bf16.mxu1 %v3761_v54  ;;  %1878 = vmatprep.mubr.bf16.mxu1 %v3767_v57  ;;  %v3838_v54 = vld [vmem:[%s4035_s25 + $0x294] ss:$36 sps:$4 sm:$0xff]  }
  0x52   : > { %3389 = vmatpush3.bf16.msra.mxu0 %v3796_v7  ;;  %v3866_v57 = vld [vmem:[%s5065_s1 + $0x210] sm:$0xff]  }
  0x53   : > { %3390 = vmatprep.subr.bf16.mxu0 %v3811_v16  ;;  %v3921_v7 = vld [vmem:[%s5065_s1 + $0x230] sm:$0xff]   ;;  %v3873_v16 = vld [vmem:[%s4035_s25 + $0x178] ss:$36 sps:$4 sm:$0xff]  }
  0x54   : > { %3281 = vmatpush3.bf16.msra.mxu1 %v3762_v58  ;;  %v3842_v58 = vld [vmem:[%s4035_s25 + $0x290] ss:$36 sps:$4 sm:$0xff]  }
  0x55   : > { %3490 = vmatprep.subr.bf16.mxu1 %v3769_v61  ;;  %v3846_v61 = vld [vmem:[%s4035_s25 + $0xa4] ss:$36 sps:$4 sm:$0xff]  }
  0x56   : > { %3391 = vmatpush3.bf16.msra.mxu0 %v3812_v17  ;;  %v3874_v17 = vld [vmem:[%s4035_s25 + $0x3fc] ss:$36 sps:$4 sm:$0xff]  }
  0x57   : > { %1750 = vmatmul.mubr.bf16.gmra.mrb[16].mxu0 %v3768_v60  ;;  %1879 = vmatmul.mubr.bf16.vlgmr.msra.gmra.mrb[16].mxu1 %v3765_v59  ;;  %v3843_v59 = vld [vmem:[%s4035_s25 + $0x58] ss:$36 sps:$4 sm:$0xff]  }
  0x58   : > { %3491 = vmatpush3.bf16.msra.mxu1 %v3770_v62  ;;  %1757 = vmatprep.mubr.bf16.mxu0 %v3773_v63  ;;  %v3844_v60 = vld [vmem:[%s4035_s25 + $0x2dc] ss:$36 sps:$4 sm:$0xff]  }
  0x59   : > { %1886 = vmatprep.mubr.bf16.mxu1 %v3775_v1  ;;  %3492 = vmatprep.subr.bf16.mxu1 %v3786_v3  ;;  %v3881_v62 = vld [vmem:[%s5065_s1 + $0x218] sm:$0xff]   ;;  %v3895_v63 = vld [vmem:[%s5065_s1 + $0x220] sm:$0xff]   ;;  %v3855_v3 = vld [vmem:[%s4035_s25 + $0xec] ss:$36 sps:$4 sm:$0xff]  }
  0x5a   : > { %3392 = vmatprep.subr.bf16.mxu0 %v3821_v22  ;;  %v3849_v1 = vld [vmem:[%s4035_s25 + $0xa0] ss:$36 sps:$4 sm:$0xff]   ;;  %v3885_v22 = vld [vmem:[%s4035_s25 + $0x20c] ss:$36 sps:$4 sm:$0xff]  }
  0x5b   : > { %3393 = vmatpush3.bf16.msra.mxu0 %v3822_v23  ;;  %v3887_v23 = vld [vmem:[%s4035_s25 + $0x440] ss:$36 sps:$4 sm:$0xff]  }
  0x5c   : > { %3493 = vmatpush3.bf16.msra.mxu1 %v3788_v4  ;;  %3626 = vmatprep.subr.bf16.mxu0 %v3836_v29  ;;  %v3908_v4 = vld [vmem:[%s5065_s1 + $0x228] sm:$0xff]  }
  0x5d   : > { %3494 = vmatprep.subr.bf16.mxu1 %v3803_v11  ;;  %v3863_v11 = vld [vmem:[%s4035_s25 + $0x368] ss:$36 sps:$4 sm:$0xff]  }
  0x5f   : > { %1758 = vmatmul.mubr.bf16.gmra.mrb[20].mxu0 %v3777_v5  ;;  %1887 = vmatmul.mubr.bf16.gmra.mrb[20].mxu1 %v3778_v8  ;;  %v3857_v5 = vld [vmem:[%s4035_s25 + $0x320] ss:$36 sps:$4 sm:$0xff]   ;;  %v3859_v8 = vld [vmem:[%s4035_s25 + $0x36c] ss:$36 sps:$4 sm:$0xff]  }
  0x60   : > { %1765 = vmatprep.mubr.bf16.mxu0 %v3779_v9  ;;  %1894 = vmatprep.mubr.bf16.mxu1 %v3781_v10  ;;  %v3861_v9 = vld [vmem:[%s4035_s25 + $0x134] ss:$36 sps:$4 sm:$0xff]  }
  0x61   : > { %3495 = vmatpush3.bf16.msra.mxu1 %v3804_v12  ;;  %v3934_v10 = vld [vmem:[%s5065_s1 + $0x238] sm:$0xff]   ;;  %v3864_v12 = vld [vmem:[%s4035_s25 + $0x130] ss:$36 sps:$4 sm:$0xff]  }
  0x62   : > { %3496 = vmatprep.subr.bf16.mxu1 %v3819_v19  ;;  %v3878_v19 = vld [vmem:[%s4035_s25 + $0x3f8] ss:$36 sps:$4 sm:$0xff]  }
  0x65   : > { %3497 = vmatpush3.bf16.msra.mxu1 %v3820_v20  ;;  %v3879_v20 = vld [vmem:[%s4035_s25 + $0x1c0] ss:$36 sps:$4 sm:$0xff]  }
  0x66   : > { %3498 = vmatprep.subr.bf16.mxu1 %v3835_v27  ;;  %v3891_v27 = vld [vmem:[%s4035_s25 + $0x18] ss:$36 sps:$4 sm:$0xff]  }
  0x67   : > { %1766 = vmatmul.mubr.bf16.gmra.mrb[24].mxu0 %v3783_v13  ;;  %1895 = vmatmul.mubr.bf16.gmra.mrb[24].mxu1 %v3784_v14  ;;  %v3868_v13 = vld [vmem:[%s4035_s25 + $0x3b4] ss:$36 sps:$4 sm:$0xff]   ;;  %v3870_v14 = vld [vmem:[%s4035_s25 + $0x17c] ss:$36 sps:$4 sm:$0xff]  }
  0x68   : > { %1773 = vmatprep.mubr.bf16.mxu0 %v3789_v15  ;;  %1902 = vmatprep.mubr.bf16.mxu1 %v3791_v18  ;;  %v3872_v15 = vld [vmem:[%s4035_s25 + $0x3b0] ss:$36 sps:$4 sm:$0xff]   ;;  %v3876_v18 = vld [vmem:[%s4035_s25 + $0x1c4] ss:$36 sps:$4 sm:$0xff]  }
  0x69   : > { %3499 = vmatpush3.bf16.msra.mxu1 %v3837_v30  ;;  %v3898_v30 = vld [vmem:[%s4035_s25 + $0x64] ss:$36 sps:$4 sm:$0xff]  }
  0x6a   : > { %3500 = vmatprep.subr.bf16.mxu1 %v3850_v34  ;;  %v3904_v34 = vld [vmem:[%s4035_s25 + $0xac] ss:$36 sps:$4 sm:$0xff]  }
  0x6d   : > { %3501 = vmatpush3.bf16.msra.mxu1 %v3852_v37  ;;  %v3909_v37 = vld [vmem:[%s4035_s25 + $0x32c] ss:$36 sps:$4 sm:$0xff]  }
  0x6e   : > { %3502 = vmatprep.subr.bf16.mxu1 %v3865_v42  ;;  %v3917_v42 = vld [vmem:[%s4035_s25 + $0x13c] ss:$36 sps:$4 sm:$0xff]  }
  0x6f   : > { %1774 = vmatmul.mubr.bf16.gmra.mrb[28].mxu0 %v3793_v21  ;;  %1903 = vmatmul.mubr.bf16.gmra.mrb[28].mxu1 %v3794_v24  ;;  %v3883_v21 = vld [vmem:[%s4035_s25 + $0x444] ss:$36 sps:$4 sm:$0xff]  }
  0x70   : > { %1781 = vmatprep.mubr.bf16.mxu0 %v3797_v25  ;;  %1910 = vmatprep.mubr.bf16.mxu1 %v3799_v26  ;;  %v3888_v24 = vld [vmem:[%s4035_s25 + $0x208] ss:$36 sps:$4 sm:$0xff]   ;;  %v3889_v25 = vld [vmem:[%s4035_s25 + $0x254] ss:$36 sps:$4 sm:$0xff]   ;;  %v3893_v26 = vld [vmem:[%s4035_s25 + $0x1c] ss:$36 sps:$4 sm:$0xff]  }
  0x71   : > { %3503 = vmatpush3.bf16.msra.mxu1 %v3867_v44  ;;  %v3920_v44 = vld [vmem:[%s4035_s25 + $0x138] ss:$36 sps:$4 sm:$0xff]  }
  0x72   : > { %3504 = vmatprep.subr.bf16.mxu1 %v3880_v48  ;;  %v3927_v48 = vld [vmem:[%s4035_s25 + $0x180] ss:$36 sps:$4 sm:$0xff]  }
  0x75   : > { %3505 = vmatpush3.bf16.msra.mxu1 %v3882_v50  ;;  %v3930_v50 = vld [vmem:[%s4035_s25 + $0x1cc] ss:$36 sps:$4 sm:$0xff]  }
  0x77   : > { %1782 = vmatmul.mubr.bf16.gmra.mrb[32].mxu0 %v3801_v28  ;;  %1911 = vmatmul.mubr.bf16.gmra.mrb[32].mxu1 %v3802_v31  ;;  %v3894_v28 = vld [vmem:[%s4035_s25 + $0x250] ss:$36 sps:$4 sm:$0xff]   ;;  %v3900_v31 = vld [vmem:[%s4035_s25 + $0x298] ss:$36 sps:$4 sm:$0xff]  }
  0x78   : > { %1789 = vmatprep.mubr.bf16.mxu0 %v3805_v32  ;;  %1918 = vmatprep.mubr.bf16.mxu1 %v3807_v33  ;;  %v3901_v32 = vld [vmem:[%s4035_s25 + $0x60] ss:$36 sps:$4 sm:$0xff]  }
  0x79   : > { %v3902_v33 = vld [vmem:[%s4035_s25 + $0x2e4] ss:$36 sps:$4 sm:$0xff]  }
  0x7f   : > { %1790 = vmatmul.mubr.bf16.gmra.mrb[36].mxu0 %v3809_v35  ;;  %1919 = vmatmul.mubr.bf16.gmra.mrb[36].mxu1 %v3810_v36  ;;  %v3906_v35 = vld [vmem:[%s4035_s25 + $0x2e0] ss:$36 sps:$4 sm:$0xff]   ;;  %v3907_v36 = vld [vmem:[%s4035_s25 + $0xa8] ss:$36 sps:$4 sm:$0xff]  }
  0x80   : > { %1797 = vmatprep.mubr.bf16.mxu0 %v3813_v38  ;;  %1926 = vmatprep.mubr.bf16.mxu1 %v3815_v39  ;;  %v3911_v38 = vld [vmem:[%s4035_s25 + $0xf4] ss:$36 sps:$4 sm:$0xff]   ;;  %v3913_v39 = vld [vmem:[%s4035_s25 + $0x328] ss:$36 sps:$4 sm:$0xff]  }
  0x87   : > { %1798 = vmatmul.mubr.bf16.gmra.mrb[40].mxu0 %v3817_v40  ;;  %1927 = vmatmul.mubr.bf16.gmra.mrb[40].mxu1 %v3818_v41  ;;  %v3914_v40 = vld [vmem:[%s4035_s25 + $0xf0] ss:$36 sps:$4 sm:$0xff]  }
  0x88   : > { %1805 = vmatprep.mubr.bf16.mxu0 %v3823_v43  ;;  %1934 = vmatprep.mubr.bf16.mxu1 %v3825_v45  ;;  %v3915_v41 = vld [vmem:[%s4035_s25 + $0x374] ss:$36 sps:$4 sm:$0xff]   ;;  %v3922_v45 = vld [vmem:[%s4035_s25 + $0x3bc] ss:$36 sps:$4 sm:$0xff]  }
  0x89   : > { %v3919_v43 = vld [vmem:[%s4035_s25 + $0x370] ss:$36 sps:$4 sm:$0xff]  }
  0x8f   : > { %1806 = vmatmul.mubr.bf16.gmra.mrb[44].mxu0 %v3827_v46  ;;  %1935 = vmatmul.mubr.bf16.gmra.mrb[44].mxu1 %v3828_v47  ;;  %v3924_v46 = vld [vmem:[%s4035_s25 + $0x184] ss:$36 sps:$4 sm:$0xff]   ;;  %v3926_v47 = vld [vmem:[%s4035_s25 + $0x3b8] ss:$36 sps:$4 sm:$0xff]  }
  0x90   : > { %1942 = vmatprep.mubr.bf16.mxu1 %v3829_v49  ;;  %2039 = vmatprep.mubr.bf16.mxu0 %v3833_v51  ;;  %v3928_v49 = vld [vmem:[%s4035_s25 + $0x404] ss:$36 sps:$4 sm:$0xff]  }
  0x91   : > { %v3932_v51 = vld [vmem:[%s4035_s25 + $0x400] ss:$36 sps:$4 sm:$0xff]  }
  0x97   : > { %1943 = vmatmul.mubr.bf16.gmra.mrb[48].mxu1 %v3834_v53  ;;  %2040 = vmatmul.mubr.bf16.vlgmr.msra.gmra.mrb[48].mxu0 %v3831_v52  ;;  %v3933_v52 = vld [vmem:[%s4035_s25 + $0x1c8] ss:$36 sps:$4 sm:$0xff]  }
  0x98   : > { %3627 = vmatpush3.bf16.msra.mxu0 %v3836_v29  ;;  %1950 = vmatprep.mubr.bf16.mxu1 %v3838_v54  ;;  %v3896_v29 = vld [vmem:[%s4035_s25 + $0x29c] ss:$36 sps:$4 sm:$0xff]   ;;  %v3935_v53 = vld [vmem:[%s4035_s25 + $0x44c] ss:$36 sps:$4 sm:$0xff]   ;;  %v3937_v54 = vld [vmem:[%s4035_s25 + $0x214] ss:$36 sps:$4 sm:$0xff]  }
  0x99   : > { %2047 = vmatprep.mubr.bf16.mxu0 %v3840_v55  ;;  %3628 = vmatprep.subr.bf16.mxu0 %v3851_v56 }
  0x9c   : > { %3629 = vmatpush3.bf16.msra.mxu0 %v3851_v56 }
  0x9d   : > { %3630 = vmatprep.subr.bf16.mxu0 %v3866_v57 }
  0x9f   : > { %1951 = vmatmul.mubr.bf16.gmra.mrb[52].mxu1 %v3842_v58  ;;  %2048 = vmatmul.mubr.bf16.gmra.mrb[52].mxu0 %v3843_v59  ;;  %v3939_v59 = vld [vmem:[%s4035_s25 + $0x448] ss:$36 sps:$4 sm:$0xff]  }
  0xa0   : > { %1958 = vmatprep.mubr.bf16.mxu1 %v3844_v60  ;;  %2055 = vmatprep.mubr.bf16.mxu0 %v3846_v61  ;;  %v3940_v60 = vld [vmem:[%s4035_s25 + $0x210] ss:$36 sps:$4 sm:$0xff]  }
  0xa1   : > { %3631 = vmatpush3.bf16.msra.mxu0 %v3866_v57 }
  0xa2   : > { %3632 = vmatprep.subr.bf16.mxu0 %v3881_v62 }
  0xa5   : > { %3633 = vmatpush3.bf16.msra.mxu0 %v3881_v62 }
  0xa6   : > { %3634 = vmatprep.subr.bf16.mxu0 %v3895_v63 }
  0xa7   : > { %1959 = vmatmul.mubr.bf16.gmra.mrb[56].mxu1 %v3848_v0  ;;  %2056 = vmatmul.mubr.bf16.gmra.mrb[56].mxu0 %v3849_v1  ;;  %v3941_v1 = vld [vmem:[%s4035_s25 + $0x25c] ss:$36 sps:$4 sm:$0xff]  }
  0xa8   : > { %1966 = vmatprep.mubr.bf16.mxu1 %v3853_v2  ;;  %2063 = vmatprep.mubr.bf16.mxu0 %v3855_v3  ;;  %v3943_v2 = vld [vmem:[%s4035_s25 + $0x20] ss:$36 sps:$4 sm:$0xff]  }
  0xa9   : > { %3635 = vmatpush3.bf16.msra.mxu0 %v3895_v63 }
  0xaa   : > { %3636 = vmatprep.subr.bf16.mxu0 %v3908_v4 }
  0xad   : > { %3637 = vmatpush3.bf16.msra.mxu0 %v3908_v4 }
  0xae   : > { %3638 = vmatprep.subr.bf16.mxu0 %v3921_v7 }
  0xaf   : > { %1967 = vmatmul.mubr.bf16.gmra.mrb[60].mxu1 %v3857_v5  ;;  %2064 = vmatmul.mubr.bf16.gmra.mrb[60].mxu0 %v3858_v6 }
  0xb0   : > { %1974 = vmatprep.mubr.bf16.mxu1 %v3859_v8  ;;  %2071 = vmatprep.mubr.bf16.mxu0 %v3861_v9 }
  0xb1   : > { %3639 = vmatpush3.bf16.msra.mxu0 %v3921_v7 }
  0xb2   : > { %3640 = vmatprep.subr.bf16.mxu0 %v3934_v10 }
  0xb5   : > { %3641 = vmatpush3.bf16.msra.mxu0 %v3934_v10 }
  0xb7   : > { %1975 = vmatmul.mubr.bf16.gmra.mrb[64].mxu1 %v3863_v11  ;;  %2072 = vmatmul.mubr.bf16.gmra.mrb[64].mxu0 %v3864_v12  ;;  %v3944_v11 = vld [vmem:[%s4035_s25 + $0x258] ss:$36 sps:$4 sm:$0xff]   ;;  %v3945_v12 = vld [vmem:[%s4035_s25 + $0x68] ss:$36 sps:$4 sm:$0xff]  }
  0xb8   : > { %1982 = vmatprep.mubr.bf16.mxu1 %v3868_v13  ;;  %2079 = vmatprep.mubr.bf16.mxu0 %v3870_v14 }
  0xbf   : > { %1983 = vmatmul.mubr.bf16.gmra.mrb[68].mxu1 %v3872_v15  ;;  %2080 = vmatmul.mubr.bf16.gmra.mrb[68].mxu0 %v3873_v16 }
  0xc0   : > { %1990 = vmatprep.mubr.bf16.mxu1 %v3874_v17  ;;  %2087 = vmatprep.mubr.bf16.mxu0 %v3876_v18  ;;  %v3946_v17 = vld [vmem:[%s4035_s25 + $0x2a4] ss:$36 sps:$4 sm:$0xff]   ;;  %v3948_v18 = vld [vmem:[%s4035_s25 + $0xb0] ss:$36 sps:$4 sm:$0xff]  }
  0xc7   : > { %1991 = vmatmul.mubr.bf16.gmra.mrb[72].mxu1 %v3878_v19  ;;  %2088 = vmatmul.mubr.bf16.gmra.mrb[72].mxu0 %v3879_v20 }
  0xc8   : > { %1998 = vmatprep.mubr.bf16.mxu1 %v3883_v21  ;;  %2095 = vmatprep.mubr.bf16.mxu0 %v3885_v22 }
  0xcf   : > { %1999 = vmatmul.mubr.bf16.gmra.mrb[76].mxu1 %v3887_v23  ;;  %2096 = vmatmul.mubr.bf16.gmra.mrb[76].mxu0 %v3888_v24 }
  0xd0   : > { %2103 = vmatprep.mubr.bf16.mxu0 %v3889_v25  ;;  %2200 = vmatprep.mubr.bf16.mxu1 %v3893_v26 }
  0xd7   : > { %2104 = vmatmul.mubr.bf16.gmra.mrb[80].mxu0 %v3894_v28  ;;  %2201 = vmatmul.mubr.bf16.vlgmr.msra.gmra.mrb[80].mxu1 %v3891_v27  ;;  %v3949_v27 = vld [vmem:[%s4035_s25 + $0x2a0] ss:$36 sps:$4 sm:$0xff]   ;;  %v3950_v28 = vld [vmem:[%s4035_s25 + $0xf8] ss:$36 sps:$4 sm:$0xff]  }
  0xd8   : > { %2111 = vmatprep.mubr.bf16.mxu0 %v3896_v29  ;;  %2208 = vmatprep.mubr.bf16.mxu1 %v3898_v30 }
  0xdf   : > { %2112 = vmatmul.mubr.bf16.gmra.mrb[84].mxu0 %v3900_v31  ;;  %2209 = vmatmul.mubr.bf16.gmra.mrb[84].mxu1 %v3901_v32 }
  0xe0   : > { %2119 = vmatprep.mubr.bf16.mxu0 %v3902_v33  ;;  %2216 = vmatprep.mubr.bf16.mxu1 %v3904_v34  ;;  %v3951_v33 = vld [vmem:[%s4035_s25 + $0x2ec] ss:$36 sps:$4 sm:$0xff]   ;;  %v3953_v34 = vld [vmem:[%s4035_s25 + $0x140] ss:$36 sps:$4 sm:$0xff]  }
  0xe7   : > { %2120 = vmatmul.mubr.bf16.gmra.mrb[88].mxu0 %v3906_v35  ;;  %2217 = vmatmul.mubr.bf16.gmra.mrb[88].mxu1 %v3907_v36 }
  0xe8   : > { %2127 = vmatprep.mubr.bf16.mxu0 %v3909_v37  ;;  %2224 = vmatprep.mubr.bf16.mxu1 %v3911_v38 }
  0xef   : > { %2128 = vmatmul.mubr.bf16.gmra.mrb[92].mxu0 %v3913_v39  ;;  %2225 = vmatmul.mubr.bf16.gmra.mrb[92].mxu1 %v3914_v40 }
  0xf0   : > { %2135 = vmatprep.mubr.bf16.mxu0 %v3915_v41  ;;  %2232 = vmatprep.mubr.bf16.mxu1 %v3917_v42 }
  0xf7   : > { %2136 = vmatmul.mubr.bf16.gmra.mrb[96].mxu0 %v3919_v43  ;;  %2233 = vmatmul.mubr.bf16.gmra.mrb[96].mxu1 %v3920_v44  ;;  %v3954_v43 = vld [vmem:[%s4035_s25 + $0x2e8] ss:$36 sps:$4 sm:$0xff]  }
  0xf8   : > { %2143 = vmatprep.mubr.bf16.mxu0 %v3922_v45  ;;  %2240 = vmatprep.mubr.bf16.mxu1 %v3924_v46  ;;  %v3955_v44 = vld [vmem:[%s4035_s25 + $0x188] ss:$36 sps:$4 sm:$0xff]  }
  0xff   : > { %2144 = vmatmul.mubr.bf16.gmra.mrb[100].mxu0 %v3926_v47  ;;  %2241 = vmatmul.mubr.bf16.gmra.mrb[100].mxu1 %v3927_v48 }
 0x100   : > { %2151 = vmatprep.mubr.bf16.mxu0 %v3928_v49  ;;  %2248 = vmatprep.mubr.bf16.mxu1 %v3930_v50  ;;  %v3956_v49 = vld [vmem:[%s4035_s25 + $0x334] ss:$36 sps:$4 sm:$0xff]  }
 0x101   : > { %v3958_v50 = vld [vmem:[%s4035_s25 + $0x1d0] ss:$36 sps:$4 sm:$0xff]  }
 0x107   : > { %2152 = vmatmul.mubr.bf16.gmra.mrb[104].mxu0 %v3932_v51  ;;  %2249 = vmatmul.mubr.bf16.gmra.mrb[104].mxu1 %v3933_v52 }
 0x108   : > { %2159 = vmatprep.mubr.bf16.mxu0 %v3935_v53  ;;  %2256 = vmatprep.mubr.bf16.mxu1 %v3937_v54 }
 0x10a   : > { %v3170_v55 = vpop.f32.mrb[0].mxu0  ;;  %v3242_v56 = vpop.f32.mrb[0].mxu1 }
 0x10b   : > { %v3171_v57 = vpop.f32.mrb[1].mxu0  ;;  %v3243_v58 = vpop.f32.mrb[1].mxu1 }
 0x10c   : > { %v4369_v61 = vadd.f32 %v3171_v57, %v3170_v55  ;;  %v4371_v62 = vadd.f32 %v3243_v58, %v3242_v56  ;;  %v3173_v63 = vpop.f32.mrb[2].mxu0  ;;  %v3245_v0 = vpop.f32.mrb[2].mxu1  ;;  %v4418_v55 = vld [vmem:[%s5066_s2] ss:$0 sm:$0xff] }
 0x10d   : > { %v3174_v3 = vpop.f32.mrb[3].mxu0  ;;  %v3246_v4 = vpop.f32.mrb[3].mxu1 }
 0x10e   : > { %v4375_v5 = vadd.f32 %v3174_v3, %v3173_v63  ;;  %v4377_v6 = vadd.f32 %v3246_v4, %v3245_v0  ;;  %v3960_v63 = vld [vmem:[%s4035_s25 + $0x218] ss:$36 sps:$4 sm:$0xff]   ;;  %v1720_v0 = vadd.f32 %v4369_v61, %v4418_v55 }
 0x10f   : > { %2160 = vmatmul.mubr.bf16.gmra.mrb[108].mxu0 %v3939_v59  ;;  %2257 = vmatmul.mubr.bf16.gmra.mrb[108].mxu1 %v3940_v60  ;;  %v3959_v60 = vld [vmem:[%s4035_s25 + $0x330] ss:$36 sps:$4 sm:$0xff]  }
 0x110   : > { %2264 = vmatprep.mubr.bf16.mxu1 %v3941_v1  ;;  %3642 = vmatprep.mubr.bf16.mxu0 %v3943_v2 }
 0x112   : > { %v3176_v7 = vpop.f32.mrb[4].mxu0  ;;  %v3248_v8 = vpop.f32.mrb[4].mxu1 }
 0x113   : > { %v3177_v9 = vpop.f32.mrb[5].mxu0  ;;  %v3249_v10 = vpop.f32.mrb[5].mxu1 }
 0x114   : > { %v4381_v13 = vadd.f32 %v3177_v9, %v3176_v7  ;;  %v4383_v14 = vadd.f32 %v3249_v10, %v3248_v8  ;;  %v3179_v15 = vpop.f32.mrb[6].mxu0  ;;  %v3251_v16 = vpop.f32.mrb[6].mxu1  ;;  %v3961_v7 = vld [vmem:[%s4035_s25 + $0x37c] ss:$36 sps:$4 sm:$0xff]  }
 0x115   : > { %v3180_v19 = vpop.f32.mrb[7].mxu0  ;;  %v3252_v20 = vpop.f32.mrb[7].mxu1  ;;  %v3963_v8 = vld [vmem:[%s4035_s25 + $0x260] ss:$36 sps:$4 sm:$0xff]  }
 0x116   : > { %v4387_v21 = vadd.f32 %v3180_v19, %v3179_v15  ;;  %v4389_v22 = vadd.f32 %v3252_v20, %v3251_v16 }
 0x117   : > { %2265 = vmatmul.mubr.bf16.gmra.mrb[112].mxu1 %v3944_v11  ;;  %3643 = vmatmul.mubr.bf16.vlgmr.msra.gmra.mrb[112].mxu0 %v3945_v12  ;;  %v1723_v11 = vadd.f32 %v4375_v5, %v4418_v55  ;;  %v1728_v5 = vadd.f32 %v4381_v13, %v4418_v55 }
 0x118   : > { %2272 = vmatprep.mubr.bf16.mxu1 %v3946_v17  ;;  %3646 = vmatprep.mubr.bf16.mxu0 %v3948_v18 }
 0x11a   : > { %v3182_v23 = vpop.f32.mrb[8].mxu0  ;;  %v3254_v24 = vpop.f32.mrb[8].mxu1 }
 0x11b   : > { %v3183_v25 = vpop.f32.mrb[9].mxu0  ;;  %v3255_v26 = vpop.f32.mrb[9].mxu1 }
 0x11c   : > { %v4393_v29 = vadd.f32 %v3183_v25, %v3182_v23  ;;  %v4395_v30 = vadd.f32 %v3255_v26, %v3254_v24  ;;  %v3185_v31 = vpop.f32.mrb[10].mxu0  ;;  %v3257_v32 = vpop.f32.mrb[10].mxu1  ;;  %v3964_v23 = vld [vmem:[%s4035_s25 + $0x378] ss:$36 sps:$4 sm:$0xff]   ;;  %v3965_v24 = vld [vmem:[%s4035_s25 + $0x2a8] ss:$36 sps:$4 sm:$0xff]  }
 0x11d   : > { %v3186_v35 = vpop.f32.mrb[11].mxu0  ;;  %v3258_v36 = vpop.f32.mrb[11].mxu1 }
 0x11e   : > { %v4399_v37 = vadd.f32 %v3186_v35, %v3185_v31  ;;  %v4401_v38 = vadd.f32 %v3258_v36, %v3257_v32  ;;  %v3966_v31 = vld [vmem:[%s4035_s25 + $0x3c4] ss:$36 sps:$4 sm:$0xff]   ;;  %v3968_v32 = vld [vmem:[%s4035_s25 + $0x2f0] ss:$36 sps:$4 sm:$0xff]   ;;  %v1731_v35 = vadd.f32 %v4387_v21, %v4418_v55  ;;  %v1736_v21 = vadd.f32 %v4393_v29, %v4418_v55 }
 0x11f   : > { %2273 = vmatmul.mubr.bf16.gmra.mrb[116].mxu1 %v3949_v27  ;;  %3647 = vmatmul.mubr.bf16.gmra.mrb[116].mxu0 %v3950_v28 }
 0x120   : > { %2280 = vmatprep.mubr.bf16.mxu1 %v3951_v33  ;;  %3650 = vmatprep.mubr.bf16.mxu0 %v3953_v34 }
 0x122   : > { %v3188_v39 = vpop.f32.mrb[12].mxu0  ;;  %v3260_v40 = vpop.f32.mrb[12].mxu1 }
 0x123   : > { %v3189_v41 = vpop.f32.mrb[13].mxu0  ;;  %v3261_v42 = vpop.f32.mrb[13].mxu1 }
 0x124   : > { %v4405_v45 = vadd.f32 %v3189_v41, %v3188_v39  ;;  %v4407_v46 = vadd.f32 %v3261_v42, %v3260_v40  ;;  %v3191_v47 = vpop.f32.mrb[14].mxu0  ;;  %v3263_v48 = vpop.f32.mrb[14].mxu1 }
 0x125   : > { %v3192_v51 = vpop.f32.mrb[15].mxu0  ;;  %v3264_v52 = vpop.f32.mrb[15].mxu1 }
 0x126   : > { %v4411_v53 = vadd.f32 %v3192_v51, %v3191_v47  ;;  %v4413_v54 = vadd.f32 %v3264_v52, %v3263_v48  ;;  %v3969_v47 = vld [vmem:[%s4035_s25 + $0x3c0] ss:$36 sps:$4 sm:$0xff]   ;;  %v3970_v48 = vld [vmem:[%s4035_s25 + $0x338] ss:$36 sps:$4 sm:$0xff]  }
 0x127   : > { %2281 = vmatmul.mubr.bf16.gmra.mrb[120].mxu1 %v3954_v43  ;;  %3651 = vmatmul.mubr.bf16.gmra.mrb[120].mxu0 %v3955_v44 }
 0x128   : > { %2288 = vmatprep.mubr.bf16.mxu1 %v3956_v49  ;;  %3654 = vmatprep.mubr.bf16.mxu0 %v3958_v50 }
 0x12a   : > { %v3194_v56 = vpop.f32.mrb[16].mxu0  ;;  %v3282_v57 = vpop.f32.mrb[16].mxu1 }
 0x12b   : > { %v3195_v58 = vpop.f32.mrb[17].mxu0  ;;  %v3283_v59 = vpop.f32.mrb[17].mxu1 }
 0x12c   : > { %v4424_v1 = vadd.f32 %v3195_v58, %v3194_v56  ;;  %v3284_v2 = vadd.f32 %v3283_v59, %v3282_v57  ;;  %v3197_v3 = vpop.f32.mrb[18].mxu0  ;;  %v3285_v4 = vpop.f32.mrb[18].mxu1  ;;  %v3971_v56 = vld [vmem:[%s4035_s25 + $0x40c] ss:$36 sps:$4 sm:$0xff]   ;;  %v3973_v57 = vld [vmem:[%s4035_s25 + $0x380] ss:$36 sps:$4 sm:$0xff]  }
 0x12d   : > { %v3198_v9 = vpop.f32.mrb[19].mxu0  ;;  %v3286_v10 = vpop.f32.mrb[19].mxu1 }
 0x12e   : > { %v4430_v12 = vadd.f32 %v3284_v2, %v1720_v0  ;;  %v4432_v15 = vadd.f32 %v3198_v9, %v3197_v3  ;;  %v3287_v16 = vadd.f32 %v3286_v10, %v3285_v4  ;;  %v3974_v9 = vld [vmem:[%s4035_s25 + $0x408] ss:$36 sps:$4 sm:$0xff]  }
 0x12f   : > { %2289 = vmatmul.mubr.bf16.gmra.mrb[124].mxu1 %v3959_v60  ;;  %3655 = vmatmul.mubr.bf16.gmra.mrb[124].mxu0 %v3960_v63  ;;  %v1739_v60 = vadd.f32 %v4399_v37, %v4418_v55  ;;  %v3975_v10 = vld [vmem:[%s4035_s25 + $0x3c8] ss:$36 sps:$4 sm:$0xff]   ;;  %v1744_v37 = vadd.f32 %v4405_v45, %v4418_v55 }
 0x130   : > { %v4434_v61 = vadd.f32 %v3287_v16, %v1723_v11  ;;  %2296 = vmatprep.mubr.bf16.mxu1 %v3961_v7  ;;  %3658 = vmatprep.mubr.bf16.mxu0 %v3963_v8 }
 0x132   : > { %v3200_v17 = vpop.f32.mrb[20].mxu0  ;;  %v3288_v18 = vpop.f32.mrb[20].mxu1 }
 0x133   : > { %v3201_v19 = vpop.f32.mrb[21].mxu0  ;;  %v3289_v20 = vpop.f32.mrb[21].mxu1 }
 0x134   : > { %v4440_v25 = vadd.f32 %v3201_v19, %v3200_v17  ;;  %v3290_v26 = vadd.f32 %v3289_v20, %v3288_v18  ;;  %v3203_v27 = vpop.f32.mrb[22].mxu0  ;;  %v3291_v28 = vpop.f32.mrb[22].mxu1  ;;  %v3976_v19 = vld [vmem:[%s4035_s25 + $0x454] ss:$36 sps:$4 sm:$0xff]  }
 0x135   : > { %v3204_v33 = vpop.f32.mrb[23].mxu0  ;;  %v3292_v34 = vpop.f32.mrb[23].mxu1  ;;  %v3978_v20 = vld [vmem:[%s4035_s25 + $0x410] ss:$36 sps:$4 sm:$0xff]  }
 0x136   : > { %v4446_v36 = vadd.f32 %v3290_v26, %v1728_v5  ;;  %v4448_v39 = vadd.f32 %v3204_v33, %v3203_v27  ;;  %v3293_v40 = vadd.f32 %v3292_v34, %v3291_v28  ;;  %v1747_v5 = vadd.f32 %v4411_v53, %v4418_v55 }
 0x137   : > { %2297 = vmatmul.mubr.bf16.gmra.mrb[128].mxu1 %v3964_v23  ;;  %3659 = vmatmul.mubr.bf16.gmra.mrb[128].mxu0 %v3965_v24  ;;  %v1752_v53 = vadd.f32 %v4424_v1, %v4418_v55 }
 0x138   : > { %v4450_v13 = vadd.f32 %v3293_v40, %v1731_v35  ;;  %2304 = vmatprep.mubr.bf16.mxu1 %v3966_v31  ;;  %3662 = vmatprep.mubr.bf16.mxu0 %v3968_v32  ;;  %v3979_v35 = vld [vmem:[%s4035_s25 + $0x450] ss:$36 sps:$4 sm:$0xff]   ;;  %v3980_v40 = vld [vmem:[%s4035_s25 + $0x458] ss:$36 sps:$4 sm:$0xff]   ;;  %s3119_s25 = sshll.u32 %s4022_s16, 8 }
 0x13a   : > { %v3206_v41 = vpop.f32.mrb[24].mxu0  ;;  %v3294_v42 = vpop.f32.mrb[24].mxu1 }
 0x13b   : > { %v3207_v43 = vpop.f32.mrb[25].mxu0  ;;  %v3295_v44 = vpop.f32.mrb[25].mxu1 }
 0x13c   : > { %v4456_v49 = vadd.f32 %v3207_v43, %v3206_v41  ;;  %v3296_v50 = vadd.f32 %v3295_v44, %v3294_v42  ;;  %v3209_v51 = vpop.f32.mrb[26].mxu0  ;;  %v3297_v52 = vpop.f32.mrb[26].mxu1 }
 0x13d   : > { %v3210_v58 = vpop.f32.mrb[27].mxu0  ;;  %v3298_v59 = vpop.f32.mrb[27].mxu1 }
 0x13e   : > { %v4462_v63 = vadd.f32 %v3296_v50, %v1736_v21  ;;  %v4464_v0 = vadd.f32 %v3210_v58, %v3209_v51  ;;  %v3299_v2 = vadd.f32 %v3298_v59, %v3297_v52  ;;  %v1755_v21 = vadd.f32 %v4432_v15, %v4418_v55 }
 0x13f   : > { %2305 = vmatmul.mubr.bf16.gmra.mrb[132].mxu1 %v3969_v47  ;;  %3663 = vmatmul.mubr.bf16.gmra.mrb[132].mxu0 %v3970_v48 }
 0x140   : > { %v4466_v29 = vadd.f32 %v3299_v2, %v1739_v60  ;;  %2312 = vmatprep.mubr.bf16.mxu1 %v3971_v56  ;;  %3666 = vmatprep.mubr.bf16.mxu0 %v3973_v57  ;;  %v1760_v60 = vadd.f32 %v4440_v25, %v4418_v55 }
 0x142   : > { %v3212_v3 = vpop.f32.mrb[28].mxu0  ;;  %v3300_v4 = vpop.f32.mrb[28].mxu1 }
 0x143   : > { %v3213_v7 = vpop.f32.mrb[29].mxu0  ;;  %v3301_v8 = vpop.f32.mrb[29].mxu1 }
 0x144   : > { %v4472_v11 = vadd.f32 %v3213_v7, %v3212_v3  ;;  %v3302_v16 = vadd.f32 %v3301_v8, %v3300_v4  ;;  %v3215_v17 = vpop.f32.mrb[30].mxu0  ;;  %v3303_v18 = vpop.f32.mrb[30].mxu1 }
 0x145   : > { %v3216_v23 = vpop.f32.mrb[31].mxu0  ;;  %v3304_v24 = vpop.f32.mrb[31].mxu1 }
 0x146   : > { %v4478_v26 = vadd.f32 %v3302_v16, %v1744_v37  ;;  %v4480_v27 = vadd.f32 %v3216_v23, %v3215_v17  ;;  %v3305_v28 = vadd.f32 %v3304_v24, %v3303_v18  ;;  %v1768_v23 = vadd.f32 %v4456_v49, %v4418_v55 }
 0x147   : > { %2313 = vmatmul.mubr.bf16.gmra.mrb[136].mxu1 %v3974_v9  ;;  %3667 = vmatmul.mubr.bf16.gmra.mrb[136].mxu0 %v3975_v10  ;;  %v1763_v9 = vadd.f32 %v4448_v39, %v4418_v55 }
 0x148   : > { %v4482_v45 = vadd.f32 %v3305_v28, %v1747_v5  ;;  %2320 = vmatprep.mubr.bf16.mxu1 %v3976_v19  ;;  %3670 = vmatprep.mubr.bf16.mxu0 %v3978_v20 }
 0x14a   : > { %v3218_v31 = vpop.f32.mrb[32].mxu0  ;;  %v3306_v32 = vpop.f32.mrb[32].mxu1 }
 0x14b   : > { %v3219_v33 = vpop.f32.mrb[33].mxu0  ;;  %v3307_v34 = vpop.f32.mrb[33].mxu1 }
 0x14c   : > { %v4488_v41 = vadd.f32 %v3219_v33, %v3218_v31  ;;  %v3308_v42 = vadd.f32 %v3307_v34, %v3306_v32  ;;  %v3221_v43 = vpop.f32.mrb[34].mxu0  ;;  %v3309_v44 = vpop.f32.mrb[34].mxu1  ;;  %v1771_v33 = vadd.f32 %v4464_v0, %v4418_v55 }
 0x14d   : > { %v3222_v47 = vpop.f32.mrb[35].mxu0  ;;  %v3310_v48 = vpop.f32.mrb[35].mxu1 }
 0x14e   : > { %v4492_v50 = vadd.f32 %v3308_v42, %v1752_v53  ;;  %v3223_v51 = vadd.f32 %v3222_v47, %v3221_v43  ;;  %v3311_v52 = vadd.f32 %v3310_v48, %v3309_v44  ;;  %v1776_v47 = vadd.f32 %v4472_v11, %v4418_v55 }
 0x14f   : > { %2321 = vmatmul.mubr.bf16.gmra.mrb[140].mxu1 %v3979_v35  ;;  %3671 = vmatmul.mubr.bf16.gmra.mrb[140].mxu0 %v3980_v40 }
 0x150   : > { %v4494_v56 = vadd.f32 %v3311_v52, %v1755_v21 }
 0x152   : > { %v3224_v57 = vpop.f32.mrb[36].mxu0  ;;  %v3312_v1 = vpop.f32.mrb[36].mxu1 }
 0x153   : > { %v3225_v58 = vpop.f32.mrb[37].mxu0  ;;  %v3313_v59 = vpop.f32.mrb[37].mxu1 }
 0x154   : > { %v4498_v2 = vadd.f32 %v3225_v58, %v3224_v57  ;;  %v3314_v3 = vadd.f32 %v3313_v59, %v3312_v1  ;;  %v3227_v4 = vpop.f32.mrb[38].mxu0  ;;  %v3315_v15 = vpop.f32.mrb[38].mxu1  ;;  %v1779_v58 = vadd.f32 %v4480_v27, %v4418_v55  ;;  %v1787_v27 = vadd.f32 %v3223_v51, %v4418_v55 }
 0x155   : > { %v3228_v7 = vpop.f32.mrb[39].mxu0  ;;  %v3316_v8 = vpop.f32.mrb[39].mxu1 }
 0x156   : > { %v4502_v10 = vadd.f32 %v3314_v3, %v1760_v60  ;;  %v3229_v37 = vadd.f32 %v3228_v7, %v3227_v4  ;;  %v3317_v16 = vadd.f32 %v3316_v8, %v3315_v15  ;;  %v1792_v51 = vadd.f32 %v4498_v2, %v4418_v55 }
 0x158   : > { %v4504_v17 = vadd.f32 %v3317_v16, %v1763_v9  ;;  %v1784_v9 = vadd.f32 %v4488_v41, %v4418_v55 }
 0x15a   : > { %v3230_v18 = vpop.f32.mrb[40].mxu0  ;;  %v3318_v19 = vpop.f32.mrb[40].mxu1 }
 0x15b   : > { %v3231_v20 = vpop.f32.mrb[41].mxu0  ;;  %v3319_v25 = vpop.f32.mrb[41].mxu1 }
 0x15c   : > { %v4508_v24 = vadd.f32 %v3231_v20, %v3230_v18  ;;  %v3320_v5 = vadd.f32 %v3319_v25, %v3318_v19  ;;  %v3233_v28 = vpop.f32.mrb[42].mxu0  ;;  %v3321_v31 = vpop.f32.mrb[42].mxu1 }
 0x15d   : > { %v3234_v32 = vpop.f32.mrb[43].mxu0  ;;  %v3322_v39 = vpop.f32.mrb[43].mxu1 }
 0x15e   : > { %v4512_v34 = vadd.f32 %v3320_v5, %v1768_v23  ;;  %v4514_v35 = vadd.f32 %v3234_v32, %v3233_v28  ;;  %v3323_v40 = vadd.f32 %v3322_v39, %v3321_v31 }
 0x160   : > { %v4516_v53 = vadd.f32 %v3323_v40, %v1771_v33 }
 0x162   : > { %v3236_v42 = vpop.f32.mrb[44].mxu0  ;;  %v3324_v43 = vpop.f32.mrb[44].mxu1 }
 0x163   : > { %v3237_v49 = vpop.f32.mrb[45].mxu0  ;;  %v3325_v44 = vpop.f32.mrb[45].mxu1 }
 0x164   : > { %v4520_v48 = vadd.f32 %v3237_v49, %v3236_v42  ;;  %v3326_v21 = vadd.f32 %v3325_v44, %v3324_v43  ;;  %v3239_v52 = vpop.f32.mrb[46].mxu0  ;;  %v3327_v57 = vpop.f32.mrb[46].mxu1 }
 0x165   : > { %v3240_v0 = vpop.f32.mrb[47].mxu0  ;;  %v3328_v1 = vpop.f32.mrb[47].mxu1 }
 0x166   : > { %v4524_v59 = vadd.f32 %v3326_v21, %v1776_v47  ;;  %v4526_v60 = vadd.f32 %v3240_v0, %v3239_v52  ;;  %v3329_v3 = vadd.f32 %v3328_v1, %v3327_v57 }
 0x168   : > { %v4528_v4 = vadd.f32 %v3329_v3, %v1779_v58 }
 0x16a   : > { %v3330_v15 = vpop.f32.mrb[48].mxu1  ;;  %v3394_v7 = vpop.f32.mrb[48].mxu0 }
 0x16b   : > { %v3331_v11 = vpop.f32.mrb[49].mxu1  ;;  %v3395_v8 = vpop.f32.mrb[49].mxu0 }
 0x16c   : > { %v3332_v16 = vadd.f32 %v3331_v11, %v3330_v15  ;;  %v3396_v18 = vadd.f32 %v3395_v8, %v3394_v7  ;;  %v3333_v19 = vpop.f32.mrb[50].mxu1  ;;  %v3397_v20 = vpop.f32.mrb[50].mxu0 }
 0x16d   : > { %v3334_v25 = vpop.f32.mrb[51].mxu1  ;;  %v3398_v23 = vpop.f32.mrb[51].mxu0 }
 0x16e   : > { %v4533_v5 = vadd.f32 %v3332_v16, %v1784_v9  ;;  %v4536_v28 = vadd.f32 %v3396_v18, %v4430_v12  ;;  %v3335_v31 = vadd.f32 %v3334_v25, %v3333_v19  ;;  %v3399_v32 = vadd.f32 %v3398_v23, %v3397_v20 }
 0x16f   : > { %v1795_v12 = vadd.f32 %v3229_v37, %v4418_v55  ;;  %v1800_v37 = vadd.f32 %v4508_v24, %v4418_v55 }
 0x170   : > { %v4538_v39 = vadd.f32 %v3335_v31, %v1787_v27  ;;  %v4541_v33 = vadd.f32 %v3399_v32, %v4434_v61 }
 0x172   : > { %v3336_v41 = vpop.f32.mrb[52].mxu1  ;;  %v3400_v40 = vpop.f32.mrb[52].mxu0 }
 0x173   : > { %v3337_v42 = vpop.f32.mrb[53].mxu1  ;;  %v3401_v43 = vpop.f32.mrb[53].mxu0 }
 0x174   : > { %v3338_v49 = vadd.f32 %v3337_v42, %v3336_v41  ;;  %v3402_v44 = vadd.f32 %v3401_v43, %v3400_v40  ;;  %v3339_v47 = vpop.f32.mrb[54].mxu1  ;;  %v3403_v21 = vpop.f32.mrb[54].mxu0 }
 0x175   : > { %v3340_v52 = vpop.f32.mrb[55].mxu1  ;;  %v3404_v57 = vpop.f32.mrb[55].mxu0 }
 0x176   : > { %v4546_v0 = vadd.f32 %v3338_v49, %v1792_v51  ;;  %v4549_v61 = vadd.f32 %v3402_v44, %v4446_v36  ;;  %v3341_v1 = vadd.f32 %v3340_v52, %v3339_v47  ;;  %v3405_v58 = vadd.f32 %v3404_v57, %v3403_v21 }
 0x177   : > { %v1803_v36 = vadd.f32 %v4514_v35, %v4418_v55  ;;  %v1808_v35 = vadd.f32 %v4520_v48, %v4418_v55 }
 0x178   : > { %v4551_v3 = vadd.f32 %v3341_v1, %v1795_v12  ;;  %v4554_v15 = vadd.f32 %v3405_v58, %v4450_v13 }
 0x17a   : > { %v3342_v2 = vpop.f32.mrb[56].mxu1  ;;  %v3406_v7 = vpop.f32.mrb[56].mxu0 }
 0x17b   : > { %v3343_v11 = vpop.f32.mrb[57].mxu1  ;;  %v3407_v8 = vpop.f32.mrb[57].mxu0 }
 0x17c   : > { %v3344_v9 = vadd.f32 %v3343_v11, %v3342_v2  ;;  %v3408_v16 = vadd.f32 %v3407_v8, %v3406_v7  ;;  %v3345_v18 = vpop.f32.mrb[58].mxu1  ;;  %v3409_v19 = vpop.f32.mrb[58].mxu0 }
 0x17d   : > { %v3346_v20 = vpop.f32.mrb[59].mxu1  ;;  %v3410_v27 = vpop.f32.mrb[59].mxu0 }
 0x17e   : > { %v4560_v25 = vadd.f32 %v3344_v9, %v1800_v37  ;;  %v4563_v13 = vadd.f32 %v3408_v16, %v4462_v63  ;;  %v3347_v23 = vadd.f32 %v3346_v20, %v3345_v18  ;;  %v3411_v31 = vadd.f32 %v3410_v27, %v3409_v19 }
 0x17f   : > { %v1811_v63 = vadd.f32 %v4526_v60, %v4418_v55  ;;  %v1816_v60 = vadd.f32 %v4371_v62, %v4418_v55 }
 0x180   : > { %v4565_v32 = vadd.f32 %v3347_v23, %v1803_v36  ;;  %v4568_v24 = vadd.f32 %v3411_v31, %v4466_v29 }
 0x182   : > { %v3348_v41 = vpop.f32.mrb[60].mxu1  ;;  %v3412_v40 = vpop.f32.mrb[60].mxu0 }
 0x183   : > { %v3349_v42 = vpop.f32.mrb[61].mxu1  ;;  %v3413_v43 = vpop.f32.mrb[61].mxu0 }
 0x184   : > { %v3350_v51 = vadd.f32 %v3349_v42, %v3348_v41  ;;  %v3414_v49 = vadd.f32 %v3413_v43, %v3412_v40  ;;  %v3351_v44 = vpop.f32.mrb[62].mxu1  ;;  %v3415_v47 = vpop.f32.mrb[62].mxu0 }
 0x185   : > { %v3352_v21 = vpop.f32.mrb[63].mxu1  ;;  %v3416_v12 = vpop.f32.mrb[63].mxu0 }
 0x186   : > { %v4574_v52 = vadd.f32 %v3350_v51, %v1808_v35  ;;  %v4577_v29 = vadd.f32 %v3414_v49, %v4478_v26  ;;  %v3353_v57 = vadd.f32 %v3352_v21, %v3351_v44  ;;  %v3417_v1 = vadd.f32 %v3416_v12, %v3415_v47 }
 0x187   : > { %v1819_v26 = vadd.f32 %v4377_v6, %v4418_v55  ;;  %v1824_v6 = vadd.f32 %v4383_v14, %v4418_v55 }
 0x188   : > { %v4579_v58 = vadd.f32 %v3353_v57, %v1811_v63  ;;  %v4582_v48 = vadd.f32 %v3417_v1, %v4482_v45 }
 0x18a   : > { %v3354_v2 = vpop.f32.mrb[64].mxu1  ;;  %v3418_v7 = vpop.f32.mrb[64].mxu0 }
 0x18b   : > { %v3355_v11 = vpop.f32.mrb[65].mxu1  ;;  %v3419_v8 = vpop.f32.mrb[65].mxu0 }
 0x18c   : > { %v3356_v37 = vadd.f32 %v3355_v11, %v3354_v2  ;;  %v3420_v9 = vadd.f32 %v3419_v8, %v3418_v7  ;;  %v3357_v16 = vpop.f32.mrb[66].mxu1  ;;  %v3421_v18 = vpop.f32.mrb[66].mxu0 }
 0x18d   : > { %v3358_v19 = vpop.f32.mrb[67].mxu1  ;;  %v3422_v36 = vpop.f32.mrb[67].mxu0 }
 0x18e   : > { %v4588_v20 = vadd.f32 %v3356_v37, %v1816_v60  ;;  %v4591_v45 = vadd.f32 %v3420_v9, %v4492_v50  ;;  %v3359_v27 = vadd.f32 %v3358_v19, %v3357_v16  ;;  %v3423_v23 = vadd.f32 %v3422_v36, %v3421_v18 }
 0x18f   : > { %v1827_v50 = vadd.f32 %v4389_v22, %v4418_v55  ;;  %v1832_v22 = vadd.f32 %v4395_v30, %v4418_v55 }
 0x190   : > { %v4593_v31 = vadd.f32 %v3359_v27, %v1819_v26  ;;  %v4596_v62 = vadd.f32 %v3423_v23, %v4494_v56 }
 0x192   : > { %v3360_v41 = vpop.f32.mrb[68].mxu1  ;;  %v3424_v40 = vpop.f32.mrb[68].mxu0 }
 0x193   : > { %v3361_v42 = vpop.f32.mrb[69].mxu1  ;;  %v3425_v43 = vpop.f32.mrb[69].mxu0 }
 0x194   : > { %v3362_v35 = vadd.f32 %v3361_v42, %v3360_v41  ;;  %v3426_v51 = vadd.f32 %v3425_v43, %v3424_v40  ;;  %v3363_v49 = vpop.f32.mrb[70].mxu1  ;;  %v3427_v44 = vpop.f32.mrb[70].mxu0 }
 0x195   : > { %v3364_v47 = vpop.f32.mrb[71].mxu1  ;;  %v3428_v63 = vpop.f32.mrb[71].mxu0 }
 0x196   : > { %v4602_v21 = vadd.f32 %v3362_v35, %v1824_v6  ;;  %v4605_v56 = vadd.f32 %v3426_v51, %v4502_v10  ;;  %v3365_v12 = vadd.f32 %v3364_v47, %v3363_v49  ;;  %v3429_v57 = vadd.f32 %v3428_v63, %v3427_v44 }
 0x197   : > { %v1835_v10 = vadd.f32 %v4401_v38, %v4418_v55  ;;  %v1840_v38 = vadd.f32 %v4407_v46, %v4418_v55 }
 0x198   : > { %v4607_v1 = vadd.f32 %v3365_v12, %v1827_v50  ;;  %v4610_v14 = vadd.f32 %v3429_v57, %v4504_v17 }
 0x19a   : > { %v3366_v2 = vpop.f32.mrb[72].mxu1  ;;  %v3430_v7 = vpop.f32.mrb[72].mxu0 }
 0x19b   : > { %v3367_v11 = vpop.f32.mrb[73].mxu1  ;;  %v3431_v8 = vpop.f32.mrb[73].mxu0 }
 0x19c   : > { %v3368_v60 = vadd.f32 %v3367_v11, %v3366_v2  ;;  %v3432_v37 = vadd.f32 %v3431_v8, %v3430_v7  ;;  %v3369_v9 = vpop.f32.mrb[74].mxu1  ;;  %v3433_v16 = vpop.f32.mrb[74].mxu0 }
 0x19d   : > { %v3370_v18 = vpop.f32.mrb[75].mxu1  ;;  %v3434_v26 = vpop.f32.mrb[75].mxu0 }
 0x19e   : > { %v4616_v19 = vadd.f32 %v3368_v60, %v1832_v22  ;;  %v4619_v17 = vadd.f32 %v3432_v37, %v4512_v34  ;;  %v3371_v36 = vadd.f32 %v3370_v18, %v3369_v9  ;;  %v3435_v27 = vadd.f32 %v3434_v26, %v3433_v16 }
 0x19f   : > { %v1843_v34 = vadd.f32 %v4413_v54, %v4418_v55 }
 0x1a0   : > { %v4621_v23 = vadd.f32 %v3371_v36, %v1835_v10  ;;  %v4624_v30 = vadd.f32 %v3435_v27, %v4516_v53 }
 0x1a2   : > { %v3372_v41 = vpop.f32.mrb[76].mxu1  ;;  %v3436_v40 = vpop.f32.mrb[76].mxu0 }
 0x1a3   : > { %v3373_v42 = vpop.f32.mrb[77].mxu1  ;;  %v3437_v43 = vpop.f32.mrb[77].mxu0 }
 0x1a4   : > { %v3374_v6 = vadd.f32 %v3373_v42, %v3372_v41  ;;  %v3438_v35 = vadd.f32 %v3437_v43, %v3436_v40  ;;  %v3375_v51 = vpop.f32.mrb[78].mxu1  ;;  %v3439_v49 = vpop.f32.mrb[78].mxu0 }
 0x1a5   : > { %v3376_v44 = vpop.f32.mrb[79].mxu1  ;;  %v3440_v50 = vpop.f32.mrb[79].mxu0 }
 0x1a6   : > { %v4630_v47 = vadd.f32 %v3374_v6, %v1840_v38  ;;  %v4633_v53 = vadd.f32 %v3438_v35, %v4524_v59  ;;  %v3377_v63 = vadd.f32 %v3376_v44, %v3375_v51  ;;  %v3441_v12 = vadd.f32 %v3440_v50, %v3439_v49 }
 0x1a8   : > { %v4635_v57 = vadd.f32 %v3377_v63, %v1843_v34  ;;  %v4638_v46 = vadd.f32 %v3441_v12, %v4528_v4 }
 0x1aa   : > { %v3442_v2 = vpop.f32.mrb[80].mxu0  ;;  %v3506_v7 = vpop.f32.mrb[80].mxu1 }
 0x1ab   : > { %v3443_v11 = vpop.f32.mrb[81].mxu0  ;;  %v3507_v8 = vpop.f32.mrb[81].mxu1 }
 0x1ac   : > { %v3444_v22 = vadd.f32 %v3443_v11, %v3442_v2  ;;  %v3508_v54 = vadd.f32 %v3507_v8, %v3506_v7  ;;  %v3445_v55 = vpop.f32.mrb[82].mxu0  ;;  %v3509_v60 = vpop.f32.mrb[82].mxu1 }
 0x1ad   : > { %v3446_v37 = vpop.f32.mrb[83].mxu0  ;;  %v3510_v9 = vpop.f32.mrb[83].mxu1 }
 0x1ae   : > { %v4641_v59 = vadd.f32 %v3444_v22, %v4533_v5  ;;  %v3447_v16 = vadd.f32 %v3446_v37, %v3445_v55  ;;  %v3511_v10 = vadd.f32 %v3510_v9, %v3509_v60  ;;  %v4644_v18 = vadd.f32 %v3508_v54, %v4536_v28 }
 0x1b0   : > { %v4647_v4 = vadd.f32 %v3447_v16, %v4538_v39  ;;  %v4650_v26 = vadd.f32 %v3511_v10, %v4541_v33 }
 0x1b2   : > { %v3448_v36 = vpop.f32.mrb[84].mxu0  ;;  %v3512_v27 = vpop.f32.mrb[84].mxu1 }
 0x1b3   : > { %v3449_v41 = vpop.f32.mrb[85].mxu0  ;;  %v3513_v40 = vpop.f32.mrb[85].mxu1 }
 0x1b4   : > { %v3450_v42 = vadd.f32 %v3449_v41, %v3448_v36  ;;  %v3514_v43 = vadd.f32 %v3513_v40, %v3512_v27  ;;  %v3451_v38 = vpop.f32.mrb[86].mxu0  ;;  %v3515_v5 = vpop.f32.mrb[86].mxu1 }
 0x1b5   : > { %v3452_v6 = vpop.f32.mrb[87].mxu0  ;;  %v3516_v35 = vpop.f32.mrb[87].mxu1 }
 0x1b6   : > { %v4653_v51 = vadd.f32 %v3450_v42, %v4546_v0  ;;  %v3453_v28 = vadd.f32 %v3452_v6, %v3451_v38  ;;  %v3517_v49 = vadd.f32 %v3516_v35, %v3515_v5  ;;  %v4656_v39 = vadd.f32 %v3514_v43, %v4549_v61 }
 0x1b7   : > { %v2523_v5 = vlaneseq }
 0x1b8   : > { %v4659_v33 = vadd.f32 %v3453_v28, %v4551_v3  ;;  %v4662_v34 = vadd.f32 %v3517_v49, %v4554_v15 }
 0x1ba   : > { %v3454_v44 = vpop.f32.mrb[88].mxu0  ;;  %v3518_v50 = vpop.f32.mrb[88].mxu1 }
 0x1bb   : > { %v3455_v63 = vpop.f32.mrb[89].mxu0  ;;  %v3519_v12 = vpop.f32.mrb[89].mxu1 }
 0x1bc   : > { %v3456_v2 = vadd.f32 %v3455_v63, %v3454_v44  ;;  %v3520_v7 = vadd.f32 %v3519_v12, %v3518_v50  ;;  %v3457_v11 = vpop.f32.mrb[90].mxu0  ;;  %v3521_v0 = vpop.f32.mrb[90].mxu1 }
 0x1bd   : > { %v3458_v8 = vpop.f32.mrb[91].mxu0  ;;  %v3522_v22 = vpop.f32.mrb[91].mxu1 }
 0x1be   : > { %v4665_v54 = vadd.f32 %v3456_v2, %v4560_v25  ;;  %v3459_v61 = vadd.f32 %v3458_v8, %v3457_v11  ;;  %v3523_v55 = vadd.f32 %v3522_v22, %v3521_v0  ;;  %v4668_v3 = vadd.f32 %v3520_v7, %v4563_v13 }
 0x1bf   : > { %v4688_v2 = vshrl.u32 %v2523_v5, 7 }
 0x1c0   : > { %v4671_v15 = vadd.f32 %v3459_v61, %v4565_v32  ;;  %v4674_v60 = vadd.f32 %v3523_v55, %v4568_v24  ;;  %v4704_v55 = vstv %s3119_s25 }
 0x1c1   : > { %v2526_v22 = vadd.s32 16, %v4688_v2  ;;  %v2527_v5 = vadd.s32 24, %v4688_v2 }
 0x1c2   : > { %v3460_v37 = vpop.f32.mrb[92].mxu0  ;;  %v3524_v9 = vpop.f32.mrb[92].mxu1 }
 0x1c3   : > { %v3461_v16 = vpop.f32.mrb[93].mxu0  ;;  %v3525_v10 = vpop.f32.mrb[93].mxu1 }
 0x1c4   : > { %v3462_v36 = vadd.f32 %v3461_v16, %v3460_v37  ;;  %v3526_v27 = vadd.f32 %v3525_v10, %v3524_v9  ;;  %v3463_v41 = vpop.f32.mrb[94].mxu0  ;;  %v3527_v25 = vpop.f32.mrb[94].mxu1 }
 0x1c5   : > { %v3464_v40 = vpop.f32.mrb[95].mxu0  ;;  %v3528_v42 = vpop.f32.mrb[95].mxu1 }
 0x1c6   : > { %v4677_v43 = vadd.f32 %v3462_v36, %v4574_v52  ;;  %v3465_v13 = vadd.f32 %v3464_v40, %v3463_v41  ;;  %v3529_v38 = vadd.f32 %v3528_v42, %v3527_v25  ;;  %v4680_v32 = vadd.f32 %v3526_v27, %v4577_v29 }
 0x1c8   : > { %v4683_v24 = vadd.f32 %v3465_v13, %v4579_v58  ;;  %v4686_v6 = vadd.f32 %v3529_v38, %v4582_v48  ;;  %v2557_v38 = vadd.s32 %v4704_v55, %v4688_v2 }
 0x1ca   : > { %v3466_v35 = vpop.f32.mrb[96].mxu0  ;;  %v3530_v28 = vpop.f32.mrb[96].mxu1  ;;  %vm2589_vm1 = vcmp.lt.s32.totalorder %v2557_v38, 512 }
 0x1cb   : > { %v3467_v49 = vpop.f32.mrb[97].mxu0  ;;  %v3531_v44 = vpop.f32.mrb[97].mxu1 }
 0x1cc   : > { %v3468_v50 = vadd.f32 %v3467_v49, %v3466_v35  ;;  %v3532_v52 = vadd.f32 %v3531_v44, %v3530_v28  ;;  %v3469_v63 = vpop.f32.mrb[98].mxu0  ;;  %v3533_v12 = vpop.f32.mrb[98].mxu1  ;;  %v2525_v35 = vadd.s32 8, %v4688_v2  ;;  %v2530_v28 = vadd.s32 48, %v4688_v2 }
 0x1cd   : > { %v3470_v29 = vpop.f32.mrb[99].mxu0  ;;  %v3534_v7 = vpop.f32.mrb[99].mxu1  ;;  %v2528_v44 = vadd.s32 32, %v4688_v2 }
 0x1ce   : > { %v4691_v58 = vadd.f32 %v3468_v50, %v4588_v20  ;;  %v3471_v11 = vadd.f32 %v3470_v29, %v3469_v63  ;;  %v3535_v0 = vadd.f32 %v3534_v7, %v3533_v12  ;;  %v4695_v48 = vadd.f32 %v3532_v52, %v4591_v45 }
 0x1cf   : > { %v2559_v45 = vadd.s32 %v4704_v55, %v2526_v22  ;;  %v5069_v12 = vmov 0.0   ;;  %v2560_v7 = vadd.s32 %v4704_v55, %v2527_v5 }
 0x1d0   : > { %v4698_v8 = vadd.f32 %v3471_v11, %v4593_v31  ;;  %v4702_v61 = vadd.f32 %v3535_v0, %v4596_v62  ;;  %v2558_v11 = vadd.s32 %v4704_v55, %v2525_v35  ;;  %v4748_v35 = vsel %vm2589_vm1, 1.0, %v5069_v12 }
 0x1d1   : > { %vm2591_vm0 = vcmp.lt.s32.totalorder %v2559_v45, 512  ;;  %vm2592_vm2 = vcmp.lt.s32.totalorder %v2560_v7, 512 }
 0x1d2   : > { %v3472_v37 = vpop.f32.mrb[100].mxu0  ;;  %v3536_v9 = vpop.f32.mrb[100].mxu1  ;;  %v4726_v29 = vsel %vm2591_vm0, 1.0, %v5069_v12  ;;  %vm2590_vm3 = vcmp.lt.s32.totalorder %v2558_v11, 512 }
 0x1d3   : > { %v3473_v20 = vpop.f32.mrb[101].mxu0  ;;  %v3537_v16 = vpop.f32.mrb[101].mxu1  ;;  %v4762_v38 = vsel %vm2590_vm3, 1.0, %v5069_v12 }
 0x1d4   : > { %v3474_v10 = vadd.f32 %v3473_v20, %v3472_v37  ;;  %v3538_v36 = vadd.f32 %v3537_v16, %v3536_v9  ;;  %v3475_v27 = vpop.f32.mrb[102].mxu0  ;;  %v3539_v41 = vpop.f32.mrb[102].mxu1  ;;  %v2531_v9 = vadd.s32 56, %v4688_v2 }
 0x1d5   : > { %v3476_v25 = vpop.f32.mrb[103].mxu0  ;;  %v3540_v31 = vpop.f32.mrb[103].mxu1 }
 0x1d6   : > { %v4708_v40 = vadd.f32 %v3474_v10, %v4602_v21  ;;  %v3477_v42 = vadd.f32 %v3476_v25, %v3475_v27  ;;  %v3541_v62 = vadd.f32 %v3540_v31, %v3539_v41  ;;  %v4711_v13 = vadd.f32 %v3538_v36, %v4605_v56 }
 0x1d7   : > { %v2561_v10 = vadd.s32 %v4704_v55, %v2528_v44  ;;  %v2529_v36 = vadd.s32 40, %v4688_v2  ;;  %v2534_v27 = vadd.s32 80, %v4688_v2  ;;  %v2532_v41 = vadd.s32 64, %v4688_v2 }
 0x1d8   : > { %5071 = vst [vmem:[#allocation2_spill] sm:$0xff] %v4708_v40  ;;  %v4719_v49 = vadd.f32 %v3477_v42, %v4607_v1  ;;  %v4722_v21 = vadd.f32 %v3541_v62, %v4610_v14  ;;  %v2563_v1 = vadd.s32 %v4704_v55, %v2530_v28  ;;  %v2535_v62 = vadd.s32 88, %v4688_v2 }
 0x1d9   : > { %v2567_v44 = vadd.s32 %v4704_v55, %v2534_v27  ;;  %vm2593_vm5 = vcmp.lt.s32.totalorder %v2561_v10, 512 }
 0x1da   : > { %5072 = vst [vmem:[#allocation3_spill] sm:$0xff] %v4719_v49  ;;  %v3478_v56 = vpop.f32.mrb[104].mxu0  ;;  %v3542_v50 = vpop.f32.mrb[104].mxu1  ;;  %vm2595_vm4 = vcmp.lt.s32.totalorder %v2563_v1, 512  ;;  %v2568_v1 = vadd.s32 %v4704_v55, %v2535_v62 }
 0x1db   : > { %v3479_v52 = vpop.f32.mrb[105].mxu0  ;;  %v3543_v63 = vpop.f32.mrb[105].mxu1  ;;  %v4765_v7 = vsel %vm2595_vm4, 1.0, %v5069_v12  ;;  %vm2599_vm8 = vcmp.lt.s32.totalorder %v2567_v44, 512 }
 0x1dc   : > { %v3480_v0 = vadd.f32 %v3479_v52, %v3478_v56  ;;  %v3544_v22 = vadd.f32 %v3543_v63, %v3542_v50  ;;  %v3481_v14 = vpop.f32.mrb[106].mxu0  ;;  %v3545_v37 = vpop.f32.mrb[106].mxu1  ;;  %v2565_v56 = vadd.s32 %v4704_v55, %v2532_v41  ;;  %v2533_v50 = vadd.s32 72, %v4688_v2 }
 0x1dd   : > { %v3482_v20 = vpop.f32.mrb[107].mxu0  ;;  %v3546_v16 = vpop.f32.mrb[107].mxu1  ;;  %v4759_v63 = vsel %vm2592_vm2, 1.0, %v5069_v12  ;;  %vm2600_vm10 = vcmp.lt.s32.totalorder %v2568_v1, 512 }
 0x1de   : > { %v4737_v45 = vadd.f32 %v3480_v0, %v4616_v19  ;;  %v3483_v25 = vadd.f32 %v3482_v20, %v3481_v14  ;;  %v3547_v31 = vadd.f32 %v3546_v16, %v3545_v37  ;;  %v4740_v42 = vadd.f32 %v3544_v22, %v4619_v17 }
 0x1df   : > { %v2564_v19 = vadd.s32 %v4704_v55, %v2531_v9  ;;  %v2562_v17 = vadd.s32 %v4704_v55, %v2529_v36  ;;  %v2538_v0 = vadd.s32 112, %v4688_v2  ;;  %v2536_v22 = vadd.s32 96, %v4688_v2 }
 0x1e0   : > { %5073 = vst [vmem:[#allocation4_spill] sm:$0xff] %v4737_v45  ;;  %v4744_v5 = vadd.f32 %v3483_v25, %v4621_v23  ;;  %v4752_v28 = vadd.f32 %v3547_v31, %v4624_v30  ;;  %v2539_v14 = vadd.s32 120, %v4688_v2  ;;  %v2537_v36 = vadd.s32 104, %v4688_v2 }
 0x1e1   : > { %vm2596_vm6 = vcmp.lt.s32.totalorder %v2564_v19, 512  ;;  %vm2594_vm7 = vcmp.lt.s32.totalorder %v2562_v17, 512  ;;  %vm2597_vm9 = vcmp.lt.s32.totalorder %v2565_v56, 512  ;;  %v2566_v25 = vadd.s32 %v4704_v55, %v2533_v50 }
 0x1e2   : > { %5074 = vst [vmem:[#allocation5_spill] sm:$0xff] %v4744_v5  ;;  %v3484_v52 = vpop.f32.mrb[108].mxu0  ;;  %v3548_v23 = vpop.f32.mrb[108].mxu1 }
 0x1e3   : > { %v3485_v30 = vpop.f32.mrb[109].mxu0  ;;  %v3549_v11 = vpop.f32.mrb[109].mxu1  ;;  %vm2598_vm11 = vcmp.lt.s32.totalorder %v2566_v25, 512 }
 0x1e4   : > { %v3486_v37 = vadd.f32 %v3485_v30, %v3484_v52  ;;  %v3550_v9 = vadd.f32 %v3549_v11, %v3548_v23  ;;  %v3487_v20 = vpop.f32.mrb[110].mxu0  ;;  %v3551_v16 = vpop.f32.mrb[110].mxu1  ;;  %v2571_v23 = vadd.s32 %v4704_v55, %v2538_v0  ;;  %v2569_v30 = vadd.s32 %v4704_v55, %v2536_v22 }
 0x1e5   : > { %v3488_v27 = vpop.f32.mrb[111].mxu0  ;;  %v3552_v41 = vpop.f32.mrb[111].mxu1  ;;  %v2572_v11 = vadd.s32 %v4704_v55, %v2539_v14 }
 0x1e6   : > { %v4774_v31 = vadd.f32 %v3486_v37, %v4630_v47  ;;  %v3489_v62 = vadd.f32 %v3488_v27, %v3487_v20  ;;  %v3553_v12 = vadd.f32 %v3552_v41, %v3551_v16  ;;  %v4777_v52 = vadd.f32 %v3550_v9, %v4633_v53 }
 0x1e7   : > { %v2570_v47 = vadd.s32 %v4704_v55, %v2537_v36  ;;  %v2542_v37 = vadd.s32 144, %v4688_v2  ;;  %v5077_v20 = vmov 0.0   ;;  %vm2603_vm12 = vcmp.lt.s32.totalorder %v2571_v23, 512 }
 0x1e8   : > { %5075 = vst [vmem:[#allocation6_spill] sm:$0xff] %v4774_v31  ;;  %v4783_v5 = vadd.f32 %v3489_v62, %v4635_v57  ;;  %v4786_v50 = vadd.f32 %v3553_v12, %v4638_v46  ;;  %v4792_v53 = vsel %vm2593_vm5, 1.0, %v5077_v20  ;;  %v4796_v0 = vsel %vm2596_vm6, 1.0, %v5077_v20 }
 0x1e9   : > { %v4800_v22 = vsel %vm2594_vm7, 1.0, %v5077_v20  ;;  %v2540_v57 = vadd.s32 128, %v4688_v2  ;;  %v4805_v14 = vsel %vm2599_vm8, 1.0, %v5077_v20  ;;  %v4809_v10 = vsel %vm2597_vm9, 1.0, %v5077_v20 }
 0x1ea   : > { %5076 = vst [vmem:[#allocation7_spill] sm:$0xff] %v4783_v5  ;;  %v3554_v46 = vpop.f32.mrb[112].mxu1  ;;  %v3644_v12 = vpop.f32.mrb[112].mxu0  ;;  %v4813_v19 = vsel %vm2600_vm10, 1.0, %v5077_v20  ;;  %vm2601_vm13 = vcmp.lt.s32.totalorder %v2569_v30, 512  ;;  %vm2604_vm14 = vcmp.lt.s32.totalorder %v2572_v11, 512  ;;  %v2575_v1 = vadd.s32 %v4704_v55, %v2542_v37 }
 0x1eb   : > { %v2372_v17 = vadd.f32 %v3644_v12, %v4656_v39  ;;  %v3555_v9 = vpop.f32.mrb[113].mxu1  ;;  %v2363_v16 = vpop.f32.mrb[113].mxu0  ;;  %vm2602_vm15 = vcmp.lt.s32.totalorder %v2570_v47, 512  ;;  %v4821_v12 = vadd.s32 %v4704_v55, %v2540_v57  ;;  %v2543_v5 = vadd.s32 152, %v4688_v2 }
 0x1ec   : > { %v3556_v44 = vadd.f32 %v3555_v9, %v3554_v46  ;;  %v2364_v36 = vadd.f32 %v2363_v16, %v4644_v18  ;;  %v3557_v56 = vpop.f32.mrb[114].mxu1  ;;  %v3645_v27 = vpop.f32.mrb[114].mxu0  ;;  %v2541_v46 = vadd.s32 136, %v4688_v2  ;;  %v4835_v57 = vsel %vm2598_vm11, 1.0, %v5077_v20 }
 0x1ed   : > { %2492 = vst [vmem:[%s4030_s22 + $0x10] sm:$0xff] %v2372_v17  ;;  %v2375_v41 = vadd.f32 %v3645_v27, %v4662_v34  ;;  %v3558_v39 = vpop.f32.mrb[115].mxu1  ;;  %v2366_v62 = vpop.f32.mrb[115].mxu0  ;;  %v2687_v34 = vmul.f32 %v4726_v29, %v2372_v17  ;;  %v4839_v27 = vsel %vm2603_vm12, 1.0, %v5077_v20  ;;  %vm2607_vm0 = vcmp.lt.s32.totalorder %v2575_v1, 512 }
 0x1ee   : > { %2490 = vst [vmem:[%s4030_s22] sm:$0xff] %v2364_v36  ;;  %v2685_v18 = vmul.f32 %v4748_v35, %v2364_v36  ;;  %v3559_v9 = vadd.f32 %v3558_v39, %v3557_v56  ;;  %v2367_v16 = vadd.f32 %v2366_v62, %v4650_v26  ;;  %v4829_v37 = vadd.f32 %v3556_v44, %v4641_v59 }
 0x1ef   : > { %2493 = vst [vmem:[%s4030_s22 + $0x18] sm:$0xff] %v2375_v41  ;;  %v4843_v35 = vsel %vm2601_vm13, 1.0, %v5077_v20  ;;  %v4849_v59 = vsel %vm2604_vm14, 1.0, %v5077_v20  ;;  %v2688_v25 = vmul.f32 %v4759_v63, %v2375_v41  ;;  %v4857_v23 = vsel %vm2602_vm15, 1.0, %v5077_v20 }
 0x1f0   : > { %2491 = vst [vmem:[%s4030_s22 + $0x8] sm:$0xff] %v2367_v16  ;;  %v2686_v26 = vmul.f32 %v4762_v38, %v2367_v16  ;;  %v4852_v29 = vadd.f32 %v3559_v9, %v4647_v4  ;;  %vm2605_vm1 = vcmp.lt.s32.totalorder %v4821_v12, 512  ;;  %v2576_v30 = vadd.s32 %v4704_v55, %v2543_v5 }
 0x1f1   : > { %v2754_v44 = vmul.f32 %v2685_v18, %v2364_v36  ;;  %v4862_v62 = vadd.s32 %v4704_v55, %v2541_v46  ;;  %v2756_v4 = vmul.f32 %v2687_v34, %v2372_v17  ;;  %v4867_v31 = vsel %vm2607_vm0, 1.0, %v5077_v20 }
 0x1f2   : > { %v2717_v38 = vadd.f32 %v2686_v26, %v2685_v18  ;;  %v2755_v56 = vmul.f32 %v2686_v26, %v2367_v16  ;;  %v3560_v11 = vpop.f32.mrb[116].mxu1  ;;  %v3648_v39 = vpop.f32.mrb[116].mxu0  ;;  %v2546_v5 = vadd.s32 176, %v4688_v2  ;;  %v2757_v17 = vmul.f32 %v2688_v25, %v2375_v41 }
 0x1f3   : > { %v2388_v63 = vadd.f32 %v3648_v39, %v4680_v32  ;;  %v3561_v9 = vpop.f32.mrb[117].mxu1  ;;  %v2379_v47 = vpop.f32.mrb[117].mxu0  ;;  %vm2608_vm2 = vcmp.lt.s32.totalorder %v2576_v30, 512  ;;  %v2544_v1 = vadd.s32 160, %v4688_v2  ;;  %vm2606_vm3 = vcmp.lt.s32.totalorder %v4862_v62, 512 }
 0x1f4   : > { %v2718_v36 = vadd.f32 %v2717_v38, %v2687_v34  ;;  %v2786_v18 = vadd.f32 %v2755_v56, %v2754_v44  ;;  %v3562_v16 = vadd.f32 %v3561_v9, %v3560_v11  ;;  %v2380_v26 = vadd.f32 %v2379_v47, %v4668_v3  ;;  %v3563_v46 = vpop.f32.mrb[118].mxu1  ;;  %v3649_v45 = vpop.f32.mrb[118].mxu0 }
 0x1f5   : > { %2496 = vst [vmem:[%s4030_s22 + $0x30] sm:$0xff] %v2388_v63  ;;  %v2391_v32 = vadd.f32 %v3649_v45, %v4686_v6  ;;  %v3564_v39 = vpop.f32.mrb[119].mxu1  ;;  %v2382_v49 = vpop.f32.mrb[119].mxu0  ;;  %v2579_v6 = vadd.s32 %v4704_v55, %v2546_v5  ;;  %v2547_v45 = vadd.s32 184, %v4688_v2  ;;  %vm2823_vm0 = vcmask 1040384  }
 0x1f6   : > { %v2787_v40 = vadd.f32 %v2786_v18, %v2756_v4  ;;  %2494 = vst [vmem:[%s4030_s22 + $0x20] sm:$0xff] %v2380_v26  ;;  %v2689_v34 = vmul.f32 %v4792_v53, %v2380_v26  ;;  %v2719_v44 = vadd.f32 %v2718_v36, %v2688_v25  ;;  %v3565_v38 = vadd.f32 %v3564_v39, %v3563_v46 }
 0x1f7   : > { %2497 = vst [vmem:[%s4030_s22 + $0x38] sm:$0xff] %v2391_v32  ;;  %v2383_v3 = vadd.f32 %v2382_v49, %v4674_v60  ;;  %v4879_v41 = vadd.f32 %v3562_v16, %v4653_v51  ;;  %v2691_v53 = vmul.f32 %v4765_v7, %v2388_v63  ;;  %v4892_v51 = vsel %vm2605_vm1, 1.0, %v5077_v20 }
 0x1f8   : > { %v2720_v56 = vadd.f32 %v2719_v44, %v2689_v34  ;;  %v2758_v11 = vmul.f32 %v2689_v34, %v2380_v26  ;;  %v2788_v9 = vadd.f32 %v2787_v40, %v2757_v17  ;;  %v4884_v4 = vadd.f32 %v3565_v38, %v4659_v33 }
 0x1f9   : > { %2495 = vst [vmem:[%s4030_s22 + $0x28] sm:$0xff] %v2383_v3  ;;  %v2690_v25 = vmul.f32 %v4800_v22, %v2383_v3  ;;  %v4897_v40 = vsel %vm2608_vm2, 1.0, %v5077_v20  ;;  %v2577_v33 = vadd.s32 %v4704_v55, %v2544_v1  ;;  %v2545_v7 = vadd.s32 168, %v4688_v2 }
 0x1fa   : > { %v2789_v60 = vadd.f32 %v2788_v9, %v2758_v11  ;;  %v3566_v49 = vpop.f32.mrb[120].mxu1  ;;  %v3652_v47 = vpop.f32.mrb[120].mxu0  ;;  %v2692_v22 = vmul.f32 %v4796_v0, %v2391_v32  ;;  %vm2611_vm4 = vcmp.lt.s32.totalorder %v2579_v6, 512  ;;  %v4905_v39 = vadd.s32 %v4704_v55, %v2547_v45 }
 0x1fb   : > { %v2721_v5 = vadd.f32 %v2720_v56, %v2690_v25  ;;  %v2759_v12 = vmul.f32 %v2690_v25, %v2383_v3  ;;  %v2404_v36 = vadd.f32 %v3652_v47, %v4711_v13  ;;  %v3567_v18 = vpop.f32.mrb[121].mxu1  ;;  %v2395_v16 = vpop.f32.mrb[121].mxu0  ;;  %v2760_v1 = vmul.f32 %v2691_v53, %v2388_v63 }
 0x1fc   : > { %v3568_v26 = vadd.f32 %v3567_v18, %v3566_v49  ;;  %v2396_v46 = vadd.f32 %v2395_v16, %v4695_v48  ;;  %v3569_v30 = vpop.f32.mrb[122].mxu1  ;;  %v3653_v17 = vpop.f32.mrb[122].mxu0  ;;  %v2761_v45 = vmul.f32 %v2692_v22, %v2391_v32  ;;  %vm2609_vm5 = vcmp.lt.s32.totalorder %v2577_v33, 512 }
 0x1fd   : > { %v2722_v34 = vadd.f32 %v2721_v5, %v2691_v53  ;;  %v2790_v0 = vadd.f32 %v2789_v60, %v2759_v12  ;;  %2500 = vst [vmem:[%s4030_s22 + $0x50] sm:$0xff] %v2404_v36  ;;  %v2407_v13 = vadd.f32 %v3653_v17, %v4722_v21  ;;  %v3570_v44 = vpop.f32.mrb[123].mxu1  ;;  %v2398_v38 = vpop.f32.mrb[123].mxu0  ;;  %v4921_v25 = vsel %vm2606_vm3, 1.0, %v5077_v20 }
 0x1fe   : > { %2498 = vst [vmem:[%s4030_s22 + $0x40] sm:$0xff] %v2396_v46  ;;  %v2693_v3 = vmul.f32 %v4809_v10, %v2396_v46  ;;  %v3571_v48 = vadd.f32 %v3570_v44, %v3569_v30  ;;  %v2399_v56 = vadd.f32 %v2398_v38, %v4702_v61  ;;  %v4913_v11 = vadd.f32 %v3568_v26, %v4665_v54 }
 0x1ff   : > { %v2791_v9 = vadd.f32 %v2790_v0, %v2760_v1  ;;  %v2723_v63 = vadd.f32 %v2722_v34, %v2692_v22  ;;  %2501 = vst [vmem:[%s4030_s22 + $0x58] sm:$0xff] %v2407_v13  ;;  %v2695_v54 = vmul.f32 %v4805_v14, %v2404_v36  ;;  %v4928_v60 = vadd.s32 %v4704_v55, %v2545_v7 }
 0x200   : > { %v2762_v53 = vmul.f32 %v2693_v3, %v2396_v46  ;;  %2499 = vst [vmem:[%s4030_s22 + $0x48] sm:$0xff] %v2399_v56  ;;  %v2694_v21 = vmul.f32 %v4835_v57, %v2399_v56  ;;  %v4924_v10 = vadd.f32 %v3571_v48, %v4671_v15  ;;  %v4932_v57 = vsel %vm2611_vm4, 1.0, %v5077_v20 }
 0x201   : > { %v2724_v61 = vadd.f32 %v2723_v63, %v2693_v3  ;;  %v2792_v32 = vadd.f32 %v2791_v9, %v2761_v45  ;;  %v4935_v62 = vsel %vm2609_vm5, 1.0, %v5077_v20  ;;  %vm2612_vm6 = vcmp.lt.s32.totalorder %v4905_v39, 512 }
 0x202   : > { %v2763_v49 = vmul.f32 %v2694_v21, %v2399_v56  ;;  %v3572_v47 = vpop.f32.mrb[124].mxu1  ;;  %v3656_v33 = vpop.f32.mrb[124].mxu0  ;;  %v2696_v14 = vmul.f32 %v4813_v19, %v2407_v13  ;;  %v2550_v46 = vadd.s32 208, %v4688_v2  ;;  %v2548_v30 = vadd.s32 192, %v4688_v2 }
 0x203   : > { %v2793_v15 = vadd.f32 %v2792_v32, %v2762_v53  ;;  %v2725_v22 = vadd.f32 %v2724_v61, %v2694_v21  ;;  %v2420_v7 = vadd.f32 %v3656_v33, %v4777_v52  ;;  %v3573_v5 = vpop.f32.mrb[125].mxu1  ;;  %v2411_v12 = vpop.f32.mrb[125].mxu0  ;;  %v2764_v17 = vmul.f32 %v2695_v54, %v2404_v36 }
 0x204   : > { %v3574_v18 = vadd.f32 %v3573_v5, %v3572_v47  ;;  %v2412_v6 = vadd.f32 %v2411_v12, %v4740_v42  ;;  %v3575_v16 = vpop.f32.mrb[126].mxu1  ;;  %v3657_v26 = vpop.f32.mrb[126].mxu0  ;;  %v2765_v48 = vmul.f32 %v2696_v14, %v2407_v13  ;;  %v2551_v45 = vadd.s32 216, %v4688_v2 }
 0x205   : > { %v2726_v1 = vadd.f32 %v2725_v22, %v2695_v54  ;;  %v2794_v34 = vadd.f32 %v2793_v15, %v2763_v49  ;;  %2504 = vst [vmem:[%s4030_s22 + $0x70] sm:$0xff] %v2420_v7  ;;  %v2423_v52 = vadd.f32 %v3657_v26, %v4786_v50  ;;  %v3576_v19 = vpop.f32.mrb[127].mxu1  ;;  %v2414_v0 = vpop.f32.mrb[127].mxu0  ;;  %vm2610_vm7 = vcmp.lt.s32.totalorder %v4928_v60, 512 }
 0x206   : > { %2502 = vst [vmem:[%s4030_s22 + $0x60] sm:$0xff] %v2412_v6  ;;  %v2697_v44 = vmul.f32 %v4843_v35, %v2412_v6  ;;  %v3577_v42 = vadd.f32 %v3576_v19, %v3575_v16  ;;  %v2415_v38 = vadd.f32 %v2414_v0, %v4752_v28  ;;  %v4949_v3 = vadd.f32 %v3574_v18, %v4677_v43 }
 0x207   : > { %v2795_v56 = vadd.f32 %v2794_v34, %v2764_v17  ;;  %v2727_v36 = vadd.f32 %v2726_v1, %v2696_v14  ;;  %2505 = vst [vmem:[%s4030_s22 + $0x78] sm:$0xff] %v2423_v52  ;;  %v2583_v35 = vadd.s32 %v4704_v55, %v2550_v46  ;;  %v2699_v28 = vmul.f32 %v4839_v27, %v2420_v7 }
 0x208   : > { %v2766_v9 = vmul.f32 %v2697_v44, %v2412_v6  ;;  %2503 = vst [vmem:[%s4030_s22 + $0x68] sm:$0xff] %v2415_v38  ;;  %v2698_v50 = vmul.f32 %v4857_v23, %v2415_v38  ;;  %v4956_v63 = vadd.f32 %v3577_v42, %v4683_v24  ;;  %v4964_v61 = vsel %vm2612_vm6, 1.0, %v5077_v20 }
 0x209   : > { %v2728_v53 = vadd.f32 %v2727_v36, %v2697_v44  ;;  %v2796_v43 = vadd.f32 %v2795_v56, %v2765_v48  ;;  %v2581_v23 = vadd.s32 %v4704_v55, %v2548_v30  ;;  %v2549_v24 = vadd.s32 200, %v4688_v2 }
 0x20a   : > { %v2767_v13 = vmul.f32 %v2698_v50, %v2415_v38  ;;  %v3578_v21 = vpop.f32.mrb[128].mxu1  ;;  %v3660_v54 = vpop.f32.mrb[128].mxu0  ;;  %v2700_v27 = vmul.f32 %v4849_v59, %v2423_v52  ;;  %vm2615_vm8 = vcmp.lt.s32.totalorder %v2583_v35, 512  ;;  %v4972_v12 = vadd.s32 %v4704_v55, %v2551_v45 }
 0x20b   : > { %v2797_v32 = vadd.f32 %v2796_v43, %v2766_v9  ;;  %v2729_v49 = vadd.f32 %v2728_v53, %v2698_v50  ;;  %v2436_v47 = vadd.f32 %v3660_v54, %v4879_v41  ;;  %v3579_v33 = vpop.f32.mrb[129].mxu1  ;;  %v2427_v15 = vpop.f32.mrb[129].mxu0  ;;  %v2768_v18 = vmul.f32 %v2699_v28, %v2420_v7 }
 0x20c   : > { %v3580_v14 = vadd.f32 %v3579_v33, %v3578_v21  ;;  %v2428_v22 = vadd.f32 %v2427_v15, %v4829_v37  ;;  %v3581_v39 = vpop.f32.mrb[130].mxu1  ;;  %v3661_v5 = vpop.f32.mrb[130].mxu0  ;;  %v2769_v1 = vmul.f32 %v2700_v27, %v2423_v52  ;;  %vm2613_vm9 = vcmp.lt.s32.totalorder %v2581_v23, 512 }
 0x20d   : > { %v2730_v6 = vadd.f32 %v2729_v49, %v2699_v28  ;;  %v2798_v16 = vadd.f32 %v2797_v32, %v2767_v13  ;;  %2508 = vst [vmem:[%s4030_s22 + $0x90] sm:$0xff] %v2436_v47  ;;  %v2439_v59 = vadd.f32 %v3661_v5, %v4884_v4  ;;  %v3582_v41 = vpop.f32.mrb[131].mxu1  ;;  %v2430_v26 = vpop.f32.mrb[131].mxu0  ;;  %v2703_v44 = vmul.f32 %v4867_v31, %v2436_v47  ;;  %v5078_v49 = vld [vmem:[#allocation2_spill] sm:$0xff]  ;;  %v5079_v5 = vld [vmem:[#allocation3_spill] sm:$0xff] }
 0x20e   : > { %2506 = vst [vmem:[%s4030_s22 + $0x80] sm:$0xff] %v2428_v22  ;;  %v2701_v46 = vmul.f32 %v4892_v51, %v2428_v22  ;;  %v3583_v37 = vadd.f32 %v3582_v41, %v3581_v39  ;;  %v2431_v30 = vadd.f32 %v2430_v26, %v4852_v29  ;;  %v4980_v17 = vadd.f32 %v3580_v14, %v4691_v58 }
 0x20f   : > { %v2799_v34 = vadd.f32 %v2798_v16, %v2768_v18  ;;  %v2731_v7 = vadd.f32 %v2730_v6, %v2700_v27  ;;  %2509 = vst [vmem:[%s4030_s22 + $0x98] sm:$0xff] %v2439_v59  ;;  %v2552_v51 = vadd.s32 224, %v4688_v2  ;;  %v3141_v58 = vsel %vm2610_vm7, 1.0, %v5077_v20 }
 0x210   : > { %v2770_v19 = vmul.f32 %v2701_v46, %v2428_v22  ;;  %2507 = vst [vmem:[%s4030_s22 + $0x88] sm:$0xff] %v2431_v30  ;;  %v2702_v4 = vmul.f32 %v4921_v25, %v2431_v30  ;;  %v4986_v0 = vadd.f32 %v3583_v37, %v4698_v8  ;;  %v4995_v56 = vsel %vm2615_vm8, 1.0, %v5077_v20 }
 0x211   : > { %v2732_v29 = vadd.f32 %v2731_v7, %v2701_v46  ;;  %v2800_v42 = vadd.f32 %v2799_v34, %v2769_v1  ;;  %v4998_v8 = vsel %vm2613_vm9, 1.0, %v5077_v20  ;;  %v2582_v25 = vadd.s32 %v4704_v55, %v2549_v24 }
 0x212   : > { %v2771_v52 = vmul.f32 %v2702_v4, %v2431_v30  ;;  %v3584_v38 = vpop.f32.mrb[132].mxu1  ;;  %v3664_v48 = vpop.f32.mrb[132].mxu0  ;;  %v2704_v36 = vmul.f32 %v4897_v40, %v2439_v59  ;;  %vm2616_vm10 = vcmp.lt.s32.totalorder %v4972_v12, 512  ;;  %v5006_v13 = vadd.s32 %v4704_v55, %v2552_v51 }
 0x213   : > { %v2801_v31 = vadd.f32 %v2800_v42, %v2770_v19  ;;  %v2733_v45 = vadd.f32 %v2732_v29, %v2702_v4  ;;  %v2452_v60 = vadd.f32 %v3664_v48, %v4949_v3  ;;  %v3585_v9 = vpop.f32.mrb[133].mxu1  ;;  %v2443_v50 = vpop.f32.mrb[133].mxu0  ;;  %v2772_v21 = vmul.f32 %v2703_v44, %v2436_v47 }
 0x214   : > { %v3586_v28 = vadd.f32 %v3585_v9, %v3584_v38  ;;  %v2444_v35 = vadd.f32 %v2443_v50, %v4913_v11  ;;  %v3587_v53 = vpop.f32.mrb[134].mxu1  ;;  %v3665_v43 = vpop.f32.mrb[134].mxu0  ;;  %v2773_v15 = vmul.f32 %v2704_v36, %v2439_v59  ;;  %vm2614_vm11 = vcmp.lt.s32.totalorder %v2582_v25, 512 }
 0x215   : > { %v2734_v54 = vadd.f32 %v2733_v45, %v2703_v44  ;;  %v2802_v40 = vadd.f32 %v2801_v31, %v2771_v52  ;;  %2512 = vst [vmem:[%s4030_s22 + $0xb0] sm:$0xff] %v2452_v60  ;;  %v2455_v3 = vadd.f32 %v3665_v43, %v4956_v63  ;;  %v3588_v23 = vpop.f32.mrb[135].mxu1  ;;  %v2446_v24 = vpop.f32.mrb[135].mxu0  ;;  %v2553_v18 = vadd.s32 232, %v4688_v2  ;;  %v5080_v45 = vld [vmem:[#allocation4_spill] sm:$0xff]  ;;  %v5081_v43 = vld [vmem:[#allocation5_spill] sm:$0xff] }
 0x216   : > { %2510 = vst [vmem:[%s4030_s22 + $0xa0] sm:$0xff] %v2444_v35  ;;  %v2705_v11 = vmul.f32 %v4935_v62, %v2444_v35  ;;  %v3589_v32 = vadd.f32 %v3588_v23, %v3587_v53  ;;  %v2447_v27 = vadd.f32 %v2446_v24, %v4924_v10  ;;  %v2307_v33 = vadd.f32 %v3586_v28, %v5078_v49 }
 0x217   : > { %v2803_v14 = vadd.f32 %v2802_v40, %v2772_v21  ;;  %v2735_v22 = vadd.f32 %v2734_v54, %v2704_v36  ;;  %2513 = vst [vmem:[%s4030_s22 + $0xb8] sm:$0xff] %v2455_v3  ;;  %v2707_v6 = vmul.f32 %v4932_v57, %v2452_v60  ;;  %v3147_v10 = vsel %vm2616_vm10, 1.0, %v5077_v20 }
 0x218   : > { %v2774_v47 = vmul.f32 %v2705_v11, %v2444_v35  ;;  %2511 = vst [vmem:[%s4030_s22 + $0xa8] sm:$0xff] %v2447_v27  ;;  %v2706_v39 = vmul.f32 %v3141_v58, %v2447_v27  ;;  %v2310_v63 = vadd.f32 %v3589_v32, %v5079_v5  ;;  %v3145_v46 = vsel %vm2614_vm11, 1.0, %v5077_v20 }
 0x219   : > { %v2736_v62 = vadd.f32 %v2735_v22, %v2705_v11  ;;  %v2804_v16 = vadd.f32 %v2803_v14, %v2773_v15  ;;  %v2554_v37 = vadd.s32 240, %v4688_v2  ;;  %vm2617_vm12 = vcmp.lt.s32.totalorder %v5006_v13, 512 }
 0x21a   : > { %v2775_v59 = vmul.f32 %v2706_v39, %v2447_v27  ;;  %v3590_v41 = vpop.f32.mrb[136].mxu1  ;;  %v3668_v26 = vpop.f32.mrb[136].mxu0  ;;  %v2708_v1 = vmul.f32 %v4964_v61, %v2455_v3  ;;  %v2555_v29 = vadd.s32 248, %v4688_v2  ;;  %v2586_v42 = vadd.s32 %v4704_v55, %v2553_v18 }
 0x21b   : > { %v2805_v30 = vadd.f32 %v2804_v16, %v2774_v47  ;;  %v2737_v57 = vadd.f32 %v2736_v62, %v2706_v39  ;;  %v2468_v34 = vadd.f32 %v3668_v26, %v2307_v33  ;;  %v3591_v7 = vpop.f32.mrb[137].mxu1  ;;  %v2459_v19 = vpop.f32.mrb[137].mxu0  ;;  %v2776_v58 = vmul.f32 %v2707_v6, %v2452_v60  ;;  %v5082_v62 = vld [vmem:[#allocation6_spill] sm:$0xff] }
 0x21c   : > { %v3592_v12 = vadd.f32 %v3591_v7, %v3590_v41  ;;  %v2460_v4 = vadd.f32 %v2459_v19, %v4980_v17  ;;  %v3593_v51 = vpop.f32.mrb[138].mxu1  ;;  %v3669_v44 = vpop.f32.mrb[138].mxu0  ;;  %v2777_v2 = vmul.f32 %v2708_v1, %v2455_v3  ;;  %v2587_v60 = vadd.s32 %v4704_v55, %v2554_v37 }
 0x21d   : > { %v2738_v52 = vadd.f32 %v2737_v57, %v2707_v6  ;;  %v2806_v38 = vadd.f32 %v2805_v30, %v2775_v59  ;;  %2516 = vst [vmem:[%s4030_s22 + $0xd0] sm:$0xff] %v2468_v34  ;;  %v2471_v61 = vadd.f32 %v3669_v44, %v2310_v63  ;;  %v3594_v48 = vpop.f32.mrb[139].mxu1  ;;  %v2462_v25 = vpop.f32.mrb[139].mxu0  ;;  %vm2618_vm13 = vcmp.lt.s32.totalorder %v2586_v42, 512  ;;  %v5083_v57 = vld [vmem:[#allocation7_spill] sm:$0xff] }
 0x21e   : > { %2514 = vst [vmem:[%s4030_s22 + $0xc0] sm:$0xff] %v2460_v4  ;;  %v2709_v31 = vmul.f32 %v4998_v8, %v2460_v4  ;;  %v3595_v36 = vadd.f32 %v3594_v48, %v3593_v51  ;;  %v2463_v17 = vadd.f32 %v2462_v25, %v4986_v0  ;;  %v2315_v9 = vadd.f32 %v3592_v12, %v5080_v45 }
 0x21f   : > { %v2807_v50 = vadd.f32 %v2806_v38, %v2776_v58  ;;  %v2739_v28 = vadd.f32 %v2738_v52, %v2708_v1  ;;  %2517 = vst [vmem:[%s4030_s22 + $0xd8] sm:$0xff] %v2471_v61  ;;  %v2711_v54 = vmul.f32 %v4995_v56, %v2468_v34  ;;  %v2588_v0 = vadd.s32 %v4704_v55, %v2555_v29 }
 0x220   : > { %v2778_v35 = vmul.f32 %v2709_v31, %v2460_v4  ;;  %2515 = vst [vmem:[%s4030_s22 + $0xc8] sm:$0xff] %v2463_v17  ;;  %v2710_v53 = vmul.f32 %v3145_v46, %v2463_v17  ;;  %v2318_v21 = vadd.f32 %v3595_v36, %v5081_v43  ;;  %v2712_v32 = vmul.f32 %v3147_v10, %v2471_v61 }
 0x221   : > { %v2740_v8 = vadd.f32 %v2739_v28, %v2709_v31  ;;  %v2808_v40 = vadd.f32 %v2807_v50, %v2777_v2  ;;  %v3148_v15 = vsel %vm2617_vm12, 1.0, %v5077_v20  ;;  %vm2619_vm14 = vcmp.lt.s32.totalorder %v2587_v60, 512 }
 0x222   : > { %v2779_v23 = vmul.f32 %v2710_v53, %v2463_v17  ;;  %v3596_v24 = vpop.f32.mrb[140].mxu1  ;;  %v3672_v3 = vpop.f32.mrb[140].mxu0  ;;  %v3149_v55 = vsel %vm2618_vm13, 1.0, %v5077_v20  ;;  %v2780_v39 = vmul.f32 %v2711_v54, %v2468_v34  ;;  %vm2620_vm15 = vcmp.lt.s32.totalorder %v2588_v0, 512 }
 0x223   : > { %v2809_v11 = vadd.f32 %v2808_v40, %v2778_v35  ;;  %v2741_v27 = vadd.f32 %v2740_v8, %v2710_v53  ;;  %v3597_v49 = vpop.f32.mrb[141].mxu1  ;;  %v2475_v33 = vpop.f32.mrb[141].mxu0  ;;  %v2781_v41 = vmul.f32 %v2712_v32, %v2471_v61  ;;  %v3150_v46 = vsel %vm2619_vm14, 1.0, %v5077_v20  ;;  %v2827_v8 = vld [vmem:[%s5068_s4] sm:$0xff] }
 0x224   : > { %v3598_v14 = vadd.f32 %v3597_v49, %v3596_v24  ;;  %v2476_v56 = vadd.f32 %v2475_v33, %v2315_v9  ;;  %v3599_v22 = vpop.f32.mrb[142].mxu1  ;;  %v3673_v47 = vpop.f32.mrb[142].mxu0  ;;  %v3151_v4 = vsel %vm2620_vm15, 1.0, %v5077_v20  ;;  %vm2825_vm1 = vcmask 1041408  }
 0x225   : > { %v2742_v5 = vadd.f32 %v2741_v27, %v2711_v54  ;;  %v2810_v63 = vadd.f32 %v2809_v11, %v2779_v23  ;;  %v3600_v18 = vpop.f32.mrb[143].mxu1  ;;  %v2478_v6 = vpop.f32.mrb[143].mxu0 }
 0x226   : > { %v2323_v16 = vadd.f32 %v3598_v14, %v5082_v62  ;;  %2518 = vst [vmem:[%s4030_s22 + $0xe0] sm:$0xff] %v2476_v56  ;;  %v2713_v13 = vmul.f32 %v3148_v15, %v2476_v56  ;;  %v3601_v10 = vadd.f32 %v3600_v18, %v3599_v22  ;;  %v2479_v59 = vadd.f32 %v2478_v6, %v2318_v21 }
 0x227   : > { %v2811_v26 = vadd.f32 %v2810_v63, %v2780_v39  ;;  %v2743_v37 = vadd.f32 %v2742_v5, %v2712_v32 }
 0x228   : > { %v2484_v30 = vadd.f32 %v3672_v3, %v2323_v16  ;;  %v2782_v1 = vmul.f32 %v2713_v13, %v2476_v56  ;;  %v2326_v34 = vadd.f32 %v3601_v10, %v5083_v57  ;;  %2519 = vst [vmem:[%s4030_s22 + $0xe8] sm:$0xff] %v2479_v59  ;;  %v2714_v7 = vmul.f32 %v3149_v55, %v2479_v59 }
 0x229   : > { %v2744_v19 = vadd.f32 %v2743_v37, %v2713_v13  ;;  %v2812_v12 = vadd.f32 %v2811_v26, %v2781_v41 }
 0x22a   : > { %2520 = vst [vmem:[%s4030_s22 + $0xf0] sm:$0xff] %v2484_v30  ;;  %v2715_v51 = vmul.f32 %v3150_v46, %v2484_v30  ;;  %v2487_v44 = vadd.f32 %v3673_v47, %v2326_v34  ;;  %v2783_v29 = vmul.f32 %v2714_v7, %v2479_v59 }
 0x22b   : > { %v2813_v42 = vadd.f32 %v2812_v12, %v2782_v1  ;;  %v2745_v58 = vadd.f32 %v2744_v19, %v2714_v7 }
 0x22c   : > { %v2784_v52 = vmul.f32 %v2715_v51, %v2484_v30  ;;  %2521 = vst [vmem:[%s4030_s22 + $0xf8] sm:$0xff] %v2487_v44  ;;  %v2716_v38 = vmul.f32 %v3151_v4, %v2487_v44 }
 0x22d   : > { %v2746_v61 = vadd.f32 %v2745_v58, %v2715_v51  ;;  %v2814_v48 = vadd.f32 %v2813_v42, %v2783_v29 }
 0x22e   : > { %v2785_v25 = vmul.f32 %v2716_v38, %v2487_v44 }
 0x22f   : > { %v2747_v31 = vadd.f32 %v2746_v61, %v2716_v38  ;;  %v2815_v36 = vadd.f32 %v2814_v48, %v2784_v52 }
 0x231   : > { %v2748_v17 = vrot.slane %v2747_v31, 4  ;;  %v2816_v45 = vadd.f32 %v2815_v36, %v2785_v25 }
 0x233   : > { %v2749_v9 = vadd.f32 %v2748_v17, %v2747_v31  ;;  %v2817_v2 = vrot.slane %v2816_v45, 4 }
 0x235   : > { %v2750_v50 = vrot.slane %v2749_v9, 2  ;;  %v2818_v20 = vadd.f32 %v2817_v2, %v2816_v45 }
 0x237   : > { %v2751_v28 = vadd.f32 %v2750_v50, %v2749_v9  ;;  %v2819_v60 = vrot.slane %v2818_v20, 2 }
 0x239   : > { %v2752_v35 = vrot.slane %v2751_v28, 1  ;;  %v2820_v53 = vadd.f32 %v2819_v60, %v2818_v20 }
 0x23b   : > { %v2821_v43 = vrot.slane %v2820_v53, 1  ;;  %v2753_v21 = vadd.f32 %v2752_v35, %v2751_v28 }
 0x23d   : > { %v2822_v54 = vadd.f32 %v2821_v43, %v2820_v53 }
 0x23f   : > { %v2824_v40 = vsel %vm2823_vm0, %v2753_v21, %v2822_v54 }
 0x240   : > { %v2826_v0 = vsel %vm2825_vm1, %v2824_v40, 0.0 }
 0x241   : > { %v2828_v23 = vadd.f32 %v2827_v8, %v2826_v0 }
 0x243   : > { %2829 = vst [vmem:[%s5068_s4] sm:$0xff] %v2828_v23 }
 0x244 PF: > { %s15_s15 = sadd.s32 1, %s3987_s15  }
 0x245   : > { %p12_p5 = scmp.ge.s32.totalorder %s15_s15, 4  }
 0x247   :  { %14 = sbr.rel (!%p12_p5) target bundleno = 1 (0x1), region = 74 }

// kernel: postres2d_forward.7
= control target key start
LH: loop header
LB: loop body
LE: loop exit
PB: predicated region body
PF: predicated region fallthrough
CT: control target
= control target key end

     0   :  { %s713_s18 = smov 0   ;;  %s1000_s0 = inlined_call_operand.vmem [shape: f32[512,128], index: 0, kind: input, shape index: {}]   ;;  %s1001_s1 = inlined_call_operand.vmem [shape: f32[512,128], index: 1, kind: input, shape index: {}]   ;;  %s1002_s2 = inlined_call_operand.vmem [shape: f32[8,128], index: 2, kind: input, shape index: {}]   ;;  %s1003_s3 = inlined_call_operand.vmem [shape: f32[8,128], index: 3, kind: input, shape index: {}]   ;;  %s1004_s4 = inlined_call_operand.vmem [shape: f32[8,128], index: 4, kind: input, shape index: {}]   ;;  %s1005_s5 = inlined_call_operand.vmem [shape: f32[512,128], index: 5, kind: output, shape index: {}]  }
   0x1 LB: > { %s650_s19 = sadd.s32 4294967295, %s681_s18   ;;  %p654_p0 = scmp.ge.s32.totalorder %s681_s18, 1  ;;  %s681_s18 = sphi %s713_s18, %s15_s18  }
   0x2   : > { %p199_p1 = scmp.lt.s32.totalorder %s681_s18, 3 }
   0x4   : > { %p200_p2 = pnand %p654_p0, %p199_p1 }
   0x5   : > { %v250_v0 = vld [vmem:[%s1002_s2] sm:$0x1] (!%p200_p2)  ;;  %v251_v1 = vld [vmem:[%s1002_s2 + $0x1] sm:$0x1] (!%p200_p2)  ;;  %v264_v4 = vld [vmem:[%s1003_s3 + $0x2] sm:$0x1] (!%p200_p2)  ;;  %v310_v16 = vlaneseq (!%p200_p2) }
   0x6   : > { %203 = sbr.rel (%p200_p2) target bundleno = 87 (0x57), region = 40  ;;  %v254_v2 = vmul.f32 (!%p200_p2), 0.001953125, %v250_v0  ;;  %v255_v3 = vmul.f32 (!%p200_p2), 0.001953125, %v251_v1  ;;  %v265_v5 = vld [vmem:[%s1003_s3 + $0x3] sm:$0x1] (!%p200_p2)  ;;  %v268_v7 = vmul.f32 (!%p200_p2), 0.001953125, %v264_v4 }
   0x7   : > { %v269_v8 = vmul.f32 (!%p200_p2), 0.001953125, %v265_v5  ;;  %s655_s28 = sshll.u32 (!%p200_p2), %s650_s19, 5  ;;  %v311_v17 = vshrl.u32 (!%p200_p2), %v310_v16, 7  ;;  %v252_v18 = vld [vmem:[%s1004_s4] sm:$0x1] (!%p200_p2) }
   0x8   : > { %v256_v6 = vmul.f32 (!%p200_p2), %v254_v2, %v254_v2  ;;  %v270_v10 = vmul.f32 (!%p200_p2), %v268_v7, %v268_v7  ;;  %p233_p3 = scmp.lt.s32.totalorder (!%p200_p2), %s655_s28, 63  ;;  %v266_v21 = vld [vmem:[%s1004_s4 + $0x2] sm:$0x1] (!%p200_p2)  ;;  %v253_v22 = vld [vmem:[%s1004_s4 + $0x1] sm:$0x1] (!%p200_p2) }
   0x9   : > { %v312_v19 = vsub.s32 (!%p200_p2), 0, %v311_v17  ;;  %v267_v25 = vld [vmem:[%s1004_s4 + $0x3] sm:$0x1] (!%p200_p2) }
   0xa   : > { %v257_v9 = vsub.f32 (!%p200_p2), %v255_v3, %v256_v6  ;;  %v271_v12 = vsub.f32 (!%p200_p2), %v269_v8, %v270_v10 }
   0xc   : > { %v258_v11 = vmax.f32 (!%p200_p2), %v257_v9, 0.0  ;;  %v272_v14 = vmax.f32 (!%p200_p2), %v271_v12, 0.0 }
   0xd   : > { %s1007_s28 = smov (!%p233_p3, %s655_s28), 63 }
   0xe   : > { %v259_v13 = vadd.f32 1e-05, %v258_v11  ;;  %v273_v15 = vadd.f32 1e-05, %v272_v14  ;;  %s733_s29 = sshll.u32 %s1007_s28, 3 }
   0xf   : > { %s742_s9 = scalar_lea.vmem %s1000_s0, %s733_s29  ;;  %s751_s14 = scalar_lea.vmem %s1001_s1, %s733_s29 }
  0x10   : > { %671 = vrsqrt.f32 %v259_v13  ;;  %v278_v26 = vld [vmem:[%s742_s9] sm:$0xff]  ;;  %v279_v27 = vld [vmem:[%s742_s9 + $0x8] sm:$0xff]  ;;  %v280_v31 = vld [vmem:[%s742_s9 + $0x10] sm:$0xff]  ;;  %s811_s22 = scalar_lea.vmem %s1005_s5, %s733_s29 }
  0x11   : > { %673 = vrsqrt.f32 %v273_v15  ;;  %v281_v32 = vld [vmem:[%s742_s9 + $0x18] sm:$0xff]  ;;  %v282_v33 = vld [vmem:[%s742_s9 + $0x20] sm:$0xff]  ;;  %v383_v35 = vld [vmem:[%s751_s14 + $0x8] sm:$0xff] }
  0x12   : > { %v382_v34 = vld [vmem:[%s751_s14] sm:$0xff]  ;;  %v384_v36 = vld [vmem:[%s751_s14 + $0x10] sm:$0xff]  ;;  %v385_v41 = vld [vmem:[%s751_s14 + $0x18] sm:$0xff] }
  0x13   : > { %v386_v42 = vld [vmem:[%s751_s14 + $0x20] sm:$0xff]  ;;  %v283_v43 = vld [vmem:[%s742_s9 + $0x28] sm:$0xff]  ;;  %v284_v57 = vld [vmem:[%s742_s9 + $0x30] sm:$0xff] }
  0x14   : > { %v387_v52 = vld [vmem:[%s751_s14 + $0x28] sm:$0xff]  ;;  %v388_v62 = vld [vmem:[%s751_s14 + $0x30] sm:$0xff]  ;;  %v389_v16 = vld [vmem:[%s751_s14 + $0x38] sm:$0xff] }
  0x1a   : > { %v672_v20 = vpop.eup %671 }
  0x1b   : > { %v261_v23 = vmul.f32 %v672_v20, %v252_v18  ;;  %v674_v24 = vpop.eup %673 }
  0x1c   : > { %v275_v29 = vmul.f32 %v674_v24, %v266_v21  ;;  %v286_v21 = vld [vmem:[%s742_s9 + $0x40] sm:$0xff] }
  0x1d   : > { %v262_v28 = vmul.f32 %v261_v23, %v254_v2  ;;  %v761_v30 = vrot.slane %v261_v23, %v312_v19  ;;  %v287_v23 = vld [vmem:[%s742_s9 + $0x48] sm:$0xff] }
  0x1e   : > { %v276_v38 = vmul.f32 %v275_v29, %v268_v7  ;;  %v770_v40 = vrot.slane %v275_v29, %v312_v19  ;;  %v285_v7 = vld [vmem:[%s742_s9 + $0x38] sm:$0xff]  ;;  %v288_v29 = vld [vmem:[%s742_s9 + $0x50] sm:$0xff] }
  0x1f   : > { %v263_v37 = vsub.f32 %v253_v22, %v262_v28  ;;  %v314_v39 = vmul.f32 %v761_v30, %v278_v26  ;;  %v315_v44 = vmul.f32 %v761_v30, %v279_v27  ;;  %v316_v45 = vmul.f32 %v761_v30, %v280_v31  ;;  %v390_v22 = vld [vmem:[%s751_s14 + $0x40] sm:$0xff]  ;;  %v391_v28 = vld [vmem:[%s751_s14 + $0x48] sm:$0xff]  ;;  %v392_v31 = vld [vmem:[%s751_s14 + $0x50] sm:$0xff] }
  0x20   : > { %v317_v46 = vmul.f32 %v761_v30, %v281_v32  ;;  %v318_v47 = vmul.f32 %v761_v30, %v282_v33  ;;  %v277_v48 = vsub.f32 %v267_v25, %v276_v38  ;;  %v418_v50 = vmul.f32 %v770_v40, %v382_v34 }
  0x21   : > { %v779_v49 = vrot.slane %v263_v37, %v312_v19  ;;  %v419_v51 = vmul.f32 %v770_v40, %v383_v35  ;;  %v420_v53 = vmul.f32 %v770_v40, %v384_v36  ;;  %v421_v54 = vmul.f32 %v770_v40, %v385_v41  ;;  %v289_v36 = vld [vmem:[%s742_s9 + $0x58] sm:$0xff] }
  0x22   : > { %v422_v55 = vmul.f32 %v770_v40, %v386_v42  ;;  %v319_v56 = vmul.f32 %v761_v30, %v283_v43  ;;  %v790_v59 = vrot.slane %v277_v48, %v312_v19  ;;  %v423_v2 = vmul.f32 %v770_v40, %v387_v52  ;;  %v393_v42 = vld [vmem:[%s751_s14 + $0x58] sm:$0xff]  ;;  %v290_v43 = vld [vmem:[%s742_s9 + $0x60] sm:$0xff] }
  0x23   : > { %v350_v58 = vadd.f32 %v779_v49, %v314_v39  ;;  %v351_v60 = vadd.f32 %v779_v49, %v315_v44  ;;  %v352_v61 = vadd.f32 %v779_v49, %v316_v45  ;;  %v353_v63 = vadd.f32 %v779_v49, %v317_v46  ;;  %v394_v48 = vld [vmem:[%s751_s14 + $0x60] sm:$0xff] }
  0x24   : > { %v354_v0 = vadd.f32 %v779_v49, %v318_v47  ;;  %v355_v1 = vadd.f32 %v779_v49, %v319_v56  ;;  %v320_v6 = vmul.f32 %v761_v30, %v284_v57  ;;  %v424_v11 = vmul.f32 %v770_v40, %v388_v62 }
  0x25   : > { %v450_v3 = vadd.f32 %v418_v50, %v350_v58  ;;  %v451_v4 = vadd.f32 %v419_v51, %v351_v60  ;;  %v452_v5 = vadd.f32 %v420_v53, %v352_v61  ;;  %v453_v8 = vadd.f32 %v421_v54, %v353_v63  ;;  %v291_v54 = vld [vmem:[%s742_s9 + $0x68] sm:$0xff] }
  0x26   : > { %v454_v9 = vadd.f32 %v422_v55, %v354_v0  ;;  %v455_v10 = vadd.f32 %v423_v2, %v355_v1  ;;  %v356_v15 = vadd.f32 %v779_v49, %v320_v6  ;;  %v321_v20 = vmul.f32 %v761_v30, %v285_v7  ;;  %v395_v60 = vld [vmem:[%s751_s14 + $0x68] sm:$0xff]  ;;  %v396_v6 = vld [vmem:[%s751_s14 + $0x70] sm:$0xff] }
  0x27   : > { %v486_v12 = vadd.f32 %v790_v59, %v450_v3  ;;  %v487_v13 = vadd.f32 %v790_v59, %v451_v4  ;;  %v488_v14 = vadd.f32 %v790_v59, %v452_v5  ;;  %v489_v17 = vadd.f32 %v790_v59, %v453_v8  ;;  %v292_v5 = vld [vmem:[%s742_s9 + $0x70] sm:$0xff] }
  0x28   : > { %v490_v18 = vadd.f32 %v790_v59, %v454_v9  ;;  %v491_v19 = vadd.f32 %v790_v59, %v455_v10  ;;  %v456_v27 = vadd.f32 %v424_v11, %v356_v15  ;;  %v357_v35 = vadd.f32 %v779_v49, %v321_v20  ;;  %v293_v15 = vld [vmem:[%s742_s9 + $0x78] sm:$0xff] }
  0x29   : > { %v518_v24 = vmax.f32 %v486_v12, 0.0  ;;  %v519_v25 = vmax.f32 %v487_v13, 0.0  ;;  %v520_v26 = vmax.f32 %v488_v14, 0.0  ;;  %v521_v32 = vmax.f32 %v489_v17, 0.0 }
  0x2a   : > { %v522_v33 = vmax.f32 %v490_v18, 0.0  ;;  %v523_v34 = vmax.f32 %v491_v19, 0.0  ;;  %v492_v37 = vadd.f32 %v790_v59, %v456_v27  ;;  %v425_v38 = vmul.f32 %v770_v40, %v389_v16  ;;  %v397_v16 = vld [vmem:[%s751_s14 + $0x78] sm:$0xff]  ;;  %v295_v27 = vld [vmem:[%s742_s9 + $0x88] sm:$0xff] }
  0x2b   : > { %550 = vst [vmem:[%s811_s22] sm:$0xff] %v518_v24  ;;  %551 = vst [vmem:[%s811_s22 + $0x8] sm:$0xff] %v519_v25  ;;  %v322_v39 = vmul.f32 %v761_v30, %v286_v21  ;;  %v426_v41 = vmul.f32 %v770_v40, %v390_v22  ;;  %v323_v44 = vmul.f32 %v761_v30, %v287_v23  ;;  %v294_v21 = vld [vmem:[%s742_s9 + $0x80] sm:$0xff] }
  0x2c   : > { %552 = vst [vmem:[%s811_s22 + $0x10] sm:$0xff] %v520_v26  ;;  %553 = vst [vmem:[%s811_s22 + $0x18] sm:$0xff] %v521_v32  ;;  %v427_v45 = vmul.f32 %v770_v40, %v391_v28  ;;  %v324_v46 = vmul.f32 %v761_v30, %v288_v29  ;;  %v428_v47 = vmul.f32 %v770_v40, %v392_v31  ;;  %v524_v50 = vmax.f32 %v492_v37, 0.0  ;;  %v398_v22 = vld [vmem:[%s751_s14 + $0x80] sm:$0xff]  ;;  %v399_v28 = vld [vmem:[%s751_s14 + $0x88] sm:$0xff] }
  0x2d   : > { %554 = vst [vmem:[%s811_s22 + $0x20] sm:$0xff] %v522_v33  ;;  %555 = vst [vmem:[%s811_s22 + $0x28] sm:$0xff] %v523_v34  ;;  %v457_v51 = vadd.f32 %v425_v38, %v357_v35  ;;  %v358_v52 = vadd.f32 %v779_v49, %v322_v39  ;;  %v325_v53 = vmul.f32 %v761_v30, %v289_v36  ;;  %v296_v34 = vld [vmem:[%s742_s9 + $0x90] sm:$0xff] }
  0x2e   : > { %v359_v55 = vadd.f32 %v779_v49, %v323_v44  ;;  %v360_v56 = vadd.f32 %v779_v49, %v324_v46  ;;  %v429_v57 = vmul.f32 %v770_v40, %v393_v42  ;;  %v326_v58 = vmul.f32 %v761_v30, %v290_v43  ;;  %556 = vst [vmem:[%s811_s22 + $0x30] sm:$0xff] %v524_v50  ;;  %v400_v35 = vld [vmem:[%s751_s14 + $0x90] sm:$0xff]  ;;  %v401_v46 = vld [vmem:[%s751_s14 + $0x98] sm:$0xff] }
  0x2f   : > { %v493_v61 = vadd.f32 %v790_v59, %v457_v51  ;;  %v458_v62 = vadd.f32 %v426_v41, %v358_v52  ;;  %v361_v63 = vadd.f32 %v779_v49, %v325_v53  ;;  %v430_v0 = vmul.f32 %v770_v40, %v394_v48  ;;  %v297_v41 = vld [vmem:[%s742_s9 + $0x98] sm:$0xff] }
  0x30   : > { %v459_v1 = vadd.f32 %v427_v45, %v359_v55  ;;  %v460_v2 = vadd.f32 %v428_v47, %v360_v56  ;;  %v362_v3 = vadd.f32 %v779_v49, %v326_v58  ;;  %v327_v4 = vmul.f32 %v761_v30, %v291_v54  ;;  %v298_v47 = vld [vmem:[%s742_s9 + $0xa0] sm:$0xff] }
  0x31   : > { %v525_v7 = vmax.f32 %v493_v61, 0.0  ;;  %v494_v8 = vadd.f32 %v790_v59, %v458_v62  ;;  %v461_v9 = vadd.f32 %v429_v57, %v361_v63  ;;  %v431_v10 = vmul.f32 %v770_v40, %v395_v60  ;;  %v402_v57 = vld [vmem:[%s751_s14 + $0xa0] sm:$0xff]  ;;  %v299_v63 = vld [vmem:[%s742_s9 + $0xa8] sm:$0xff] }
  0x32   : > { %v495_v11 = vadd.f32 %v790_v59, %v459_v1  ;;  %v496_v12 = vadd.f32 %v790_v59, %v460_v2  ;;  %v462_v13 = vadd.f32 %v430_v0, %v362_v3  ;;  %v363_v14 = vadd.f32 %v779_v49, %v327_v4  ;;  %v403_v4 = vld [vmem:[%s751_s14 + $0xa8] sm:$0xff] }
  0x33   : > { %557 = vst [vmem:[%s811_s22 + $0x38] sm:$0xff] %v525_v7  ;;  %v526_v17 = vmax.f32 %v494_v8, 0.0  ;;  %v497_v18 = vadd.f32 %v790_v59, %v461_v9  ;;  %v328_v19 = vmul.f32 %v761_v30, %v292_v5  ;;  %v432_v20 = vmul.f32 %v770_v40, %v396_v6  ;;  %v300_v9 = vld [vmem:[%s742_s9 + $0xb0] sm:$0xff] }
  0x34   : > { %v527_v23 = vmax.f32 %v495_v11, 0.0  ;;  %v528_v24 = vmax.f32 %v496_v12, 0.0  ;;  %v498_v25 = vadd.f32 %v790_v59, %v462_v13  ;;  %v463_v26 = vadd.f32 %v431_v10, %v363_v14  ;;  %v404_v14 = vld [vmem:[%s751_s14 + $0xb0] sm:$0xff] }
  0x35   : > { %558 = vst [vmem:[%s811_s22 + $0x40] sm:$0xff] %v526_v17  ;;  %v529_v29 = vmax.f32 %v497_v18, 0.0  ;;  %v364_v31 = vadd.f32 %v779_v49, %v328_v19  ;;  %v329_v32 = vmul.f32 %v761_v30, %v293_v15  ;;  %v433_v33 = vmul.f32 %v770_v40, %v397_v16  ;;  %v301_v15 = vld [vmem:[%s742_s9 + $0xb8] sm:$0xff] }
  0x36   : > { %559 = vst [vmem:[%s811_s22 + $0x48] sm:$0xff] %v527_v23  ;;  %560 = vst [vmem:[%s811_s22 + $0x50] sm:$0xff] %v528_v24  ;;  %v530_v36 = vmax.f32 %v498_v25, 0.0  ;;  %v499_v37 = vadd.f32 %v790_v59, %v463_v26  ;;  %v330_v38 = vmul.f32 %v761_v30, %v294_v21  ;;  %v434_v39 = vmul.f32 %v770_v40, %v398_v22  ;;  %v302_v25 = vld [vmem:[%s742_s9 + $0xc0] sm:$0xff] }
  0x37   : > { %561 = vst [vmem:[%s811_s22 + $0x58] sm:$0xff] %v529_v29  ;;  %v464_v42 = vadd.f32 %v432_v20, %v364_v31  ;;  %v365_v43 = vadd.f32 %v779_v49, %v329_v32  ;;  %v331_v44 = vmul.f32 %v761_v30, %v295_v27  ;;  %v435_v45 = vmul.f32 %v770_v40, %v399_v28  ;;  %v405_v20 = vld [vmem:[%s751_s14 + $0xb8] sm:$0xff]  ;;  %v406_v26 = vld [vmem:[%s751_s14 + $0xc0] sm:$0xff]  ;;  %v303_v32 = vld [vmem:[%s742_s9 + $0xc8] sm:$0xff] }
  0x38   : > { %562 = vst [vmem:[%s811_s22 + $0x60] sm:$0xff] %v530_v36  ;;  %v531_v48 = vmax.f32 %v499_v37, 0.0  ;;  %v366_v50 = vadd.f32 %v779_v49, %v330_v38  ;;  %v332_v51 = vmul.f32 %v761_v30, %v296_v34  ;;  %v436_v52 = vmul.f32 %v770_v40, %v400_v35  ;;  %v304_v38 = vld [vmem:[%s742_s9 + $0xd0] sm:$0xff] }
  0x39   : > { %v500_v53 = vadd.f32 %v790_v59, %v464_v42  ;;  %v465_v54 = vadd.f32 %v433_v33, %v365_v43  ;;  %v367_v55 = vadd.f32 %v779_v49, %v331_v44  ;;  %v333_v56 = vmul.f32 %v761_v30, %v297_v41  ;;  %v407_v33 = vld [vmem:[%s751_s14 + $0xc8] sm:$0xff] }
  0x3a   : > { %563 = vst [vmem:[%s811_s22 + $0x68] sm:$0xff] %v531_v48  ;;  %v466_v58 = vadd.f32 %v434_v39, %v366_v50  ;;  %v368_v60 = vadd.f32 %v779_v49, %v332_v51  ;;  %v437_v61 = vmul.f32 %v770_v40, %v401_v46  ;;  %v334_v62 = vmul.f32 %v761_v30, %v298_v47  ;;  %v408_v39 = vld [vmem:[%s751_s14 + $0xd0] sm:$0xff]  ;;  %v409_v51 = vld [vmem:[%s751_s14 + $0xd8] sm:$0xff] }
  0x3b   : > { %v532_v0 = vmax.f32 %v500_v53, 0.0  ;;  %v501_v1 = vadd.f32 %v790_v59, %v465_v54  ;;  %v467_v2 = vadd.f32 %v435_v45, %v367_v55  ;;  %v369_v3 = vadd.f32 %v779_v49, %v333_v56  ;;  %v305_v45 = vld [vmem:[%s742_s9 + $0xd8] sm:$0xff]  ;;  %v306_v56 = vld [vmem:[%s742_s9 + $0xe0] sm:$0xff] }
  0x3c   : > { %v502_v5 = vadd.f32 %v790_v59, %v466_v58  ;;  %v468_v6 = vadd.f32 %v436_v52, %v368_v60  ;;  %v370_v7 = vadd.f32 %v779_v49, %v334_v62  ;;  %v438_v8 = vmul.f32 %v770_v40, %v402_v57  ;;  %v410_v62 = vld [vmem:[%s751_s14 + $0xe0] sm:$0xff] }
  0x3d   : > { %564 = vst [vmem:[%s811_s22 + $0x70] sm:$0xff] %v532_v0  ;;  %v533_v10 = vmax.f32 %v501_v1, 0.0  ;;  %v503_v11 = vadd.f32 %v790_v59, %v467_v2  ;;  %v469_v12 = vadd.f32 %v437_v61, %v369_v3  ;;  %v335_v13 = vmul.f32 %v761_v30, %v299_v63  ;;  %v307_v3 = vld [vmem:[%s742_s9 + $0xe8] sm:$0xff] }
  0x3e   : > { %v534_v16 = vmax.f32 %v502_v5, 0.0  ;;  %v504_v17 = vadd.f32 %v790_v59, %v468_v6  ;;  %v470_v18 = vadd.f32 %v438_v8, %v370_v7  ;;  %v439_v19 = vmul.f32 %v770_v40, %v403_v4  ;;  %v411_v8 = vld [vmem:[%s751_s14 + $0xe8] sm:$0xff] }
  0x3f   : > { %565 = vst [vmem:[%s811_s22 + $0x78] sm:$0xff] %v533_v10  ;;  %v535_v21 = vmax.f32 %v503_v11, 0.0  ;;  %v505_v22 = vadd.f32 %v790_v59, %v469_v12  ;;  %v371_v23 = vadd.f32 %v779_v49, %v335_v13  ;;  %v336_v24 = vmul.f32 %v761_v30, %v300_v9  ;;  %v308_v9 = vld [vmem:[%s742_s9 + $0xf0] sm:$0xff] }
  0x40   : > { %566 = vst [vmem:[%s811_s22 + $0x80] sm:$0xff] %v534_v16  ;;  %v536_v27 = vmax.f32 %v504_v17, 0.0  ;;  %v506_v28 = vadd.f32 %v790_v59, %v470_v18  ;;  %v440_v29 = vmul.f32 %v770_v40, %v404_v14  ;;  %v337_v31 = vmul.f32 %v761_v30, %v301_v15  ;;  %v412_v18 = vld [vmem:[%s751_s14 + $0xf0] sm:$0xff] }
  0x41   : > { %567 = vst [vmem:[%s811_s22 + $0x88] sm:$0xff] %v535_v21  ;;  %v537_v34 = vmax.f32 %v505_v22, 0.0  ;;  %v471_v35 = vadd.f32 %v439_v19, %v371_v23  ;;  %v372_v36 = vadd.f32 %v779_v49, %v336_v24  ;;  %v441_v37 = vmul.f32 %v770_v40, %v405_v20  ;;  %v309_v19 = vld [vmem:[%s742_s9 + $0xf8] sm:$0xff] }
  0x42   : > { %568 = vst [vmem:[%s811_s22 + $0x90] sm:$0xff] %v536_v27  ;;  %v538_v41 = vmax.f32 %v506_v28, 0.0  ;;  %v373_v42 = vadd.f32 %v779_v49, %v337_v31  ;;  %v338_v43 = vmul.f32 %v761_v30, %v302_v25  ;;  %v442_v44 = vmul.f32 %v770_v40, %v406_v26  ;;  %v413_v24 = vld [vmem:[%s751_s14 + $0xf8] sm:$0xff] }
  0x43   : > { %569 = vst [vmem:[%s811_s22 + $0x98] sm:$0xff] %v537_v34  ;;  %v507_v46 = vadd.f32 %v790_v59, %v471_v35  ;;  %v472_v47 = vadd.f32 %v440_v29, %v372_v36  ;;  %v339_v48 = vmul.f32 %v761_v30, %v303_v32  ;;  %v443_v50 = vmul.f32 %v770_v40, %v407_v33 }
  0x44   : > { %570 = vst [vmem:[%s811_s22 + $0xa0] sm:$0xff] %v538_v41  ;;  %v473_v52 = vadd.f32 %v441_v37, %v373_v42  ;;  %v374_v53 = vadd.f32 %v779_v49, %v338_v43  ;;  %v340_v54 = vmul.f32 %v761_v30, %v304_v38  ;;  %v444_v55 = vmul.f32 %v770_v40, %v408_v39 }
  0x45   : > { %v539_v57 = vmax.f32 %v507_v46, 0.0  ;;  %v508_v58 = vadd.f32 %v790_v59, %v472_v47  ;;  %v375_v60 = vadd.f32 %v779_v49, %v339_v48  ;;  %v341_v61 = vmul.f32 %v761_v30, %v305_v45 }
  0x46   : > { %v509_v63 = vadd.f32 %v790_v59, %v473_v52  ;;  %v474_v0 = vadd.f32 %v442_v44, %v374_v53  ;;  %v376_v1 = vadd.f32 %v779_v49, %v340_v54  ;;  %v445_v2 = vmul.f32 %v770_v40, %v409_v51 }
  0x47   : > { %571 = vst [vmem:[%s811_s22 + $0xa8] sm:$0xff] %v539_v57  ;;  %v540_v4 = vmax.f32 %v508_v58, 0.0  ;;  %v475_v5 = vadd.f32 %v443_v50, %v375_v60  ;;  %v377_v6 = vadd.f32 %v779_v49, %v341_v61  ;;  %v342_v7 = vmul.f32 %v761_v30, %v306_v56 }
  0x48   : > { %v541_v10 = vmax.f32 %v509_v63, 0.0  ;;  %v510_v11 = vadd.f32 %v790_v59, %v474_v0  ;;  %v476_v12 = vadd.f32 %v444_v55, %v376_v1  ;;  %v446_v13 = vmul.f32 %v770_v40, %v410_v62 }
  0x49   : > { %572 = vst [vmem:[%s811_s22 + $0xb0] sm:$0xff] %v540_v4  ;;  %v511_v14 = vadd.f32 %v790_v59, %v475_v5  ;;  %v477_v15 = vadd.f32 %v445_v2, %v377_v6  ;;  %v378_v16 = vadd.f32 %v779_v49, %v342_v7  ;;  %v343_v17 = vmul.f32 %v761_v30, %v307_v3 }
  0x4a   : > { %573 = vst [vmem:[%s811_s22 + $0xb8] sm:$0xff] %v541_v10  ;;  %v542_v20 = vmax.f32 %v510_v11, 0.0  ;;  %v512_v21 = vadd.f32 %v790_v59, %v476_v12  ;;  %v447_v22 = vmul.f32 %v770_v40, %v411_v8  ;;  %v344_v23 = vmul.f32 %v761_v30, %v308_v9 }
  0x4b   : > { %v543_v25 = vmax.f32 %v511_v14, 0.0  ;;  %v513_v26 = vadd.f32 %v790_v59, %v477_v15  ;;  %v478_v27 = vadd.f32 %v446_v13, %v378_v16  ;;  %v379_v28 = vadd.f32 %v779_v49, %v343_v17 }
  0x4c   : > { %574 = vst [vmem:[%s811_s22 + $0xc0] sm:$0xff] %v542_v20  ;;  %v544_v29 = vmax.f32 %v512_v21, 0.0  ;;  %v380_v31 = vadd.f32 %v779_v49, %v344_v23  ;;  %v448_v32 = vmul.f32 %v770_v40, %v412_v18  ;;  %v345_v33 = vmul.f32 %v761_v30, %v309_v19 }
  0x4d   : > { %575 = vst [vmem:[%s811_s22 + $0xc8] sm:$0xff] %v543_v25  ;;  %v545_v34 = vmax.f32 %v513_v26, 0.0  ;;  %v514_v35 = vadd.f32 %v790_v59, %v478_v27  ;;  %v479_v36 = vadd.f32 %v447_v22, %v379_v28  ;;  %v449_v37 = vmul.f32 %v770_v40, %v413_v24 }
  0x4e   : > { %576 = vst [vmem:[%s811_s22 + $0xd0] sm:$0xff] %v544_v29  ;;  %v480_v38 = vadd.f32 %v448_v32, %v380_v31  ;;  %v381_v39 = vadd.f32 %v779_v49, %v345_v33 }
  0x4f   : > { %577 = vst [vmem:[%s811_s22 + $0xd8] sm:$0xff] %v545_v34  ;;  %v546_v41 = vmax.f32 %v514_v35, 0.0  ;;  %v515_v42 = vadd.f32 %v790_v59, %v479_v36 }
  0x50   : > { %v516_v30 = vadd.f32 %v790_v59, %v480_v38  ;;  %v481_v43 = vadd.f32 %v449_v37, %v381_v39 }
  0x51   : > { %578 = vst [vmem:[%s811_s22 + $0xe0] sm:$0xff] %v546_v41  ;;  %v547_v44 = vmax.f32 %v515_v42, 0.0 }
  0x52   : > { %v548_v45 = vmax.f32 %v516_v30, 0.0  ;;  %v517_v46 = vadd.f32 %v790_v59, %v481_v43 }
  0x53   : > { %579 = vst [vmem:[%s811_s22 + $0xe8] sm:$0xff] %v547_v44 }
  0x54   : > { %580 = vst [vmem:[%s811_s22 + $0xf0] sm:$0xff] %v548_v45  ;;  %v549_v40 = vmax.f32 %v517_v46, 0.0 }
  0x56   : > { %581 = vst [vmem:[%s811_s22 + $0xf8] sm:$0xff] %v549_v40 }
  0x57 PF: > { %s15_s18 = sadd.s32 1, %s681_s18  }
  0x58   : > { %p12_p4 = scmp.ge.s32.totalorder %s15_s18, 4  }
  0x5a   :  { %14 = sbr.rel (!%p12_p4) target bundleno = 1 (0x1), region = 73 }

</bundles_post_ra>
